<compile_context>
chip_gen: v6e
topology: v6e:2x2x1
jax: 0.10.0
libtpu: 0.0.40
codegen_flags: <defaults>
</compile_context>

<pallas_src>
import functools

import jax
import jax.numpy as jnp
from jax.experimental import pallas as pl
from jax.experimental.pallas import tpu as pltpu

LN_EPS = 1e-5


# ---------------------------------------------------------------------------
# Compiler params (generation-dependent VMEM limit, parallel batch axis)
# ---------------------------------------------------------------------------
@functools.lru_cache(maxsize=None)
def _vmem_limit_bytes():
    try:
        cap = int(pltpu.get_tpu_info().vmem_capacity_bytes)
    except Exception:   # older/newer jax or non-TPU tracing: conservative default
        cap = 128 * 1024 * 1024
    # Stay at/below half of physical VMEM (v7x: 64 MiB physical), never below
    # the v5e default scoped limit.
    return max(16 * 1024 * 1024, min(64 * 1024 * 1024, cap // 2))


def _compiler_params():
    return pltpu.CompilerParams(
        dimension_semantics=("parallel",),          # batch axis -> 2 TCs on v7x
        vmem_limit_bytes=_vmem_limit_bytes(),
    )


# ---------------------------------------------------------------------------
# in-kernel helpers
# ---------------------------------------------------------------------------
def _layernorm(x, gamma, beta):
    mu = jnp.mean(x, axis=-1, keepdims=True)
    var = jnp.mean((x - mu) ** 2, axis=-1, keepdims=True)
    return (x - mu) * jax.lax.rsqrt(var + LN_EPS) * gamma + beta


def _attn_body(x, ln_g, ln_b, wqkv, wproj, bproj, *, in_dim, num_heads, scale):
    """LayerNorm + QKV + multi-head softmax attention + proj + v residual.

    x: (R, dim) float32 rows of a SINGLE batch (no cross-batch entries, hence
    no additive mask).  Weight matmul operands bf16, accumulation f32.
    Returns (R, in_dim) float32.
    """
    hd = in_dim // num_heads

    xn = _layernorm(x, ln_g, ln_b)
    qkv = jnp.dot(xn.astype(jnp.bfloat16), wqkv,
                  preferred_element_type=jnp.float32)            # (R, 3*in_dim)
    # Fold the 1/sqrt(hd) scale into Q once (R*in_dim mults) instead of
    # scaling every (R, R) score matrix (num_heads*R^2 mults).
    q = qkv[:, :in_dim] * scale
    k = qkv[:, in_dim:2 * in_dim]
    v = qkv[:, 2 * in_dim:]

    heads = []
    for h in range(num_heads):                                   # static unroll
        qh = q[:, h * hd:(h + 1) * hd].astype(jnp.bfloat16)
        kh = k[:, h * hd:(h + 1) * hd].astype(jnp.bfloat16)
        vh = v[:, h * hd:(h + 1) * hd].astype(jnp.bfloat16)

        s = jax.lax.dot_general(qh, kh, (((1,), (1,)), ((), ())),
                                preferred_element_type=jnp.float32)   # (R, R)
        s = s - jnp.max(s, axis=-1, keepdims=True)
        p = jnp.exp(s)
        p = p * pl.reciprocal(jnp.sum(p, axis=-1, keepdims=True), approx=True)

        heads.append(jnp.dot(p.astype(jnp.bfloat16), vh,
                             preferred_element_type=jnp.float32))     # (R, hd)

    # One concatenation + a single K=in_dim projection matmul (contraction
    # depth num_heads*hd) instead of num_heads K=hd matmuls on sliced wproj.
    o = jnp.concatenate(heads, axis=-1)                          # (R, in_dim)
    proj = jnp.dot(o.astype(jnp.bfloat16), wproj,
                   preferred_element_type=jnp.float32) + bproj

    # sr_ratio == 1 path of the PyTorch Attention: out = v + proj(attn_out)
    return v + proj


# ---------------------------------------------------------------------------
# Kernels
# ---------------------------------------------------------------------------
def attention_kernel(x_ref, vec_ref, wqkv_ref, wproj_ref, o_ref, *,
                     dim, in_dim, num_heads, scale):
    vec = vec_ref[...]                         # packed: [ln_g; ln_b; bproj]
    out = _attn_body(x_ref[...], vec[0:1, :dim], vec[1:2, :dim],
                     wqkv_ref[...], wproj_ref[...], vec[2:3, :in_dim],
                     in_dim=in_dim, num_heads=num_heads, scale=scale)
    o_ref[...] = out.astype(o_ref.dtype)


def fused_init_mlp_kernel(*refs, dim, in_dim, hidden, num_heads, scale,
                          num_splits):
    """init-attention(norm1(x)) + sum(level splits) + (x + Mlp(norm2(x)))."""
    x_ref = refs[0]
    split_refs = refs[1:1 + num_splits]
    vec_ref, wqkv_ref, wproj_ref, w1_ref, w2_ref, o_ref = refs[1 + num_splits:]

    # packed vectors: [ln1_g; ln1_b; bproj; ln2_g; ln2_b; b1; b2]
    vec = vec_ref[...]
    out = _attn_body(x_ref[...], vec[0:1, :dim], vec[1:2, :dim],
                     wqkv_ref[...], wproj_ref[...], vec[2:3, :in_dim],
                     in_dim=in_dim, num_heads=num_heads, scale=scale)

    for s_ref in split_refs:                                     # 'add' fusion
        out = out + s_ref[...].astype(jnp.float32)

    xn = _layernorm(out, vec[3:4, :in_dim], vec[4:5, :in_dim])
    h = jnp.dot(xn.astype(jnp.bfloat16), w1_ref[...],
                preferred_element_type=jnp.float32) + vec[5:6, :hidden]
    h = jnp.maximum(h, 0.0)
    y = jnp.dot(h.astype(jnp.bfloat16), w2_ref[...],
                preferred_element_type=jnp.float32) + vec[6:7, :in_dim]

    o_ref[...] = (out + y).astype(o_ref.dtype)


# ---------------------------------------------------------------------------
# pallas_call wrappers (grid=(B,) "parallel", per-batch blocks)
# ---------------------------------------------------------------------------
def _pack_rows(rows, width):
    """Pack tiny (1, d) parameter vectors into one (n, width) f32 array so the
    kernel gets one small DMA / BlockSpec instead of one per vector."""
    out = jnp.zeros((len(rows), width), jnp.float32)
    for i, r in enumerate(rows):
        r = jnp.asarray(r, jnp.float32).reshape(-1)
        out = out.at[i, :r.shape[0]].set(r)
    return out


def run_attention(x, p, *, in_dim, num_heads, out_dtype=jnp.bfloat16):
    """One granularity-level attention: LayerNorm + Attention (sr_ratio=1)."""
    B, N, dim = x.shape
    hd = in_dim // num_heads
    scale = float(hd) ** -0.5
    width = max(dim, in_dim)
    vec = _pack_rows([p["ln_g"], p["ln_b"], p["bproj"]], width)

    kernel = functools.partial(attention_kernel, dim=dim, in_dim=in_dim,
                               num_heads=num_heads, scale=scale)
    out = pl.pallas_call(
        kernel,
        out_shape=jax.ShapeDtypeStruct((B * N, in_dim), out_dtype),
        grid=(B,),
        in_specs=[
            pl.BlockSpec((N, dim), lambda b: (b, 0)),        # this batch's rows
            pl.BlockSpec((3, width), lambda b: (0, 0)),      # packed vectors
            pl.BlockSpec((dim, 3 * in_dim), lambda b: (0, 0)),
            pl.BlockSpec((in_dim, in_dim), lambda b: (0, 0)),
        ],
        out_specs=pl.BlockSpec((N, in_dim), lambda b: (b, 0)),
        compiler_params=_compiler_params(),
    )(x.reshape(B * N, dim), vec, p["wqkv"], p["wproj"])
    return out.reshape(B, N, in_dim)


def run_fused(x, splits, pa, pm, *, in_dim, num_heads):
    """Fused init-attention + residual add of splits + MLP block."""
    B, N, dim = x.shape
    hd = in_dim // num_heads
    scale = float(hd) ** -0.5
    hidden = pm["w1"].shape[1]
    width = max(dim, in_dim, hidden)
    vec = _pack_rows([pa["ln_g"], pa["ln_b"], pa["bproj"],
                      pm["ln_g"], pm["ln_b"], pm["b1"], pm["b2"]], width)
    splits_flat = [s.reshape(B * N, in_dim) for s in splits]

    kernel = functools.partial(fused_init_mlp_kernel, dim=dim, in_dim=in_dim,
                               hidden=hidden, num_heads=num_heads, scale=scale,
                               num_splits=len(splits_flat))
    in_specs = (
        [pl.BlockSpec((N, dim), lambda b: (b, 0))]
        + [pl.BlockSpec((N, in_dim), lambda b: (b, 0)) for _ in splits_flat]
        + [
            pl.BlockSpec((7, width), lambda b: (0, 0)),      # packed vectors
            pl.BlockSpec((dim, 3 * in_dim), lambda b: (0, 0)),
            pl.BlockSpec((in_dim, in_dim), lambda b: (0, 0)),
            pl.BlockSpec((in_dim, hidden), lambda b: (0, 0)),
            pl.BlockSpec((hidden, in_dim), lambda b: (0, 0)),
        ]
    )
    out = pl.pallas_call(
        kernel,
        out_shape=jax.ShapeDtypeStruct((B * N, in_dim), jnp.float32),
        grid=(B,),
        in_specs=in_specs,
        out_specs=pl.BlockSpec((N, in_dim), lambda b: (b, 0)),
        compiler_params=_compiler_params(),
    )(x.reshape(B * N, dim), *splits_flat, vec,
      pa["wqkv"], pa["wproj"], pm["w1"], pm["w2"])
    return out.reshape(B, N, in_dim)


# ---------------------------------------------------------------------------
# Glue: unfold / fold (non-overlapping, kernel == stride) as pure reshapes.
# ---------------------------------------------------------------------------
def unfold_nonoverlap(x_nchw, k):
    B, C, H, W = x_nchw.shape
    xe = x_nchw.reshape(B, C, H // k, k, W // k, k)
    # -> (B, ph, pw, C, kh, kw) -> (B, L, C*k*k)  (torch.nn.Unfold channel order)
    return jnp.transpose(xe, (0, 2, 4, 1, 3, 5)).reshape(
        B, (H // k) * (W // k), C * k * k)


def fold_nonoverlap(patches, k, C_out, H, W):
    B = patches.shape[0]
    y = patches.reshape(B, H // k, W // k, C_out, k, k)
    return jnp.transpose(y, (0, 3, 1, 4, 2, 5)).reshape(B, C_out, H, W)


# ---------------------------------------------------------------------------
# Full forward (defaults: keep_init=True, multi_gran_opt='add')
# ---------------------------------------------------------------------------
def multi_gran_forward_pallas(x, params, *, H, in_dim, num_heads, num_levels):
    B, N, C = x.shape
    x_tmp = jnp.transpose(x, (0, 2, 1)).reshape(B, C, H, H)      # NCHW view

    splits = []
    for i in range(1, num_levels):
        k = 2 ** i
        p = params["levels"][i - 1]
        in_dim_i = in_dim * k * k
        patches = unfold_nonoverlap(x_tmp, k)                    # (B, L, C*k*k)
        att = run_attention(patches, p, in_dim=in_dim_i,
                            num_heads=num_heads)                 # bf16 output
        folded = fold_nonoverlap(att, k, in_dim, H, H)           # (B, in_dim, H, H)
        splits.append(
            jnp.transpose(folded.reshape(B, in_dim, H * H), (0, 2, 1)))

    # keep_init + 'add' + MLP block, fused into one kernel.
    return run_fused(x, splits, params["init"], params["mlp"],
                     in_dim=in_dim, num_heads=num_heads)


# ---------------------------------------------------------------------------
# Pure-JAX reference (same weights, HIGHEST precision) for verification
# ---------------------------------------------------------------------------
def ref_attention(x, p, *, in_dim, num_heads):
    HI = jax.lax.Precision.HIGHEST
    B, N, dim = x.shape
    hd = in_dim // num_heads
    scale = float(hd) ** -0.5
    wqkv = p["wqkv"].astype(jnp.float32)
    wproj = p["wproj"].astype(jnp.float32)
    xn = _layernorm(x, p["ln_g"], p["ln_b"])
    qkv = jnp.einsum("bnd,de->bne", xn, wqkv, precision=HI)
    qkv = qkv.reshape(B, N, 3, num_heads, hd).transpose(2, 0, 3, 1, 4)
    q, k, v = qkv[0], qkv[1], qkv[2]
    attn = jnp.einsum("bhqd,bhkd->bhqk", q, k, precision=HI) * scale
    attn = jax.nn.softmax(attn, axis=-1)
    o = jnp.einsum("bhqk,bhkd->bhqd", attn, v, precision=HI)
    o = o.transpose(0, 2, 1, 3).reshape(B, N, in_dim)
    proj = jnp.einsum("bne,ef->bnf", o, wproj, precision=HI) + p["bproj"]
    v_flat = v.transpose(0, 2, 1, 3).reshape(B, N, in_dim)
    return v_flat + proj


def ref_mlp(x, p):
    HI = jax.lax.Precision.HIGHEST
    w1 = p["w1"].astype(jnp.float32)
    w2 = p["w2"].astype(jnp.float32)
    xn = _layernorm(x, p["ln_g"], p["ln_b"])
    h = jnp.maximum(jnp.einsum("bnd,de->bne", xn, w1, precision=HI)
                    + p["b1"], 0.0)
    y = jnp.einsum("bnd,de->bne", h, w2, precision=HI) + p["b2"]
    return x + y


def multi_gran_forward_ref(x, params, *, H, in_dim, num_heads, num_levels):
    B, N, C = x.shape
    x_tmp = jnp.transpose(x, (0, 2, 1)).reshape(B, C, H, H)
    splits = []
    for i in range(1, num_levels):
        k = 2 ** i
        p = params["levels"][i - 1]
        in_dim_i = in_dim * k * k
        patches = unfold_nonoverlap(x_tmp, k)
        att = ref_attention(patches, p, in_dim=in_dim_i, num_heads=num_heads)
        folded = fold_nonoverlap(att, k, in_dim, H, H)
        splits.append(
            jnp.transpose(folded.reshape(B, in_dim, H * H), (0, 2, 1)))
    out = ref_attention(x, params["init"], in_dim=in_dim, num_heads=num_heads)
    for s in splits:
        out = out + s
    return ref_mlp(out, params["mlp"])


# ---------------------------------------------------------------------------
# Deterministic parameter construction (weights stored bf16, LN/bias f32)
# ---------------------------------------------------------------------------
def _attn_params(key, dim, in_dim):
    k1, k2, k3 = jax.random.split(key, 3)
    return dict(
        ln_g=jnp.ones((1, dim), jnp.float32),
        ln_b=jnp.zeros((1, dim), jnp.float32),
        wqkv=(jax.random.normal(k1, (dim, 3 * in_dim), jnp.float32)
              * 0.02).astype(jnp.bfloat16),
        wproj=(jax.random.normal(k2, (in_dim, in_dim), jnp.float32)
               * 0.02).astype(jnp.bfloat16),
        bproj=jax.random.normal(k3, (1, in_dim), jnp.float32) * 0.02,
    )


def _mlp_params(key, d, dh):
    k1, k2, k3, k4 = jax.random.split(key, 4)
    return dict(
        ln_g=jnp.ones((1, d), jnp.float32),
        ln_b=jnp.zeros((1, d), jnp.float32),
        w1=(jax.random.normal(k1, (d, dh), jnp.float32) * 0.02
            ).astype(jnp.bfloat16),
        b1=jax.random.normal(k2, (1, dh), jnp.float32) * 0.02,
        w2=(jax.random.normal(k3, (dh, d), jnp.float32) * 0.02
            ).astype(jnp.bfloat16),
        b2=jax.random.normal(k4, (1, d), jnp.float32) * 0.02,
    )


def make_params(key, *, dim, in_dim, num_levels, mlp_ratio=1.0):
    keys = jax.random.split(key, num_levels + 2)
    levels = []
    for i in range(1, num_levels):
        k = 2 ** i
        levels.append(_attn_params(keys[i - 1], dim * k * k, in_dim * k * k))
    return dict(
        levels=levels,
        init=_attn_params(keys[num_levels - 1], dim, in_dim),
        mlp=_mlp_params(keys[num_levels], in_dim, int(in_dim * mlp_ratio)),
    )


# ---------------------------------------------------------------------------
if __name__ == "__main__":
    B = 2
    H = 8                 # input_resolution
    N = H * H             # 64 tokens
    dim = 16
    in_dim = 32
    num_heads = 4
    num_levels = 2        # one extra granularity level (kernel/stride = 2)

    root = jax.random.PRNGKey(0)
    k_x, k_p = jax.random.split(root)
    x = jax.random.normal(k_x, (B, N, dim), jnp.float32)
    params = make_params(k_p, dim=dim, in_dim=in_dim, num_levels=num_levels)

    fwd = jax.jit(functools.partial(
        multi_gran_forward_pallas, H=H, in_dim=in_dim,
        num_heads=num_heads, num_levels=num_levels))
    out = jax.block_until_ready(fwd(x, params))

    ref = jax.block_until_ready(
        multi_gran_forward_ref(x, params, H=H, in_dim=in_dim,
                               num_heads=num_heads, num_levels=num_levels))

    assert out.shape == (B, N, in_dim), out.shape
    err = float(jnp.max(jnp.abs(out - ref)))
    # bf16 matmul operands + bf16 level splits + approx reciprocal vs
    # HIGHEST-precision f32 reference.
    if not jnp.allclose(out, ref, atol=3e-3, rtol=1e-2):
        raise AssertionError(
            f"Pallas kernel mismatch vs reference, max|err|={err}")

    print("KERNEL_OK")
</pallas_src>

<mosaic_0001>
module attributes {stable_mosaic.version = 11 : i64} {
  func.func @attention_kernel(%arg0: i32, %arg1: memref<16x64xf32, #tpu.memory_space<vmem>>, %arg2: memref<3x128xf32, #tpu.memory_space<vmem>>, %arg3: memref<64x384xbf16, #tpu.memory_space<vmem>>, %arg4: memref<128x128xbf16, #tpu.memory_space<vmem>>, %arg5: memref<16x128xbf16, #tpu.memory_space<vmem>>) attributes {dimension_semantics = [#tpu.dimension_semantics<parallel>], iteration_bounds = array<i64: 2>, scalar_prefetch = 0 : i64, scratch_operands = 0 : i64, tpu.core_type = #tpu.core_type<tc>, window_params = [{transform_indices = @transform_0, window_bounds = array<i64: 16, 64>}, {pipeline_mode = #tpu.pipeline_mode<synchronous>, transform_indices = @transform_1, window_bounds = array<i64: 3, 128>}, {pipeline_mode = #tpu.pipeline_mode<synchronous>, transform_indices = @transform_2, window_bounds = array<i64: 64, 384>}, {pipeline_mode = #tpu.pipeline_mode<synchronous>, transform_indices = @transform_3, window_bounds = array<i64: 128, 128>}, {transform_indices = @transform_4, window_bounds = array<i64: 16, 128>}]} {
    %c0 = arith.constant 0 : index
    %c0_0 = arith.constant 0 : index
    %0 = vector.load %arg2[%c0, %c0_0] : memref<3x128xf32, #tpu.memory_space<vmem>>, vector<3x128xf32>
    %c0_1 = arith.constant 0 : index
    %c0_2 = arith.constant 0 : index
    %1 = vector.load %arg1[%c0_1, %c0_2] : memref<16x64xf32, #tpu.memory_space<vmem>>, vector<16x64xf32>
    %2 = vector.extract_strided_slice %0 {offsets = [0, 0], sizes = [1, 64], strides = [1, 1]} : vector<3x128xf32> to vector<1x64xf32>
    %3 = vector.extract_strided_slice %0 {offsets = [1, 0], sizes = [1, 64], strides = [1, 1]} : vector<3x128xf32> to vector<1x64xf32>
    %c0_3 = arith.constant 0 : index
    %c0_4 = arith.constant 0 : index
    %4 = vector.load %arg3[%c0_3, %c0_4] : memref<64x384xbf16, #tpu.memory_space<vmem>>, vector<64x384xbf16>
    %c0_5 = arith.constant 0 : index
    %c0_6 = arith.constant 0 : index
    %5 = vector.load %arg4[%c0_5, %c0_6] : memref<128x128xbf16, #tpu.memory_space<vmem>>, vector<128x128xbf16>
    %6 = vector.extract_strided_slice %0 {offsets = [2, 0], sizes = [1, 128], strides = [1, 1]} : vector<3x128xf32> to vector<1x128xf32>
    %cst = arith.constant dense<0.000000e+00> : vector<16xf32>
    %7 = vector.multi_reduction <add>, %1, %cst [1] : vector<16x64xf32> to vector<16xf32>
    %8 = vector.shape_cast %7 : vector<16xf32> to vector<16x1xf32>
    %cst_7 = arith.constant 6.400000e+01 : f32
    %9 = vector.broadcast %cst_7 : f32 to vector<16x1xf32>
    %10 = arith.divf %8, %9 : vector<16x1xf32>
    %11 = vector.broadcast %10 : vector<16x1xf32> to vector<16x64xf32>
    %12 = arith.subf %1, %11 : vector<16x64xf32>
    %13 = arith.mulf %12, %12 : vector<16x64xf32>
    %cst_8 = arith.constant dense<0.000000e+00> : vector<16xf32>
    %14 = vector.multi_reduction <add>, %13, %cst_8 [1] : vector<16x64xf32> to vector<16xf32>
    %15 = vector.shape_cast %14 : vector<16xf32> to vector<16x1xf32>
    %cst_9 = arith.constant 6.400000e+01 : f32
    %16 = vector.broadcast %cst_9 : f32 to vector<16x1xf32>
    %17 = arith.divf %15, %16 : vector<16x1xf32>
    %18 = vector.broadcast %10 : vector<16x1xf32> to vector<16x64xf32>
    %19 = arith.subf %1, %18 : vector<16x64xf32>
    %cst_10 = arith.constant 9.99999974E-6 : f32
    %20 = vector.broadcast %cst_10 : f32 to vector<16x1xf32>
    %21 = arith.addf %17, %20 : vector<16x1xf32>
    %22 = math.rsqrt %21 : vector<16x1xf32>
    %23 = vector.broadcast %22 : vector<16x1xf32> to vector<16x64xf32>
    %24 = arith.mulf %19, %23 : vector<16x64xf32>
    %25 = vector.broadcast %2 : vector<1x64xf32> to vector<16x64xf32>
    %26 = arith.mulf %24, %25 : vector<16x64xf32>
    %27 = vector.broadcast %3 : vector<1x64xf32> to vector<16x64xf32>
    %28 = arith.addf %26, %27 : vector<16x64xf32>
    %29 = arith.truncf %28 : vector<16x64xf32> to vector<16x64xbf16>
    %cst_11 = arith.constant dense<0.000000e+00> : vector<16x384xf32>
    %30 = tpu.matmul %29, %4, %cst_11 {dimension_numbers = #tpu.dot_dimension_numbers<[1], [0], [0], [1], [0, 0, 1, 1], [], []>} : vector<16x64xbf16>, vector<64x384xbf16>, vector<16x384xf32> -> vector<16x384xf32>
    %31 = vector.extract_strided_slice %30 {offsets = [0, 0], sizes = [16, 128], strides = [1, 1]} : vector<16x384xf32> to vector<16x128xf32>
    %cst_12 = arith.constant 0.176776692 : f32
    %32 = vector.broadcast %cst_12 : f32 to vector<16x128xf32>
    %33 = arith.mulf %31, %32 : vector<16x128xf32>
    %34 = vector.extract_strided_slice %30 {offsets = [0, 128], sizes = [16, 128], strides = [1, 1]} : vector<16x384xf32> to vector<16x128xf32>
    %35 = vector.extract_strided_slice %30 {offsets = [0, 256], sizes = [16, 128], strides = [1, 1]} : vector<16x384xf32> to vector<16x128xf32>
    %36 = vector.extract_strided_slice %33 {offsets = [0, 0], sizes = [16, 32], strides = [1, 1]} : vector<16x128xf32> to vector<16x32xf32>
    %37 = arith.truncf %36 : vector<16x32xf32> to vector<16x32xbf16>
    %38 = vector.extract_strided_slice %34 {offsets = [0, 0], sizes = [16, 32], strides = [1, 1]} : vector<16x128xf32> to vector<16x32xf32>
    %39 = arith.truncf %38 : vector<16x32xf32> to vector<16x32xbf16>
    %40 = vector.extract_strided_slice %35 {offsets = [0, 0], sizes = [16, 32], strides = [1, 1]} : vector<16x128xf32> to vector<16x32xf32>
    %41 = arith.truncf %40 : vector<16x32xf32> to vector<16x32xbf16>
    %cst_13 = arith.constant dense<0.000000e+00> : vector<16x16xf32>
    %42 = tpu.matmul %37, %39, %cst_13 {dimension_numbers = #tpu.dot_dimension_numbers<[1], [1], [0], [0], [0, 0, 1, 0], [], []>} : vector<16x32xbf16>, vector<16x32xbf16>, vector<16x16xf32> -> vector<16x16xf32>
    %cst_14 = arith.constant dense<0xFF800000> : vector<16xf32>
    %43 = vector.multi_reduction <maximumf>, %42, %cst_14 [1] : vector<16x16xf32> to vector<16xf32>
    %44 = vector.shape_cast %43 : vector<16xf32> to vector<16x1xf32>
    %45 = vector.broadcast %44 : vector<16x1xf32> to vector<16x16xf32>
    %46 = arith.subf %42, %45 : vector<16x16xf32>
    %47 = math.exp %46 : vector<16x16xf32>
    %cst_15 = arith.constant dense<0.000000e+00> : vector<16xf32>
    %48 = vector.multi_reduction <add>, %47, %cst_15 [1] : vector<16x16xf32> to vector<16xf32>
    %49 = vector.shape_cast %48 : vector<16xf32> to vector<16x1xf32>
    %50 = tpu.reciprocal %49 {approx = true} : vector<16x1xf32> -> vector<16x1xf32>
    %51 = vector.broadcast %50 : vector<16x1xf32> to vector<16x16xf32>
    %52 = arith.mulf %47, %51 : vector<16x16xf32>
    %53 = arith.truncf %52 : vector<16x16xf32> to vector<16x16xbf16>
    %cst_16 = arith.constant dense<0.000000e+00> : vector<16x32xf32>
    %54 = tpu.matmul %53, %41, %cst_16 {dimension_numbers = #tpu.dot_dimension_numbers<[1], [0], [0], [1], [0, 0, 1, 1], [], []>} : vector<16x16xbf16>, vector<16x32xbf16>, vector<16x32xf32> -> vector<16x32xf32>
    %55 = vector.extract_strided_slice %33 {offsets = [0, 32], sizes = [16, 32], strides = [1, 1]} : vector<16x128xf32> to vector<16x32xf32>
    %56 = arith.truncf %55 : vector<16x32xf32> to vector<16x32xbf16>
    %57 = vector.extract_strided_slice %34 {offsets = [0, 32], sizes = [16, 32], strides = [1, 1]} : vector<16x128xf32> to vector<16x32xf32>
    %58 = arith.truncf %57 : vector<16x32xf32> to vector<16x32xbf16>
    %59 = vector.extract_strided_slice %35 {offsets = [0, 32], sizes = [16, 32], strides = [1, 1]} : vector<16x128xf32> to vector<16x32xf32>
    %60 = arith.truncf %59 : vector<16x32xf32> to vector<16x32xbf16>
    %cst_17 = arith.constant dense<0.000000e+00> : vector<16x16xf32>
    %61 = tpu.matmul %56, %58, %cst_17 {dimension_numbers = #tpu.dot_dimension_numbers<[1], [1], [0], [0], [0, 0, 1, 0], [], []>} : vector<16x32xbf16>, vector<16x32xbf16>, vector<16x16xf32> -> vector<16x16xf32>
    %cst_18 = arith.constant dense<0xFF800000> : vector<16xf32>
    %62 = vector.multi_reduction <maximumf>, %61, %cst_18 [1] : vector<16x16xf32> to vector<16xf32>
    %63 = vector.shape_cast %62 : vector<16xf32> to vector<16x1xf32>
    %64 = vector.broadcast %63 : vector<16x1xf32> to vector<16x16xf32>
    %65 = arith.subf %61, %64 : vector<16x16xf32>
    %66 = math.exp %65 : vector<16x16xf32>
    %cst_19 = arith.constant dense<0.000000e+00> : vector<16xf32>
    %67 = vector.multi_reduction <add>, %66, %cst_19 [1] : vector<16x16xf32> to vector<16xf32>
    %68 = vector.shape_cast %67 : vector<16xf32> to vector<16x1xf32>
    %69 = tpu.reciprocal %68 {approx = true} : vector<16x1xf32> -> vector<16x1xf32>
    %70 = vector.broadcast %69 : vector<16x1xf32> to vector<16x16xf32>
    %71 = arith.mulf %66, %70 : vector<16x16xf32>
    %72 = arith.truncf %71 : vector<16x16xf32> to vector<16x16xbf16>
    %cst_20 = arith.constant dense<0.000000e+00> : vector<16x32xf32>
    %73 = tpu.matmul %72, %60, %cst_20 {dimension_numbers = #tpu.dot_dimension_numbers<[1], [0], [0], [1], [0, 0, 1, 1], [], []>} : vector<16x16xbf16>, vector<16x32xbf16>, vector<16x32xf32> -> vector<16x32xf32>
    %74 = vector.extract_strided_slice %33 {offsets = [0, 64], sizes = [16, 32], strides = [1, 1]} : vector<16x128xf32> to vector<16x32xf32>
    %75 = arith.truncf %74 : vector<16x32xf32> to vector<16x32xbf16>
    %76 = vector.extract_strided_slice %34 {offsets = [0, 64], sizes = [16, 32], strides = [1, 1]} : vector<16x128xf32> to vector<16x32xf32>
    %77 = arith.truncf %76 : vector<16x32xf32> to vector<16x32xbf16>
    %78 = vector.extract_strided_slice %35 {offsets = [0, 64], sizes = [16, 32], strides = [1, 1]} : vector<16x128xf32> to vector<16x32xf32>
    %79 = arith.truncf %78 : vector<16x32xf32> to vector<16x32xbf16>
    %cst_21 = arith.constant dense<0.000000e+00> : vector<16x16xf32>
    %80 = tpu.matmul %75, %77, %cst_21 {dimension_numbers = #tpu.dot_dimension_numbers<[1], [1], [0], [0], [0, 0, 1, 0], [], []>} : vector<16x32xbf16>, vector<16x32xbf16>, vector<16x16xf32> -> vector<16x16xf32>
    %cst_22 = arith.constant dense<0xFF800000> : vector<16xf32>
    %81 = vector.multi_reduction <maximumf>, %80, %cst_22 [1] : vector<16x16xf32> to vector<16xf32>
    %82 = vector.shape_cast %81 : vector<16xf32> to vector<16x1xf32>
    %83 = vector.broadcast %82 : vector<16x1xf32> to vector<16x16xf32>
    %84 = arith.subf %80, %83 : vector<16x16xf32>
    %85 = math.exp %84 : vector<16x16xf32>
    %cst_23 = arith.constant dense<0.000000e+00> : vector<16xf32>
    %86 = vector.multi_reduction <add>, %85, %cst_23 [1] : vector<16x16xf32> to vector<16xf32>
    %87 = vector.shape_cast %86 : vector<16xf32> to vector<16x1xf32>
    %88 = tpu.reciprocal %87 {approx = true} : vector<16x1xf32> -> vector<16x1xf32>
    %89 = vector.broadcast %88 : vector<16x1xf32> to vector<16x16xf32>
    %90 = arith.mulf %85, %89 : vector<16x16xf32>
    %91 = arith.truncf %90 : vector<16x16xf32> to vector<16x16xbf16>
    %cst_24 = arith.constant dense<0.000000e+00> : vector<16x32xf32>
    %92 = tpu.matmul %91, %79, %cst_24 {dimension_numbers = #tpu.dot_dimension_numbers<[1], [0], [0], [1], [0, 0, 1, 1], [], []>} : vector<16x16xbf16>, vector<16x32xbf16>, vector<16x32xf32> -> vector<16x32xf32>
    %93 = vector.extract_strided_slice %33 {offsets = [0, 96], sizes = [16, 32], strides = [1, 1]} : vector<16x128xf32> to vector<16x32xf32>
    %94 = arith.truncf %93 : vector<16x32xf32> to vector<16x32xbf16>
    %95 = vector.extract_strided_slice %34 {offsets = [0, 96], sizes = [16, 32], strides = [1, 1]} : vector<16x128xf32> to vector<16x32xf32>
    %96 = arith.truncf %95 : vector<16x32xf32> to vector<16x32xbf16>
    %97 = vector.extract_strided_slice %35 {offsets = [0, 96], sizes = [16, 32], strides = [1, 1]} : vector<16x128xf32> to vector<16x32xf32>
    %98 = arith.truncf %97 : vector<16x32xf32> to vector<16x32xbf16>
    %cst_25 = arith.constant dense<0.000000e+00> : vector<16x16xf32>
    %99 = tpu.matmul %94, %96, %cst_25 {dimension_numbers = #tpu.dot_dimension_numbers<[1], [1], [0], [0], [0, 0, 1, 0], [], []>} : vector<16x32xbf16>, vector<16x32xbf16>, vector<16x16xf32> -> vector<16x16xf32>
    %cst_26 = arith.constant dense<0xFF800000> : vector<16xf32>
    %100 = vector.multi_reduction <maximumf>, %99, %cst_26 [1] : vector<16x16xf32> to vector<16xf32>
    %101 = vector.shape_cast %100 : vector<16xf32> to vector<16x1xf32>
    %102 = vector.broadcast %101 : vector<16x1xf32> to vector<16x16xf32>
    %103 = arith.subf %99, %102 : vector<16x16xf32>
    %104 = math.exp %103 : vector<16x16xf32>
    %cst_27 = arith.constant dense<0.000000e+00> : vector<16xf32>
    %105 = vector.multi_reduction <add>, %104, %cst_27 [1] : vector<16x16xf32> to vector<16xf32>
    %106 = vector.shape_cast %105 : vector<16xf32> to vector<16x1xf32>
    %107 = tpu.reciprocal %106 {approx = true} : vector<16x1xf32> -> vector<16x1xf32>
    %108 = vector.broadcast %107 : vector<16x1xf32> to vector<16x16xf32>
    %109 = arith.mulf %104, %108 : vector<16x16xf32>
    %110 = arith.truncf %109 : vector<16x16xf32> to vector<16x16xbf16>
    %cst_28 = arith.constant dense<0.000000e+00> : vector<16x32xf32>
    %111 = tpu.matmul %110, %98, %cst_28 {dimension_numbers = #tpu.dot_dimension_numbers<[1], [0], [0], [1], [0, 0, 1, 1], [], []>} : vector<16x16xbf16>, vector<16x32xbf16>, vector<16x32xf32> -> vector<16x32xf32>
    %112 = tpu.concatenate %54, %73, %92, %111 in 1 : vector<16x32xf32>, vector<16x32xf32>, vector<16x32xf32>, vector<16x32xf32> -> vector<16x128xf32>
    %113 = arith.truncf %112 : vector<16x128xf32> to vector<16x128xbf16>
    %cst_29 = arith.constant dense<0.000000e+00> : vector<16x128xf32>
    %114 = tpu.matmul %113, %5, %cst_29 {dimension_numbers = #tpu.dot_dimension_numbers<[1], [0], [0], [1], [0, 0, 1, 1], [], []>} : vector<16x128xbf16>, vector<128x128xbf16>, vector<16x128xf32> -> vector<16x128xf32>
    %115 = vector.broadcast %6 : vector<1x128xf32> to vector<16x128xf32>
    %116 = arith.addf %114, %115 : vector<16x128xf32>
    %117 = arith.addf %35, %116 : vector<16x128xf32>
    %118 = arith.truncf %117 : vector<16x128xf32> to vector<16x128xbf16>
    %c0_30 = arith.constant 0 : index
    %c0_31 = arith.constant 0 : index
    %119 = vector.load %arg5[%c0_30, %c0_31] : memref<16x128xbf16, #tpu.memory_space<vmem>>, vector<16x128xbf16>
    tpu.vector_store %arg5[%c0_30, %c0_31], %118 {strides = array<i32>} : memref<16x128xbf16, #tpu.memory_space<vmem>>, vector<16x128xbf16>,
    return
  }
  func.func @transform_0(%arg0: i32) -> (i32, i32) {
    %c0_i32 = arith.constant 0 : i32
    %c0_i32_0 = arith.constant 0 : i32
    return %arg0, %c0_i32 : i32, i32
  }
  func.func @transform_1(%arg0: i32) -> (i32, i32) {
    %c0_i32 = arith.constant 0 : i32
    %c0_i32_0 = arith.constant 0 : i32
    %c0_i32_1 = arith.constant 0 : i32
    return %c0_i32, %c0_i32_0 : i32, i32
  }
  func.func @transform_2(%arg0: i32) -> (i32, i32) {
    %c0_i32 = arith.constant 0 : i32
    %c0_i32_0 = arith.constant 0 : i32
    %c0_i32_1 = arith.constant 0 : i32
    return %c0_i32, %c0_i32_0 : i32, i32
  }
  func.func @transform_3(%arg0: i32) -> (i32, i32) {
    %c0_i32 = arith.constant 0 : i32
    %c0_i32_0 = arith.constant 0 : i32
    %c0_i32_1 = arith.constant 0 : i32
    return %c0_i32, %c0_i32_0 : i32, i32
  }
  func.func @transform_4(%arg0: i32) -> (i32, i32) {
    %c0_i32 = arith.constant 0 : i32
    %c0_i32_0 = arith.constant 0 : i32
    return %arg0, %c0_i32 : i32, i32
  }
}

module attributes {stable_mosaic.version = 11 : i64} {
  func.func @fused_init_mlp_kernel(%arg0: i32, %arg1: memref<64x16xf32, #tpu.memory_space<vmem>>, %arg2: memref<64x32xbf16, #tpu.memory_space<vmem>>, %arg3: memref<7x32xf32, #tpu.memory_space<vmem>>, %arg4: memref<16x96xbf16, #tpu.memory_space<vmem>>, %arg5: memref<32x32xbf16, #tpu.memory_space<vmem>>, %arg6: memref<32x32xbf16, #tpu.memory_space<vmem>>, %arg7: memref<32x32xbf16, #tpu.memory_space<vmem>>, %arg8: memref<64x32xf32, #tpu.memory_space<vmem>>) attributes {dimension_semantics = [#tpu.dimension_semantics<parallel>], iteration_bounds = array<i64: 2>, scalar_prefetch = 0 : i64, scratch_operands = 0 : i64, tpu.core_type = #tpu.core_type<tc>, window_params = [{transform_indices = @transform_0, window_bounds = array<i64: 64, 16>}, {transform_indices = @transform_1, window_bounds = array<i64: 64, 32>}, {pipeline_mode = #tpu.pipeline_mode<synchronous>, transform_indices = @transform_2, window_bounds = array<i64: 7, 32>}, {pipeline_mode = #tpu.pipeline_mode<synchronous>, transform_indices = @transform_3, window_bounds = array<i64: 16, 96>}, {pipeline_mode = #tpu.pipeline_mode<synchronous>, transform_indices = @transform_4, window_bounds = array<i64: 32, 32>}, {pipeline_mode = #tpu.pipeline_mode<synchronous>, transform_indices = @transform_5, window_bounds = array<i64: 32, 32>}, {pipeline_mode = #tpu.pipeline_mode<synchronous>, transform_indices = @transform_6, window_bounds = array<i64: 32, 32>}, {transform_indices = @transform_7, window_bounds = array<i64: 64, 32>}]} {
    %c0 = arith.constant 0 : index
    %c0_0 = arith.constant 0 : index
    %0 = vector.load %arg3[%c0, %c0_0] : memref<7x32xf32, #tpu.memory_space<vmem>>, vector<7x32xf32>
    %c0_1 = arith.constant 0 : index
    %c0_2 = arith.constant 0 : index
    %1 = vector.load %arg1[%c0_1, %c0_2] : memref<64x16xf32, #tpu.memory_space<vmem>>, vector<64x16xf32>
    %2 = vector.extract_strided_slice %0 {offsets = [0, 0], sizes = [1, 16], strides = [1, 1]} : vector<7x32xf32> to vector<1x16xf32>
    %3 = vector.extract_strided_slice %0 {offsets = [1, 0], sizes = [1, 16], strides = [1, 1]} : vector<7x32xf32> to vector<1x16xf32>
    %c0_3 = arith.constant 0 : index
    %c0_4 = arith.constant 0 : index
    %4 = vector.load %arg4[%c0_3, %c0_4] : memref<16x96xbf16, #tpu.memory_space<vmem>>, vector<16x96xbf16>
    %c0_5 = arith.constant 0 : index
    %c0_6 = arith.constant 0 : index
    %5 = vector.load %arg5[%c0_5, %c0_6] : memref<32x32xbf16, #tpu.memory_space<vmem>>, vector<32x32xbf16>
    %6 = vector.extract_strided_slice %0 {offsets = [2, 0], sizes = [1, 32], strides = [1, 1]} : vector<7x32xf32> to vector<1x32xf32>
    %cst = arith.constant dense<0.000000e+00> : vector<64xf32>
    %7 = vector.multi_reduction <add>, %1, %cst [1] : vector<64x16xf32> to vector<64xf32>
    %8 = vector.shape_cast %7 : vector<64xf32> to vector<64x1xf32>
    %cst_7 = arith.constant 1.600000e+01 : f32
    %9 = vector.broadcast %cst_7 : f32 to vector<64x1xf32>
    %10 = arith.divf %8, %9 : vector<64x1xf32>
    %11 = vector.broadcast %10 : vector<64x1xf32> to vector<64x16xf32>
    %12 = arith.subf %1, %11 : vector<64x16xf32>
    %13 = arith.mulf %12, %12 : vector<64x16xf32>
    %cst_8 = arith.constant dense<0.000000e+00> : vector<64xf32>
    %14 = vector.multi_reduction <add>, %13, %cst_8 [1] : vector<64x16xf32> to vector<64xf32>
    %15 = vector.shape_cast %14 : vector<64xf32> to vector<64x1xf32>
    %cst_9 = arith.constant 1.600000e+01 : f32
    %16 = vector.broadcast %cst_9 : f32 to vector<64x1xf32>
    %17 = arith.divf %15, %16 : vector<64x1xf32>
    %18 = vector.broadcast %10 : vector<64x1xf32> to vector<64x16xf32>
    %19 = arith.subf %1, %18 : vector<64x16xf32>
    %cst_10 = arith.constant 9.99999974E-6 : f32
    %20 = vector.broadcast %cst_10 : f32 to vector<64x1xf32>
    %21 = arith.addf %17, %20 : vector<64x1xf32>
    %22 = math.rsqrt %21 : vector<64x1xf32>
    %23 = vector.broadcast %22 : vector<64x1xf32> to vector<64x16xf32>
    %24 = arith.mulf %19, %23 : vector<64x16xf32>
    %25 = vector.broadcast %2 : vector<1x16xf32> to vector<64x16xf32>
    %26 = arith.mulf %24, %25 : vector<64x16xf32>
    %27 = vector.broadcast %3 : vector<1x16xf32> to vector<64x16xf32>
    %28 = arith.addf %26, %27 : vector<64x16xf32>
    %29 = arith.truncf %28 : vector<64x16xf32> to vector<64x16xbf16>
    %cst_11 = arith.constant dense<0.000000e+00> : vector<64x96xf32>
    %30 = tpu.matmul %29, %4, %cst_11 {dimension_numbers = #tpu.dot_dimension_numbers<[1], [0], [0], [1], [0, 0, 1, 1], [], []>} : vector<64x16xbf16>, vector<16x96xbf16>, vector<64x96xf32> -> vector<64x96xf32>
    %31 = vector.extract_strided_slice %30 {offsets = [0, 0], sizes = [64, 32], strides = [1, 1]} : vector<64x96xf32> to vector<64x32xf32>
    %cst_12 = arith.constant 0.353553385 : f32
    %32 = vector.broadcast %cst_12 : f32 to vector<64x32xf32>
    %33 = arith.mulf %31, %32 : vector<64x32xf32>
    %34 = vector.extract_strided_slice %30 {offsets = [0, 32], sizes = [64, 32], strides = [1, 1]} : vector<64x96xf32> to vector<64x32xf32>
    %35 = vector.extract_strided_slice %30 {offsets = [0, 64], sizes = [64, 32], strides = [1, 1]} : vector<64x96xf32> to vector<64x32xf32>
    %36 = vector.extract_strided_slice %33 {offsets = [0, 0], sizes = [64, 8], strides = [1, 1]} : vector<64x32xf32> to vector<64x8xf32>
    %37 = arith.truncf %36 : vector<64x8xf32> to vector<64x8xbf16>
    %38 = vector.extract_strided_slice %34 {offsets = [0, 0], sizes = [64, 8], strides = [1, 1]} : vector<64x32xf32> to vector<64x8xf32>
    %39 = arith.truncf %38 : vector<64x8xf32> to vector<64x8xbf16>
    %40 = vector.extract_strided_slice %35 {offsets = [0, 0], sizes = [64, 8], strides = [1, 1]} : vector<64x32xf32> to vector<64x8xf32>
    %41 = arith.truncf %40 : vector<64x8xf32> to vector<64x8xbf16>
    %cst_13 = arith.constant dense<0.000000e+00> : vector<64x64xf32>
    %42 = tpu.matmul %37, %39, %cst_13 {dimension_numbers = #tpu.dot_dimension_numbers<[1], [1], [0], [0], [0, 0, 1, 0], [], []>} : vector<64x8xbf16>, vector<64x8xbf16>, vector<64x64xf32> -> vector<64x64xf32>
    %cst_14 = arith.constant dense<0xFF800000> : vector<64xf32>
    %43 = vector.multi_reduction <maximumf>, %42, %cst_14 [1] : vector<64x64xf32> to vector<64xf32>
    %44 = vector.shape_cast %43 : vector<64xf32> to vector<64x1xf32>
    %45 = vector.broadcast %44 : vector<64x1xf32> to vector<64x64xf32>
    %46 = arith.subf %42, %45 : vector<64x64xf32>
    %47 = math.exp %46 : vector<64x64xf32>
    %cst_15 = arith.constant dense<0.000000e+00> : vector<64xf32>
    %48 = vector.multi_reduction <add>, %47, %cst_15 [1] : vector<64x64xf32> to vector<64xf32>
    %49 = vector.shape_cast %48 : vector<64xf32> to vector<64x1xf32>
    %50 = tpu.reciprocal %49 {approx = true} : vector<64x1xf32> -> vector<64x1xf32>
    %51 = vector.broadcast %50 : vector<64x1xf32> to vector<64x64xf32>
    %52 = arith.mulf %47, %51 : vector<64x64xf32>
    %53 = arith.truncf %52 : vector<64x64xf32> to vector<64x64xbf16>
    %cst_16 = arith.constant dense<0.000000e+00> : vector<64x8xf32>
    %54 = tpu.matmul %53, %41, %cst_16 {dimension_numbers = #tpu.dot_dimension_numbers<[1], [0], [0], [1], [0, 0, 1, 1], [], []>} : vector<64x64xbf16>, vector<64x8xbf16>, vector<64x8xf32> -> vector<64x8xf32>
    %55 = vector.extract_strided_slice %33 {offsets = [0, 8], sizes = [64, 8], strides = [1, 1]} : vector<64x32xf32> to vector<64x8xf32>
    %56 = arith.truncf %55 : vector<64x8xf32> to vector<64x8xbf16>
    %57 = vector.extract_strided_slice %34 {offsets = [0, 8], sizes = [64, 8], strides = [1, 1]} : vector<64x32xf32> to vector<64x8xf32>
    %58 = arith.truncf %57 : vector<64x8xf32> to vector<64x8xbf16>
    %59 = vector.extract_strided_slice %35 {offsets = [0, 8], sizes = [64, 8], strides = [1, 1]} : vector<64x32xf32> to vector<64x8xf32>
    %60 = arith.truncf %59 : vector<64x8xf32> to vector<64x8xbf16>
    %cst_17 = arith.constant dense<0.000000e+00> : vector<64x64xf32>
    %61 = tpu.matmul %56, %58, %cst_17 {dimension_numbers = #tpu.dot_dimension_numbers<[1], [1], [0], [0], [0, 0, 1, 0], [], []>} : vector<64x8xbf16>, vector<64x8xbf16>, vector<64x64xf32> -> vector<64x64xf32>
    %cst_18 = arith.constant dense<0xFF800000> : vector<64xf32>
    %62 = vector.multi_reduction <maximumf>, %61, %cst_18 [1] : vector<64x64xf32> to vector<64xf32>
    %63 = vector.shape_cast %62 : vector<64xf32> to vector<64x1xf32>
    %64 = vector.broadcast %63 : vector<64x1xf32> to vector<64x64xf32>
    %65 = arith.subf %61, %64 : vector<64x64xf32>
    %66 = math.exp %65 : vector<64x64xf32>
    %cst_19 = arith.constant dense<0.000000e+00> : vector<64xf32>
    %67 = vector.multi_reduction <add>, %66, %cst_19 [1] : vector<64x64xf32> to vector<64xf32>
    %68 = vector.shape_cast %67 : vector<64xf32> to vector<64x1xf32>
    %69 = tpu.reciprocal %68 {approx = true} : vector<64x1xf32> -> vector<64x1xf32>
    %70 = vector.broadcast %69 : vector<64x1xf32> to vector<64x64xf32>
    %71 = arith.mulf %66, %70 : vector<64x64xf32>
    %72 = arith.truncf %71 : vector<64x64xf32> to vector<64x64xbf16>
    %cst_20 = arith.constant dense<0.000000e+00> : vector<64x8xf32>
    %73 = tpu.matmul %72, %60, %cst_20 {dimension_numbers = #tpu.dot_dimension_numbers<[1], [0], [0], [1], [0, 0, 1, 1], [], []>} : vector<64x64xbf16>, vector<64x8xbf16>, vector<64x8xf32> -> vector<64x8xf32>
    %74 = vector.extract_strided_slice %33 {offsets = [0, 16], sizes = [64, 8], strides = [1, 1]} : vector<64x32xf32> to vector<64x8xf32>
    %75 = arith.truncf %74 : vector<64x8xf32> to vector<64x8xbf16>
    %76 = vector.extract_strided_slice %34 {offsets = [0, 16], sizes = [64, 8], strides = [1, 1]} : vector<64x32xf32> to vector<64x8xf32>
    %77 = arith.truncf %76 : vector<64x8xf32> to vector<64x8xbf16>
    %78 = vector.extract_strided_slice %35 {offsets = [0, 16], sizes = [64, 8], strides = [1, 1]} : vector<64x32xf32> to vector<64x8xf32>
    %79 = arith.truncf %78 : vector<64x8xf32> to vector<64x8xbf16>
    %cst_21 = arith.constant dense<0.000000e+00> : vector<64x64xf32>
    %80 = tpu.matmul %75, %77, %cst_21 {dimension_numbers = #tpu.dot_dimension_numbers<[1], [1], [0], [0], [0, 0, 1, 0], [], []>} : vector<64x8xbf16>, vector<64x8xbf16>, vector<64x64xf32> -> vector<64x64xf32>
    %cst_22 = arith.constant dense<0xFF800000> : vector<64xf32>
    %81 = vector.multi_reduction <maximumf>, %80, %cst_22 [1] : vector<64x64xf32> to vector<64xf32>
    %82 = vector.shape_cast %81 : vector<64xf32> to vector<64x1xf32>
    %83 = vector.broadcast %82 : vector<64x1xf32> to vector<64x64xf32>
    %84 = arith.subf %80, %83 : vector<64x64xf32>
    %85 = math.exp %84 : vector<64x64xf32>
    %cst_23 = arith.constant dense<0.000000e+00> : vector<64xf32>
    %86 = vector.multi_reduction <add>, %85, %cst_23 [1] : vector<64x64xf32> to vector<64xf32>
    %87 = vector.shape_cast %86 : vector<64xf32> to vector<64x1xf32>
    %88 = tpu.reciprocal %87 {approx = true} : vector<64x1xf32> -> vector<64x1xf32>
    %89 = vector.broadcast %88 : vector<64x1xf32> to vector<64x64xf32>
    %90 = arith.mulf %85, %89 : vector<64x64xf32>
    %91 = arith.truncf %90 : vector<64x64xf32> to vector<64x64xbf16>
    %cst_24 = arith.constant dense<0.000000e+00> : vector<64x8xf32>
    %92 = tpu.matmul %91, %79, %cst_24 {dimension_numbers = #tpu.dot_dimension_numbers<[1], [0], [0], [1], [0, 0, 1, 1], [], []>} : vector<64x64xbf16>, vector<64x8xbf16>, vector<64x8xf32> -> vector<64x8xf32>
    %93 = vector.extract_strided_slice %33 {offsets = [0, 24], sizes = [64, 8], strides = [1, 1]} : vector<64x32xf32> to vector<64x8xf32>
    %94 = arith.truncf %93 : vector<64x8xf32> to vector<64x8xbf16>
    %95 = vector.extract_strided_slice %34 {offsets = [0, 24], sizes = [64, 8], strides = [1, 1]} : vector<64x32xf32> to vector<64x8xf32>
    %96 = arith.truncf %95 : vector<64x8xf32> to vector<64x8xbf16>
    %97 = vector.extract_strided_slice %35 {offsets = [0, 24], sizes = [64, 8], strides = [1, 1]} : vector<64x32xf32> to vector<64x8xf32>
    %98 = arith.truncf %97 : vector<64x8xf32> to vector<64x8xbf16>
    %cst_25 = arith.constant dense<0.000000e+00> : vector<64x64xf32>
    %99 = tpu.matmul %94, %96, %cst_25 {dimension_numbers = #tpu.dot_dimension_numbers<[1], [1], [0], [0], [0, 0, 1, 0], [], []>} : vector<64x8xbf16>, vector<64x8xbf16>, vector<64x64xf32> -> vector<64x64xf32>
    %cst_26 = arith.constant dense<0xFF800000> : vector<64xf32>
    %100 = vector.multi_reduction <maximumf>, %99, %cst_26 [1] : vector<64x64xf32> to vector<64xf32>
    %101 = vector.shape_cast %100 : vector<64xf32> to vector<64x1xf32>
    %102 = vector.broadcast %101 : vector<64x1xf32> to vector<64x64xf32>
    %103 = arith.subf %99, %102 : vector<64x64xf32>
    %104 = math.exp %103 : vector<64x64xf32>
    %cst_27 = arith.constant dense<0.000000e+00> : vector<64xf32>
    %105 = vector.multi_reduction <add>, %104, %cst_27 [1] : vector<64x64xf32> to vector<64xf32>
    %106 = vector.shape_cast %105 : vector<64xf32> to vector<64x1xf32>
    %107 = tpu.reciprocal %106 {approx = true} : vector<64x1xf32> -> vector<64x1xf32>
    %108 = vector.broadcast %107 : vector<64x1xf32> to vector<64x64xf32>
    %109 = arith.mulf %104, %108 : vector<64x64xf32>
    %110 = arith.truncf %109 : vector<64x64xf32> to vector<64x64xbf16>
    %cst_28 = arith.constant dense<0.000000e+00> : vector<64x8xf32>
    %111 = tpu.matmul %110, %98, %cst_28 {dimension_numbers = #tpu.dot_dimension_numbers<[1], [0], [0], [1], [0, 0, 1, 1], [], []>} : vector<64x64xbf16>, vector<64x8xbf16>, vector<64x8xf32> -> vector<64x8xf32>
    %112 = tpu.concatenate %54, %73, %92, %111 in 1 : vector<64x8xf32>, vector<64x8xf32>, vector<64x8xf32>, vector<64x8xf32> -> vector<64x32xf32>
    %113 = arith.truncf %112 : vector<64x32xf32> to vector<64x32xbf16>
    %cst_29 = arith.constant dense<0.000000e+00> : vector<64x32xf32>
    %114 = tpu.matmul %113, %5, %cst_29 {dimension_numbers = #tpu.dot_dimension_numbers<[1], [0], [0], [1], [0, 0, 1, 1], [], []>} : vector<64x32xbf16>, vector<32x32xbf16>, vector<64x32xf32> -> vector<64x32xf32>
    %115 = vector.broadcast %6 : vector<1x32xf32> to vector<64x32xf32>
    %116 = arith.addf %114, %115 : vector<64x32xf32>
    %117 = arith.addf %35, %116 : vector<64x32xf32>
    %c0_30 = arith.constant 0 : index
    %c0_31 = arith.constant 0 : index
    %118 = vector.load %arg2[%c0_30, %c0_31] : memref<64x32xbf16, #tpu.memory_space<vmem>>, vector<64x32xbf16>
    %119 = arith.extf %118 : vector<64x32xbf16> to vector<64x32xf32>
    %120 = arith.addf %117, %119 : vector<64x32xf32>
    %121 = vector.extract_strided_slice %0 {offsets = [3, 0], sizes = [1, 32], strides = [1, 1]} : vector<7x32xf32> to vector<1x32xf32>
    %122 = vector.extract_strided_slice %0 {offsets = [4, 0], sizes = [1, 32], strides = [1, 1]} : vector<7x32xf32> to vector<1x32xf32>
    %cst_32 = arith.constant dense<0.000000e+00> : vector<64xf32>
    %123 = vector.multi_reduction <add>, %120, %cst_32 [1] : vector<64x32xf32> to vector<64xf32>
    %124 = vector.shape_cast %123 : vector<64xf32> to vector<64x1xf32>
    %cst_33 = arith.constant 3.200000e+01 : f32
    %125 = vector.broadcast %cst_33 : f32 to vector<64x1xf32>
    %126 = arith.divf %124, %125 : vector<64x1xf32>
    %127 = vector.broadcast %126 : vector<64x1xf32> to vector<64x32xf32>
    %128 = arith.subf %120, %127 : vector<64x32xf32>
    %129 = arith.mulf %128, %128 : vector<64x32xf32>
    %cst_34 = arith.constant dense<0.000000e+00> : vector<64xf32>
    %130 = vector.multi_reduction <add>, %129, %cst_34 [1] : vector<64x32xf32> to vector<64xf32>
    %131 = vector.shape_cast %130 : vector<64xf32> to vector<64x1xf32>
    %cst_35 = arith.constant 3.200000e+01 : f32
    %132 = vector.broadcast %cst_35 : f32 to vector<64x1xf32>
    %133 = arith.divf %131, %132 : vector<64x1xf32>
    %134 = vector.broadcast %126 : vector<64x1xf32> to vector<64x32xf32>
    %135 = arith.subf %120, %134 : vector<64x32xf32>
    %cst_36 = arith.constant 9.99999974E-6 : f32
    %136 = vector.broadcast %cst_36 : f32 to vector<64x1xf32>
    %137 = arith.addf %133, %136 : vector<64x1xf32>
    %138 = math.rsqrt %137 : vector<64x1xf32>
    %139 = vector.broadcast %138 : vector<64x1xf32> to vector<64x32xf32>
    %140 = arith.mulf %135, %139 : vector<64x32xf32>
    %141 = vector.broadcast %121 : vector<1x32xf32> to vector<64x32xf32>
    %142 = arith.mulf %140, %141 : vector<64x32xf32>
    %143 = vector.broadcast %122 : vector<1x32xf32> to vector<64x32xf32>
    %144 = arith.addf %142, %143 : vector<64x32xf32>
    %145 = arith.truncf %144 : vector<64x32xf32> to vector<64x32xbf16>
    %c0_37 = arith.constant 0 : index
    %c0_38 = arith.constant 0 : index
    %146 = vector.load %arg6[%c0_37, %c0_38] : memref<32x32xbf16, #tpu.memory_space<vmem>>, vector<32x32xbf16>
    %cst_39 = arith.constant dense<0.000000e+00> : vector<64x32xf32>
    %147 = tpu.matmul %145, %146, %cst_39 {dimension_numbers = #tpu.dot_dimension_numbers<[1], [0], [0], [1], [0, 0, 1, 1], [], []>} : vector<64x32xbf16>, vector<32x32xbf16>, vector<64x32xf32> -> vector<64x32xf32>
    %148 = vector.extract_strided_slice %0 {offsets = [5, 0], sizes = [1, 32], strides = [1, 1]} : vector<7x32xf32> to vector<1x32xf32>
    %149 = vector.broadcast %148 : vector<1x32xf32> to vector<64x32xf32>
    %150 = arith.addf %147, %149 : vector<64x32xf32>
    %cst_40 = arith.constant 0.000000e+00 : f32
    %151 = vector.broadcast %cst_40 : f32 to vector<64x32xf32>
    %152 = arith.maximumf %150, %151 : vector<64x32xf32>
    %153 = arith.truncf %152 : vector<64x32xf32> to vector<64x32xbf16>
    %c0_41 = arith.constant 0 : index
    %c0_42 = arith.constant 0 : index
    %154 = vector.load %arg7[%c0_41, %c0_42] : memref<32x32xbf16, #tpu.memory_space<vmem>>, vector<32x32xbf16>
    %cst_43 = arith.constant dense<0.000000e+00> : vector<64x32xf32>
    %155 = tpu.matmul %153, %154, %cst_43 {dimension_numbers = #tpu.dot_dimension_numbers<[1], [0], [0], [1], [0, 0, 1, 1], [], []>} : vector<64x32xbf16>, vector<32x32xbf16>, vector<64x32xf32> -> vector<64x32xf32>
    %156 = vector.extract_strided_slice %0 {offsets = [6, 0], sizes = [1, 32], strides = [1, 1]} : vector<7x32xf32> to vector<1x32xf32>
    %157 = vector.broadcast %156 : vector<1x32xf32> to vector<64x32xf32>
    %158 = arith.addf %155, %157 : vector<64x32xf32>
    %159 = arith.addf %120, %158 : vector<64x32xf32>
    %c0_44 = arith.constant 0 : index
    %c0_45 = arith.constant 0 : index
    %160 = vector.load %arg8[%c0_44, %c0_45] : memref<64x32xf32, #tpu.memory_space<vmem>>, vector<64x32xf32>
    tpu.vector_store %arg8[%c0_44, %c0_45], %159 {strides = array<i32>} : memref<64x32xf32, #tpu.memory_space<vmem>>, vector<64x32xf32>,
    return
  }
  func.func @transform_0(%arg0: i32) -> (i32, i32) {
    %c0_i32 = arith.constant 0 : i32
    %c0_i32_0 = arith.constant 0 : i32
    return %arg0, %c0_i32 : i32, i32
  }
  func.func @transform_1(%arg0: i32) -> (i32, i32) {
    %c0_i32 = arith.constant 0 : i32
    %c0_i32_0 = arith.constant 0 : i32
    return %arg0, %c0_i32 : i32, i32
  }
  func.func @transform_2(%arg0: i32) -> (i32, i32) {
    %c0_i32 = arith.constant 0 : i32
    %c0_i32_0 = arith.constant 0 : i32
    %c0_i32_1 = arith.constant 0 : i32
    return %c0_i32, %c0_i32_0 : i32, i32
  }
  func.func @transform_3(%arg0: i32) -> (i32, i32) {
    %c0_i32 = arith.constant 0 : i32
    %c0_i32_0 = arith.constant 0 : i32
    %c0_i32_1 = arith.constant 0 : i32
    return %c0_i32, %c0_i32_0 : i32, i32
  }
  func.func @transform_4(%arg0: i32) -> (i32, i32) {
    %c0_i32 = arith.constant 0 : i32
    %c0_i32_0 = arith.constant 0 : i32
    %c0_i32_1 = arith.constant 0 : i32
    return %c0_i32, %c0_i32_0 : i32, i32
  }
  func.func @transform_5(%arg0: i32) -> (i32, i32) {
    %c0_i32 = arith.constant 0 : i32
    %c0_i32_0 = arith.constant 0 : i32
    %c0_i32_1 = arith.constant 0 : i32
    return %c0_i32, %c0_i32_0 : i32, i32
  }
  func.func @transform_6(%arg0: i32) -> (i32, i32) {
    %c0_i32 = arith.constant 0 : i32
    %c0_i32_0 = arith.constant 0 : i32
    %c0_i32_1 = arith.constant 0 : i32
    return %c0_i32, %c0_i32_0 : i32, i32
  }
  func.func @transform_7(%arg0: i32) -> (i32, i32) {
    %c0_i32 = arith.constant 0 : i32
    %c0_i32_0 = arith.constant 0 : i32
    return %arg0, %c0_i32 : i32, i32
  }
}

</mosaic_0001>

<bundles_post_ra>
// kernel: multi_gran_forward_pallas.2
= control target key start
LH: loop header
LB: loop body
LE: loop exit
PB: predicated region body
PF: predicated region fallthrough
CT: control target
= control target key end

     0   :  { %s1397_s15 = smov 0   ;;  %s1599_s0 = inlined_call_operand.vmem [shape: f32[32,64], index: 0, kind: input, shape index: {}]   ;;  %s1600_s1 = inlined_call_operand.vmem [shape: f32[3,128], index: 1, kind: input, shape index: {}]   ;;  %s1601_s2 = inlined_call_operand.vmem [shape: bf16[64,384], index: 2, kind: input, shape index: {}]   ;;  %s1602_s3 = inlined_call_operand.vmem [shape: bf16[128,128], index: 3, kind: input, shape index: {}]   ;;  %s1603_s4 = inlined_call_operand.vmem [shape: bf16[32,128], index: 4, kind: output, shape index: {}]  }
   0x1 LB: > { %s1109_s16 = sadd.s32 4294967295, %s1364_s15   ;;  %p1113_p0 = scmp.ge.s32.totalorder %s1364_s15, 1  ;;  %s1364_s15 = sphi %s1397_s15, %s14_s15  }
   0x2   : > { %p163_p1 = scmp.lt.s32.totalorder %s1364_s15, 3 }
   0x4   : > { %p164_p2 = pnand %p1113_p0, %p163_p1 }
   0x5   : > { %s1114_s17 = sshll.u32 (!%p164_p2), %s1109_s16, 1  ;;  %s1369_s24 = smov (!%p164_p2), 96  }
   0x6   : > { %167 = sbr.rel (%p164_p2) target bundleno = 1748 (0x6d4), region = 36  ;;  %p190_p3 = scmp.lt.s32.totalorder (!%p164_p2), %s1114_s17, 3 }
   0x7   : > { %s1370_s25 = smov (!%p164_p2), 64   ;;  %s1371_s26 = smov (!%p164_p2), 32  }
   0xb   : > { %s1605_s17 = smov (!%p190_p3, %s1114_s17), 3  ;;  %vm237_vm0 = vcmask 523264   ;;  %v1298_v14 = vld [vmem:[%s1601_s2 + $0x4c] ss:$12 sps:$4 sm:$0xff]   ;;  %v1300_v15 = vld [vmem:[%s1601_s2 + $0x48] ss:$12 sps:$4 sm:$0xff]   ;;  %v265_v30 = vlaneseq }
   0xc   : > { %s1115_s18 = sshll.u32 %s1605_s17, 3  ;;  %v1301_v16 = vld [vmem:[%s1601_s2 + $0x34] ss:$12 sps:$4 sm:$0xff]   ;;  %353 = vmatprep.subr.bf16.mxu1 %v1298_v14  ;;  %v1303_v17 = vld [vmem:[%s1601_s2 + $0x30] ss:$12 sps:$4 sm:$0xff]   ;;  %v1366_v18 = vmov 0  }
   0xd   : > { %s193_s21 = scalar_lea.vmem %s1599_s0, %s1115_s18  ;;  %354 = vmatpush1.bf16.msra.mxu1 %v1300_v15  ;;  %377 = vmatprep.mubr.bf16.mxu1 %v1366_v18  ;;  %v1304_v19 = vld [vmem:[%s1601_s2 + $0x1c] ss:$12 sps:$4 sm:$0xff]   ;;  %v1367_v20 = vmov 0.0   ;;  %v1306_v21 = vld [vmem:[%s1601_s2 + $0x18] ss:$12 sps:$4 sm:$0xff]   ;;  %vm1368_vm1 = vmmov 0  }
   0xe   : > { %v203_v0 = vld [vmem:[%s193_s21] sm:$0xff]  ;;  %v204_v1 = vld [vmem:[%s193_s21 + $0x8] sm:$0xff]  ;;  %355 = vmatprep.subr.bf16.mxu1 %v1301_v16  ;;  %1201 = vmatprep.subr.bf16.mxu0 %v1367_v20  ;;  %v1443_v31 = vshrl.u32 %v265_v30, 7  ;;  %v1310_v45 = vld [vmem:[%s1601_s2 + $0x50] ss:$12 sps:$4 sm:$0xff]   ;;  %vm434_vm2 = vcmask 261120  }
   0xf   : > { %v238_v2 = vsel %vm237_vm0, %v203_v0, 0.0  ;;  %v241_v3 = vsel %vm237_vm0, %v204_v1, 0.0  ;;  %v1307_v22 = vld [vmem:[%s1601_s2 + $0x4] ss:$12 sps:$4 sm:$0xff]   ;;  %v1309_v23 = vld [vmem:[%s1601_s2] ss:$12 sps:$4 sm:$0xff]   ;;  %1203 = vmatprep.mubr.msk.bf16.mxu0 %vm1368_vm1, %v1367_v20 }
  0x10   : > { %239 = vadd.xlane.f32.xlu0 %v238_v2  ;;  %v267_v32 = vsub.s32 0, %v1443_v31  ;;  %v1449_v33 = vld [vmem:[%s1600_s1] sm:$0x7]  ;;  %v273_v37 = vsub.s32 1, %v1443_v31  ;;  %v1311_v47 = vld [vmem:[%s1601_s2 + $0x38] ss:$12 sps:$4 sm:$0xff]  }
  0x11   : > { %356 = vmatpush1.bf16.msra.mxu1 %v1303_v17  ;;  %v1312_v48 = vld [vmem:[%s1601_s2 + $0x20] ss:$12 sps:$4 sm:$0xff]   ;;  %v1313_v49 = vld [vmem:[%s1601_s2 + $0x8] ss:$12 sps:$4 sm:$0xff]   ;;  %vm482_vm3 = vcmask 130048   ;;  %vm944_vm4 = vcmask 785408  }
  0x12   : > { %357 = vmatprep.subr.bf16.mxu1 %v1304_v19  ;;  %v268_v36 = vrot.slane %v1449_v33, %v267_v32  ;;  %v274_v41 = vrot.slane %v1449_v33, %v273_v37  ;;  %s1117_s19 = sshll.u32 %s1605_s17, 2 }
  0x13   : > { %s199_s22 = scalar_lea.vmem %s1603_s4, %s1117_s19 }
  0x14   : > { %242 = vadd.xlane.f32.xlu0 %v241_v3 }
  0x15   : > { %358 = vmatpush1.bf16.msra.mxu1 %v1306_v21 }
  0x16   : > { %359 = vmatprep.subr.bf16.mxu1 %v1307_v22 }
  0x19   : > { %360 = vmatpush1.bf16.msra.mxu1 %v1309_v23 }
  0x1a   : > { %1189 = vmatprep.subr.bf16.mxu1 %v1367_v20 }
  0x99   : > { %v240_v4 = vpop.xlane.xlu0 %239 }
  0x9a   : > { %v245_v5 = vmul.f32 0.015625, %v240_v4 }
  0x9c   : > { %v247_v6 = vsub.f32 %v203_v0, %v245_v5 }
  0x9d   : > { %v243_v7 = vpop.xlane.xlu0 %242 }
  0x9e   : > { %v246_v8 = vmul.f32 0.015625, %v243_v7  ;;  %v249_v9 = vmul.f32 %v247_v6, %v247_v6 }
  0xa0   : > { %v248_v10 = vsub.f32 %v204_v1, %v246_v8  ;;  %v251_v11 = vsel %vm237_vm0, %v249_v9, 0.0 }
  0xa1   : > { %252 = vadd.xlane.f32.xlu1 %v251_v11 }
  0xa2   : > { %v250_v12 = vmul.f32 %v248_v10, %v248_v10 }
  0xa4   : > { %v254_v13 = vsel %vm237_vm0, %v250_v12, 0.0 }
  0xa5   : > { %255 = vadd.xlane.f32.xlu1 %v254_v13 }
 0x12a   : > { %v253_v24 = vpop.xlane.xlu1 %252 }
 0x12b   : > { %v257_v25 = vmul.f32 0.015625, %v253_v24 }
 0x12d   : > { %v259_v26 = vadd.f32 1e-05, %v257_v25 }
 0x12e   : > { %v256_v27 = vpop.xlane.xlu1 %255 }
 0x12f   : > { %1322 = vrsqrt.f32 %v259_v26  ;;  %v258_v28 = vmul.f32 0.015625, %v256_v27 }
 0x131   : > { %v260_v29 = vadd.f32 1e-05, %v258_v28 }
 0x133   : > { %1324 = vrsqrt.f32 %v260_v29 }
 0x13c   : > { %v1323_v34 = vpop.eup %1322 }
 0x13d   : > { %v263_v35 = vmul.f32 %v1323_v34, %v247_v6 }
 0x13f   : > { %v269_v40 = vmul.f32 %v268_v36, %v263_v35 }
 0x140   : > { %v1325_v38 = vpop.eup %1324 }
 0x141   : > { %v264_v39 = vmul.f32 %v1325_v38, %v248_v10  ;;  %v275_v43 = vadd.f32 %v274_v41, %v269_v40 }
 0x143   : > { %v270_v42 = vmul.f32 %v268_v36, %v264_v39 }
 0x145   : > { %v276_v44 = vadd.f32 %v274_v41, %v270_v42 }
 0x147   : > { %v277_v46 = vpack.c.bf16 %v276_v44, %v275_v43 }
 0x149   : > { %1130 = vmatmul.mubr.msk.bf16.vlgmr.msra.gmra.mxu1 %vm237_vm0, %v277_v46 }
 0x14a   : > { %1190 = vmatpush3.bf16.msra.mxu1 %v1310_v45  ;;  %1197 = vmatprep.mubr.msk.bf16.mxu1 %vm1368_vm1, %v1367_v20 }
 0x14b   : > { %1191 = vmatprep.subr.bf16.mxu1 %v1367_v20 }
 0x14e   : > { %1192 = vmatpush3.bf16.msra.mxu1 %v1311_v47 }
 0x14f   : > { %1193 = vmatprep.subr.bf16.mxu1 %v1367_v20 }
 0x152   : > { %1194 = vmatpush3.bf16.msra.mxu1 %v1312_v48 }
 0x153   : > { %1195 = vmatprep.subr.bf16.mxu1 %v1367_v20 }
 0x156   : > { %1196 = vmatpush3.bf16.msra.mxu1 %v1313_v49 }
 0x157   : > { %1207 = vmatprep.subr.bf16.mxu1 %v1367_v20 }
 0x159   : > { %1198 = vmatmul.mubr.msk.bf16.vlgmr.msra.gmra.mxu1 %vm237_vm0, %v277_v46 }
 0x15a   : > { %1209 = vmatprep.mubr.msk.bf16.mxu1 %vm1368_vm1, %v1367_v20 }
 0x209   : > { %v379_v50 = vpop.f32.mrf.mxu1 }
 0x20a   : > { %v429_v53 = vmul.f32 0.17677669, %v379_v50 }
 0x20b   : > { %v381_v51 = vpop.f32.mrf.mxu1 }
 0x20d   : > { %v383_v52 = vpop.f32.mrf.mxu1 }
 0x20e   : > { %v430_v54 = vmul.f32 0.17677669, %v383_v52 }
 0x20f   : > { %v385_v55 = vpop.f32.mrf.mxu1 }
 0x210   : > { %v431_v56 = vpack.c.bf16 %v430_v54, %v429_v53  ;;  %v432_v57 = vpack.c.bf16 %v385_v55, %v381_v51 }
 0x212   : > { %551 = vrot.lane.b32.xlu1 %v431_v56, %s1369_s24  ;;  %554 = vrot.lane.b32.xlu0 %v432_v57, %s1369_s24  ;;  %v439_v58 = vsel %vm434_vm2, %v432_v57, 0 }
 0x213   : > { %1202 = vmatpush3.bf16.xpose.msra.mxu0 %v439_v58 }
 0x214   : > { %1213 = vmatprep.subr.bf16.mxu0 %v1367_v20 }
 0x216   : > { %676 = vrot.lane.b32.xlu1 %v432_v57, %s1370_s25  ;;  %797 = vrot.lane.b32.xlu0 %v432_v57, %s1371_s26 }
 0x219   : > { %v1482_v59 = vpop.f32.mrf.mxu1 }
 0x21a   : > { %674 = vrot.lane.b32.xlu1 %v431_v56, %s1370_s25  ;;  %1204 = vmatmul.mubr.msk.bf16.vlgmr.msra.gmra.mxu0 %vm434_vm2, %v431_v56 }
 0x21b   : > { %v1199_v60 = vpop.f32.mrf.mxu1  ;;  %1215 = vmatprep.mubr.msk.bf16.mxu0 %vm1368_vm1, %v1367_v20 }
 0x21d   : > { %v1488_v61 = vpop.f32.mrf.mxu1 }
 0x21e   : > { %v1492_v62 = vpack.c.bf16 %v1488_v61, %v1482_v59  ;;  %795 = vrot.lane.b32.xlu1 %v431_v56, %s1371_s26 }
 0x21f   : > { %v1200_v63 = vpop.f32.mrf.mxu1 }
 0x220   : > { %1208 = vmatpush3.bf16.msra.mxu1 %v1492_v62 }
 0x221   : > { %1219 = vmatprep.subr.bf16.mxu1 %v1367_v20 }
 0x284   : > { %v552_v0 = vpop.permute.xlu1 %551  ;;  %v555_v1 = vpop.permute.xlu0 %554 }
 0x285   : > { %v560_v2 = vsel %vm434_vm2, %v555_v1, 0 }
 0x286   : > { %1214 = vmatpush3.bf16.xpose.msra.mxu0 %v560_v2 }
 0x287   : > { %1225 = vmatprep.subr.bf16.mxu0 %v1367_v20 }
 0x288   : > { %v677_v3 = vpop.permute.xlu1 %676  ;;  %v798_v5 = vpop.permute.xlu0 %797 }
 0x289   : > { %v682_v4 = vsel %vm434_vm2, %v677_v3, 0  ;;  %v803_v7 = vsel %vm434_vm2, %v798_v5, 0 }
 0x28c   : > { %v675_v6 = vpop.permute.xlu1 %674 }
 0x28d   : > { %1216 = vmatmul.mubr.msk.bf16.vlgmr.msra.gmra.mxu0 %vm434_vm2, %v552_v0 }
 0x28e   : > { %1226 = vmatpush3.bf16.xpose.msra.mxu0 %v682_v4  ;;  %1227 = vmatprep.mubr.msk.bf16.mxu0 %vm1368_vm1, %v1367_v20 }
 0x28f   : > { %1237 = vmatprep.subr.bf16.mxu0 %v1367_v20 }
 0x290   : > { %v796_v8 = vpop.permute.xlu1 %795 }
 0x295   : > { %1228 = vmatmul.mubr.msk.bf16.vlgmr.msra.gmra.mxu0 %vm434_vm2, %v675_v6 }
 0x296   : > { %1238 = vmatpush3.bf16.xpose.msra.mxu0 %v803_v7  ;;  %1239 = vmatprep.mubr.msk.bf16.mxu0 %vm1368_vm1, %v1367_v20 }
 0x297   : > { %1249 = vmatprep.subr.bf16.mxu0 %v1367_v20 }
 0x29d   : > { %1240 = vmatmul.mubr.msk.bf16.vlgmr.msra.gmra.mxu0 %vm434_vm2, %v796_v8 }
 0x29e   : > { %1265 = vmatprep.mubr.msk.bf16.mxu0 %vm1368_vm1, %v1367_v20 }
 0x2da   : > { %v475_v9 = vpop.f32.mrf.mxu0 }
 0x2db   : > { %v483_v10 = vsel %vm482_vm3, %v475_v9, -inf }
 0x2dc   : > { %484 = vmax.xlane.f32.xlu0 %v483_v10  ;;  %v1205_v11 = vpop.f32.mrf.mxu0 }
 0x2de   : > { %v478_v12 = vpop.f32.mrf.mxu0 }
 0x2df   : > { %v486_v13 = vsel %vm482_vm3, %v478_v12, -inf }
 0x2e0   : > { %487 = vmax.xlane.f32.xlu1 %v486_v13  ;;  %v1206_v14 = vpop.f32.mrf.mxu0 }
 0x34d   : > { %v596_v15 = vpop.f32.mrf.mxu0 }
 0x34e   : > { %v603_v16 = vsel %vm482_vm3, %v596_v15, -inf }
 0x34f   : > { %604 = vmax.xlane.f32.xlu0 %v603_v16  ;;  %v1217_v17 = vpop.f32.mrf.mxu0 }
 0x351   : > { %v599_v18 = vpop.f32.mrf.mxu0 }
 0x352   : > { %v606_v19 = vsel %vm482_vm3, %v599_v18, -inf }
 0x353   : > { %607 = vmax.xlane.f32.xlu0 %v606_v19  ;;  %v1218_v21 = vpop.f32.mrf.mxu0 }
 0x355   : > { %v718_v22 = vpop.f32.mrf.mxu0 }
 0x356   : > { %v725_v23 = vsel %vm482_vm3, %v718_v22, -inf }
 0x357   : > { %726 = vmax.xlane.f32.xlu0 %v725_v23  ;;  %v1229_v24 = vpop.f32.mrf.mxu0 }
 0x359   : > { %v721_v25 = vpop.f32.mrf.mxu0 }
 0x35a   : > { %v728_v26 = vsel %vm482_vm3, %v721_v25, -inf }
 0x35b   : > { %729 = vmax.xlane.f32.xlu1 %v728_v26  ;;  %v1230_v27 = vpop.f32.mrf.mxu0 }
 0x35d   : > { %v839_v28 = vpop.f32.mrf.mxu0 }
 0x35e   : > { %v846_v29 = vsel %vm482_vm3, %v839_v28, -inf }
 0x35f   : > { %847 = vmax.xlane.f32.xlu0 %v846_v29  ;;  %v1241_v30 = vpop.f32.mrf.mxu0 }
 0x361   : > { %v1519_v32 = vpop.f32.mrf.mxu0 }
 0x362   : > { %v849_v34 = vsel %vm482_vm3, %v1519_v32, -inf }
 0x363   : > { %850 = vmax.xlane.f32.xlu1 %v849_v34  ;;  %v1242_v35 = vpop.f32.mrf.mxu0 }
 0x365   : > { %v485_v36 = vpop.xlane.xlu0 %484 }
 0x366   : > { %v489_v37 = vsub.f32 %v475_v9, %v485_v36 }
 0x368   : > { %v491_v38 = vmul.f32 1.442695, %v489_v37 }
 0x369   : > { %v488_v39 = vpop.xlane.xlu1 %487 }
 0x36a   : > { %1326 = vpow2.f32 %v491_v38  ;;  %v490_v40 = vsub.f32 %v478_v12, %v488_v39 }
 0x36c   : > { %v493_v41 = vmul.f32 1.442695, %v490_v40 }
 0x36e   : > { %1328 = vpow2.f32 %v493_v41 }
 0x377   : > { %v1327_v42 = vpop.eup %1326 }
 0x378   : > { %v495_v43 = vsel %vm482_vm3, %v1327_v42, 0.0 }
 0x379   : > { %496 = vadd.xlane.f32.xlu0 %v495_v43 }
 0x37b   : > { %v1329_v44 = vpop.eup %1328 }
 0x37c   : > { %v498_v45 = vsel %vm482_vm3, %v1329_v44, 0.0 }
 0x37d   : > { %499 = vadd.xlane.f32.xlu1 %v498_v45 }
 0x3d8   : > { %v605_v46 = vpop.xlane.xlu0 %604 }
 0x3d9   : > { %v609_v47 = vsub.f32 %v596_v15, %v605_v46 }
 0x3db   : > { %v611_v48 = vmul.f32 1.442695, %v609_v47 }
 0x3dc   : > { %v608_v49 = vpop.xlane.xlu0 %607 }
 0x3dd   : > { %1330 = vpow2.f32 %v611_v48  ;;  %v610_v50 = vsub.f32 %v599_v18, %v608_v49 }
 0x3df   : > { %v613_v51 = vmul.f32 1.442695, %v610_v50 }
 0x3e0   : > { %v727_v52 = vpop.xlane.xlu0 %726 }
 0x3e1   : > { %1332 = vpow2.f32 %v613_v51  ;;  %v731_v53 = vsub.f32 %v718_v22, %v727_v52 }
 0x3e3   : > { %v733_v54 = vmul.f32 1.442695, %v731_v53 }
 0x3e4   : > { %v730_v55 = vpop.xlane.xlu1 %729 }
 0x3e5   : > { %1334 = vpow2.f32 %v733_v54  ;;  %v732_v56 = vsub.f32 %v721_v25, %v730_v55  ;;  %v1314_v55 = vld [vmem:[%s1602_s3 + $0x38] sm:$0xff]  }
 0x3e6   : > { %1250 = vmatpush3.bf16.msra.mxu0 %v1314_v55 }
 0x3e7   : > { %v735_v57 = vmul.f32 1.442695, %v732_v56  ;;  %1251 = vmatprep.subr.bf16.mxu0 %v1367_v20 }
 0x3e8   : > { %v848_v58 = vpop.xlane.xlu0 %847 }
 0x3e9   : > { %1336 = vpow2.f32 %v735_v57  ;;  %v852_v60 = vsub.f32 %v839_v28, %v848_v58  ;;  %v1315_v58 = vld [vmem:[%s1602_s3 + $0x30] sm:$0xff]  }
 0x3ea   : > { %v1331_v63 = vpop.eup %1330  ;;  %1252 = vmatpush3.bf16.msra.mxu0 %v1315_v58 }
 0x3eb   : > { %v854_v0 = vmul.f32 1.442695, %v852_v60  ;;  %v615_v1 = vsel %vm482_vm3, %v1331_v63, 0.0  ;;  %1253 = vmatprep.subr.bf16.mxu0 %v1367_v20 }
 0x3ec   : > { %616 = vadd.xlane.f32.xlu0 %v615_v1  ;;  %v851_v10 = vpop.xlane.xlu1 %850 }
 0x3ed   : > { %1338 = vpow2.f32 %v854_v0  ;;  %v853_v15 = vsub.f32 %v1519_v32, %v851_v10  ;;  %v1316_v0 = vld [vmem:[%s1602_s3 + $0x28] sm:$0xff]  }
 0x3ee   : > { %v1333_v2 = vpop.eup %1332  ;;  %1254 = vmatpush3.bf16.msra.mxu0 %v1316_v0 }
 0x3ef   : > { %v618_v3 = vsel %vm482_vm3, %v1333_v2, 0.0  ;;  %v856_v19 = vmul.f32 1.442695, %v853_v15  ;;  %1255 = vmatprep.subr.bf16.mxu0 %v1367_v20 }
 0x3f0   : > { %619 = vadd.xlane.f32.xlu1 %v618_v3 }
 0x3f2   : > { %v1335_v4 = vpop.eup %1334 }
 0x3f3   : > { %v737_v5 = vsel %vm482_vm3, %v1335_v4, 0.0 }
 0x3f4   : > { %738 = vadd.xlane.f32.xlu0 %v737_v5  ;;  %v1318_v5 = vld [vmem:[%s1602_s3 + $0x18] sm:$0xff]  }
 0x3f6   : > { %v1337_v6 = vpop.eup %1336 }
 0x3f7   : > { %v740_v7 = vsel %vm482_vm3, %v1337_v6, 0.0 }
 0x3f8   : > { %741 = vadd.xlane.f32.xlu1 %v740_v7  ;;  %v1320_v7 = vld [vmem:[%s1602_s3 + $0x8] sm:$0xff]  }
 0x3fa   : > { %v1339_v8 = vpop.eup %1338 }
 0x3fb   : > { %v858_v9 = vsel %vm482_vm3, %v1339_v8, 0.0 }
 0x3fc   : > { %859 = vadd.xlane.f32.xlu0 %v858_v9 }
 0x402   : > { %v497_v11 = vpop.xlane.xlu0 %496 }
 0x403   : > { %1340 = vrcp.f32 %v497_v11 }
 0x406   : > { %v500_v12 = vpop.xlane.xlu1 %499 }
 0x407   : > { %1342 = vrcp.f32 %v500_v12 }
 0x408   : > { %1344 = vpow2.f32 %v856_v19 }
 0x409   : > { %748 = vrot.lane.b32.xlu1 %v1492_v62, %s1370_s25 }
 0x410   : > { %v1341_v13 = vpop.eup %1340 }
 0x411   : > { %v503_v16 = vmul.f32 %v1341_v13, %v1327_v42 }
 0x412   : > { %627 = vrot.lane.b32.xlu0 %v1492_v62, %s1369_s24 }
 0x414   : > { %v1343_v14 = vpop.eup %1342 }
 0x415   : > { %v504_v17 = vmul.f32 %v1343_v14, %v1329_v44  ;;  %v1345_v21 = vpop.eup %1344 }
 0x416   : > { %v861_v22 = vsel %vm482_vm3, %v1345_v21, 0.0 }
 0x417   : > { %v505_v18 = vpack.c.bf16 %v504_v17, %v503_v16 }
 0x419   : > { %1210 = vmatmul.mubr.msk.bf16.vlgmr.msra.gmra.mxu1 %vm482_vm3, %v505_v18 }
 0x41a   : > { %1221 = vmatprep.mubr.msk.bf16.mxu1 %vm1368_vm1, %v1367_v20 }
 0x42d   : > { %862 = vadd.xlane.f32.xlu1 %v861_v22 }
 0x43e   : > { %869 = vrot.lane.b32.xlu1 %v1492_v62, %s1371_s26 }
 0x475   : > { %v617_v23 = vpop.xlane.xlu0 %616 }
 0x476   : > { %1346 = vrcp.f32 %v617_v23 }
 0x479   : > { %v620_v24 = vpop.xlane.xlu1 %619 }
 0x47a   : > { %1348 = vrcp.f32 %v620_v24 }
 0x47d   : > { %v739_v25 = vpop.xlane.xlu0 %738 }
 0x47e   : > { %1350 = vrcp.f32 %v739_v25 }
 0x481   : > { %v742_v26 = vpop.xlane.xlu1 %741 }
 0x482   : > { %1352 = vrcp.f32 %v742_v26 }
 0x483   : > { %v1347_v27 = vpop.eup %1346 }
 0x484   : > { %v623_v30 = vmul.f32 %v1347_v27, %v1331_v63 }
 0x485   : > { %v860_v28 = vpop.xlane.xlu0 %859  ;;  %v749_v62 = vpop.permute.xlu1 %748 }
 0x486   : > { %1354 = vrcp.f32 %v860_v28 }
 0x487   : > { %v1349_v29 = vpop.eup %1348 }
 0x488   : > { %v624_v32 = vmul.f32 %v1349_v29, %v1333_v2 }
 0x489   : > { %v628_v34 = vpop.permute.xlu0 %627 }
 0x48a   : > { %1220 = vmatpush3.bf16.msra.mxu1 %v628_v34  ;;  %v625_v35 = vpack.c.bf16 %v624_v32, %v623_v30  ;;  %v950_v30 = vsub.s32 2, %v1443_v31 }
 0x48b   : > { %1231 = vmatprep.subr.bf16.mxu1 %v1367_v20  ;;  %v1351_v36 = vpop.eup %1350 }
 0x48c   : > { %v745_v38 = vmul.f32 %v1351_v36, %v1335_v4  ;;  %v1317_v4 = vld [vmem:[%s1602_s3 + $0x20] sm:$0xff]   ;;  %v951_v32 = vrot.slane %v1449_v33, %v950_v30 }
 0x48d   : > { %1222 = vmatmul.mubr.msk.bf16.vlgmr.msra.gmra.mxu1 %vm482_vm3, %v625_v35  ;;  %1256 = vmatpush3.bf16.msra.mxu0 %v1317_v4 }
 0x48e   : > { %1232 = vmatpush3.bf16.msra.mxu1 %v749_v62  ;;  %1233 = vmatprep.mubr.msk.bf16.mxu1 %vm1368_vm1, %v1367_v20 }
 0x48f   : > { %v1353_v37 = vpop.eup %1352  ;;  %1243 = vmatprep.subr.bf16.mxu1 %v1367_v20  ;;  %1257 = vmatprep.subr.bf16.mxu0 %v1367_v20 }
 0x490   : > { %v746_v39 = vmul.f32 %v1353_v37, %v1337_v6  ;;  %v1319_v6 = vld [vmem:[%s1602_s3 + $0x10] sm:$0xff]  }
 0x491   : > { %1258 = vmatpush3.bf16.msra.mxu0 %v1318_v5 }
 0x492   : > { %v747_v40 = vpack.c.bf16 %v746_v39, %v745_v38  ;;  %1259 = vmatprep.subr.bf16.mxu0 %v1367_v20 }
 0x493   : > { %v1355_v43 = vpop.eup %1354 }
 0x494   : > { %v866_v45 = vmul.f32 %v1355_v43, %v1339_v8  ;;  %v1321_v8 = vld [vmem:[%s1602_s3] sm:$0xff]  }
 0x495   : > { %1234 = vmatmul.mubr.msk.bf16.vlgmr.msra.gmra.mxu1 %vm482_vm3, %v747_v40  ;;  %1260 = vmatpush3.bf16.msra.mxu0 %v1319_v6 }
 0x496   : > { %1245 = vmatprep.mubr.msk.bf16.mxu1 %vm1368_vm1, %v1367_v20  ;;  %1261 = vmatprep.subr.bf16.mxu0 %v1367_v20 }
 0x499   : > { %1262 = vmatpush3.bf16.msra.mxu0 %v1320_v7 }
 0x49a   : > { %1263 = vmatprep.subr.bf16.mxu0 %v1367_v20 }
 0x49d   : > { %1264 = vmatpush3.bf16.msra.mxu0 %v1321_v8 }
 0x4b6   : > { %v863_v41 = vpop.xlane.xlu1 %862 }
 0x4b7   : > { %1356 = vrcp.f32 %v863_v41 }
 0x4ba   : > { %v870_v42 = vpop.permute.xlu1 %869 }
 0x4bb   : > { %1244 = vmatpush3.bf16.msra.mxu1 %v870_v42 }
 0x4c4   : > { %v1357_v44 = vpop.eup %1356 }
 0x4c5   : > { %v867_v46 = vmul.f32 %v1357_v44, %v1345_v21 }
 0x4c7   : > { %v868_v47 = vpack.c.bf16 %v867_v46, %v866_v45 }
 0x4c9   : > { %1246 = vmatmul.mubr.msk.bf16.vlgmr.msra.gmra.mxu1 %vm482_vm3, %v868_v47 }
 0x4d9   : > { %v543_v48 = vpop.f32.mrf.mxu1 }
 0x4db   : > { %v1211_v49 = vpop.f32.mrf.mxu1 }
 0x4dd   : > { %v546_v50 = vpop.f32.mrf.mxu1 }
 0x4df   : > { %v1212_v51 = vpop.f32.mrf.mxu1 }
 0x54d   : > { %v667_v52 = vpop.f32.mrf.mxu1 }
 0x54f   : > { %v1223_v53 = vpop.f32.mrf.mxu1 }
 0x551   : > { %v670_v54 = vpop.f32.mrf.mxu1 }
 0x552   : > { %v1283_v56 = vpack.i.bf16 %v670_v54, %v667_v52 }
 0x553   : > { %v1224_v57 = vpop.f32.mrf.mxu1 }
 0x554   : > { %1284 = vrot.lane.b32.xlu1 %v1283_v56, %s1371_s26 }
 0x555   : > { %v788_v60 = vpop.f32.mrf.mxu1 }
 0x557   : > { %v1235_v63 = vpop.f32.mrf.mxu1 }
 0x559   : > { %v791_v1 = vpop.f32.mrf.mxu1 }
 0x55a   : > { %v1288_v2 = vpack.i.bf16 %v791_v1, %v788_v60 }
 0x55b   : > { %v1236_v3 = vpop.f32.mrf.mxu1 }
 0x55c   : > { %1289 = vrot.lane.b32.xlu0 %v1288_v2, %s1370_s25 }
 0x589   : > { %v909_v9 = vpop.f32.mrf.mxu1 }
 0x58b   : > { %v1247_v10 = vpop.f32.mrf.mxu1 }
 0x58d   : > { %v912_v11 = vpop.f32.mrf.mxu1 }
 0x58e   : > { %v1293_v12 = vpack.i.bf16 %v912_v11, %v909_v9 }
 0x58f   : > { %v1248_v13 = vpop.f32.mrf.mxu1 }
 0x590   : > { %1294 = vrot.lane.b32.xlu1 %v1293_v12, %s1369_s24 }
 0x5c6   : > { %v1285_v14 = vpop.permute.xlu1 %1284 }
 0x5c7   : > { %v1287_v16 = vunpack.i.h.bf16 %v1285_v14  ;;  %v1286_v17 = vunpack.i.l.bf16 %v1285_v14 }
 0x5c9   : > { %v941_v21 = vsel %vm434_vm2, %v546_v50, %v1287_v16  ;;  %v940_v22 = vsel %vm434_vm2, %v543_v48, %v1286_v17 }
 0x5ce   : > { %v1290_v15 = vpop.permute.xlu0 %1289 }
 0x5cf   : > { %v1292_v18 = vunpack.i.h.bf16 %v1290_v15  ;;  %v1291_v19 = vunpack.i.l.bf16 %v1290_v15 }
 0x5d1   : > { %v943_v25 = vsel %vm237_vm0, %v941_v21, %v1292_v18  ;;  %v942_v26 = vsel %vm237_vm0, %v940_v22, %v1291_v19 }
 0x602   : > { %v1295_v20 = vpop.permute.xlu1 %1294 }
 0x603   : > { %v1297_v23 = vunpack.i.h.bf16 %v1295_v20  ;;  %v1296_v24 = vunpack.i.l.bf16 %v1295_v20 }
 0x605   : > { %v946_v27 = vsel %vm944_vm4, %v943_v25, %v1297_v23  ;;  %v945_v28 = vsel %vm944_vm4, %v942_v26, %v1296_v24 }
 0x606   : > { %v947_v29 = vpack.c.bf16 %v946_v27, %v945_v28 }
 0x608   : > { %1266 = vmatmul.mubr.bf16.vlgmr.msra.gmra.mxu0 %v947_v29 }
 0x6c8   : > { %v1034_v34 = vpop.f32.mrf.mxu0 }
 0x6c9   : > { %v1035_v36 = vadd.f32 %v1034_v34, %v951_v32 }
 0x6ca   : > { %v1267_v35 = vpop.f32.mrf.mxu0 }
 0x6cb   : > { %v1041_v39 = vadd.f32 %v1035_v36, %v1482_v59 }
 0x6cc   : > { %v1037_v62 = vpop.f32.mrf.mxu0 }
 0x6cd   : > { %v1038_v37 = vadd.f32 %v1037_v62, %v951_v32 }
 0x6ce   : > { %v1268_v38 = vpop.f32.mrf.mxu0 }
 0x6cf   : > { %v1042_v40 = vadd.f32 %v1038_v37, %v1488_v61 }
 0x6d1   : > { %v1157_v41 = vpack.c.bf16 %v1042_v40, %v1041_v39 }
 0x6d3   : > { %1158 = vst [vmem:[%s199_s22] sm:$0xff] %v1157_v41  }
 0x6d4 PF: > { %s14_s15 = sadd.s32 1, %s1364_s15  }
 0x6d5   : > { %p11_p4 = scmp.ge.s32.totalorder %s14_s15, 4  }
 0x6d7   :  { %13 = sbr.rel (!%p11_p4) target bundleno = 1 (0x1), region = 66 }

// kernel: multi_gran_forward_pallas.3
= control target key start
LH: loop header
LB: loop body
LE: loop exit
PB: predicated region body
PF: predicated region fallthrough
CT: control target
= control target key end

     0   :  { %s3297_s24 = smov 0   ;;  %s4004_s0 = inlined_call_operand.vmem [shape: f32[128,16], index: 0, kind: input, shape index: {}]   ;;  %s4005_s1 = inlined_call_operand.vmem [shape: bf16[128,32], index: 1, kind: input, shape index: {}]   ;;  %s4006_s2 = inlined_call_operand.vmem [shape: f32[7,32], index: 2, kind: input, shape index: {}]   ;;  %s4007_s3 = inlined_call_operand.vmem [shape: bf16[16,96], index: 3, kind: input, shape index: {}]   ;;  %s4008_s4 = inlined_call_operand.vmem [shape: bf16[32,32], index: 4, kind: input, shape index: {}]   ;;  %s4009_s5 = inlined_call_operand.vmem [shape: bf16[32,32], index: 5, kind: input, shape index: {}]   ;;  %s4010_s6 = inlined_call_operand.vmem [shape: bf16[32,32], index: 6, kind: input, shape index: {}]   ;;  %s4011_s7 = inlined_call_operand.vmem [shape: f32[128,32], index: 7, kind: output, shape index: {}]  }
   0x1 LB: > { %s2585_s25 = sadd.s32 4294967295, %s3241_s24   ;;  %p2589_p0 = scmp.ge.s32.totalorder %s3241_s24, 1  ;;  %s3241_s24 = sphi %s3297_s24, %s17_s24  }
   0x2   : > { %p249_p1 = scmp.lt.s32.totalorder %s3241_s24, 3 }
   0x4   : > { %p250_p2 = pnand %p2589_p0, %p249_p1 }
   0x5   : > { %s2590_s26 = sshll.u32 (!%p250_p2), %s2585_s25, 3  ;;  %s3243_s12 = smov (!%p250_p2), 96  }
   0x6   : > { %253 = sbr.rel (%p250_p2) target bundleno = 4885 (0x1315), region = 48  ;;  %p287_p3 = scmp.lt.s32.totalorder (!%p250_p2), %s2590_s26, 15 }
   0x7   : > { %s3244_s13 = smov (!%p250_p2), 64   ;;  %s3245_s14 = smov (!%p250_p2), 88  }
   0x8   : > { %s3246_s15 = smov (!%p250_p2), 120   ;;  %s3247_s16 = smov (!%p250_p2), 56  }
   0x9   : > { %s3248_s17 = smov (!%p250_p2), 80   ;;  %s3249_s18 = smov (!%p250_p2), 112  }
   0xa   : > { %s3250_s19 = smov (!%p250_p2), 48   ;;  %s3251_s20 = smov (!%p250_p2), 72  }
   0xb   : > { %s4019_s26 = smov (!%p287_p3, %s2590_s26), 15  ;;  %vm320_vm0 = vcmask 130048   ;;  %v3059_v56 = vld [vmem:[%s4007_s3] sm:$0xff]   ;;  %vm565_vm1 = vcmask 64512   ;;  %vm655_vm2 = vcmask 523264   ;;  %s3252_s21 = smov 104  }
   0xc   : > { %s2591_s27 = sshll.u32 %s4019_s26, 3  ;;  %2759 = vmatprep.subr.bf16.mxu0 %v3059_v56  ;;  %s3253_s22 = smov 40   ;;  %vm1811_vm3 = vcmask 195584   ;;  %vm1840_vm4 = vcmask 261120  }
   0xd   : > { %s290_s30 = scalar_lea.vmem %s4004_s0, %s2591_s27  ;;  %2760 = vmatpush3.bf16.msra.mxu0 %v3059_v56  ;;  %s3254_s23 = smov 8  }
   0xe   : > { %v306_v0 = vld [vmem:[%s290_s30] sm:$0xff]  ;;  %v308_v1 = vld [vmem:[%s290_s30 + $0x10] sm:$0xff]  ;;  %v307_v2 = vld [vmem:[%s290_s30 + $0x8] sm:$0xff]  ;;  %s3255_s25 = smov 16   ;;  %s3256_s9 = smov 24  }
   0xf   : > { %v321_v3 = vsel %vm320_vm0, %v306_v0, 0.0  ;;  %v327_v4 = vsel %vm320_vm0, %v308_v1, 0.0  ;;  %v309_v5 = vld [vmem:[%s290_s30 + $0x18] sm:$0xff]  ;;  %v324_v6 = vsel %vm320_vm0, %v307_v2, 0.0  ;;  %v310_v8 = vld [vmem:[%s290_s30 + $0x20] sm:$0xff]  ;;  %v311_v9 = vld [vmem:[%s290_s30 + $0x28] sm:$0xff] }
  0x10   : > { %322 = vadd.xlane.f32.xlu0 %v321_v3  ;;  %328 = vadd.xlane.f32.xlu1 %v327_v4  ;;  %v330_v7 = vsel %vm320_vm0, %v309_v5, 0.0  ;;  %v333_v10 = vsel %vm320_vm0, %v310_v8, 0.0  ;;  %v336_v11 = vsel %vm320_vm0, %v311_v9, 0.0  ;;  %v312_v12 = vld [vmem:[%s290_s30 + $0x30] sm:$0xff]  ;;  %v313_v13 = vld [vmem:[%s290_s30 + $0x38] sm:$0xff]  ;;  %s2593_s10 = sshll.u32 %s4019_s26, 2  ;;  %s302_s30 = scalar_lea.vmem %s4011_s7, %s2591_s27 }
  0x11   : > { %v339_v14 = vsel %vm320_vm0, %v312_v12, 0.0  ;;  %v342_v15 = vsel %vm320_vm0, %v313_v13, 0.0 }
  0x14   : > { %325 = vadd.xlane.f32.xlu0 %v324_v6  ;;  %331 = vadd.xlane.f32.xlu1 %v330_v7 }
  0x18   : > { %334 = vadd.xlane.f32.xlu0 %v333_v10  ;;  %337 = vadd.xlane.f32.xlu1 %v336_v11 }
  0x1c   : > { %340 = vadd.xlane.f32.xlu0 %v339_v14  ;;  %343 = vadd.xlane.f32.xlu1 %v342_v15 }
  0x99   : > { %v323_v16 = vpop.xlane.xlu0 %322  ;;  %v329_v17 = vpop.xlane.xlu1 %328 }
  0x9a   : > { %v346_v18 = vmul.f32 0.0625, %v323_v16  ;;  %v348_v19 = vmul.f32 0.0625, %v329_v17 }
  0x9c   : > { %v3321_v20 = vsub.f32 %v306_v0, %v346_v18  ;;  %v3323_v21 = vsub.f32 %v308_v1, %v348_v19  ;;  %v305_v18 = vld [vmem:[%s4006_s2] sm:$0x7f] }
  0x9d   : > { %v326_v22 = vpop.xlane.xlu0 %325  ;;  %v332_v23 = vpop.xlane.xlu1 %331 }
  0x9e   : > { %v347_v24 = vmul.f32 0.0625, %v326_v22  ;;  %v349_v25 = vmul.f32 0.0625, %v332_v23  ;;  %v362_v26 = vmul.f32 %v3321_v20, %v3321_v20  ;;  %v364_v27 = vmul.f32 %v3323_v21, %v3323_v21 }
  0xa0   : > { %v3329_v28 = vsub.f32 %v307_v2, %v347_v24  ;;  %v3331_v29 = vsub.f32 %v309_v5, %v349_v25  ;;  %v370_v30 = vsel %vm320_vm0, %v362_v26, 0.0  ;;  %v376_v33 = vsel %vm320_vm0, %v364_v27, 0.0 }
  0xa1   : > { %371 = vadd.xlane.f32.xlu0 %v370_v30  ;;  %v335_v31 = vpop.xlane.xlu0 %334  ;;  %v338_v32 = vpop.xlane.xlu1 %337  ;;  %v426_v2 = vlaneseq }
  0xa2   : > { %v350_v34 = vmul.f32 0.0625, %v335_v31  ;;  %v351_v35 = vmul.f32 0.0625, %v338_v32  ;;  %v363_v36 = vmul.f32 %v3329_v28, %v3329_v28  ;;  %v365_v37 = vmul.f32 %v3331_v29, %v3331_v29 }
  0xa4   : > { %v3339_v38 = vsub.f32 %v310_v8, %v350_v34  ;;  %v3341_v39 = vsub.f32 %v311_v9, %v351_v35  ;;  %v373_v40 = vsel %vm320_vm0, %v363_v36, 0.0  ;;  %v379_v43 = vsel %vm320_vm0, %v365_v37, 0.0 }
  0xa5   : > { %377 = vadd.xlane.f32.xlu0 %v376_v33  ;;  %374 = vadd.xlane.f32.xlu1 %v373_v40  ;;  %v341_v41 = vpop.xlane.xlu0 %340  ;;  %v344_v42 = vpop.xlane.xlu1 %343  ;;  %v3364_v9 = vshrl.u32 %v426_v2, 7 }
  0xa6   : > { %v352_v44 = vmul.f32 0.0625, %v341_v41  ;;  %v353_v45 = vmul.f32 0.0625, %v344_v42  ;;  %v366_v46 = vmul.f32 %v3339_v38, %v3339_v38  ;;  %v367_v47 = vmul.f32 %v3341_v39, %v3341_v39 }
  0xa7   : > { %v428_v16 = vsub.s32 0, %v3364_v9  ;;  %v440_v26 = vsub.s32 1, %v3364_v9 }
  0xa8   : > { %v3349_v48 = vsub.f32 %v312_v12, %v352_v44  ;;  %v3351_v49 = vsub.f32 %v313_v13, %v353_v45  ;;  %v382_v50 = vsel %vm320_vm0, %v366_v46, 0.0  ;;  %v385_v51 = vsel %vm320_vm0, %v367_v47, 0.0 }
  0xa9   : > { %380 = vadd.xlane.f32.xlu1 %v379_v43  ;;  %383 = vadd.xlane.f32.xlu0 %v382_v50  ;;  %v429_v25 = vrot.slane %v305_v18, %v428_v16  ;;  %v441_v33 = vrot.slane %v305_v18, %v440_v26 }
  0xaa   : > { %v368_v52 = vmul.f32 %v3349_v48, %v3349_v48  ;;  %v369_v53 = vmul.f32 %v3351_v49, %v3351_v49 }
  0xac   : > { %v388_v54 = vsel %vm320_vm0, %v368_v52, 0.0  ;;  %v391_v55 = vsel %vm320_vm0, %v369_v53, 0.0 }
  0xad   : > { %386 = vadd.xlane.f32.xlu1 %v385_v51  ;;  %389 = vadd.xlane.f32.xlu0 %v388_v54 }
  0xb1   : > { %392 = vadd.xlane.f32.xlu1 %v391_v55 }
 0x12a   : > { %v372_v57 = vpop.xlane.xlu0 %371 }
 0x12b   : > { %v394_v58 = vmul.f32 0.0625, %v372_v57 }
 0x12d   : > { %v402_v59 = vadd.f32 1e-05, %v394_v58 }
 0x12e   : > { %v375_v60 = vpop.xlane.xlu1 %374  ;;  %v378_v61 = vpop.xlane.xlu0 %377 }
 0x12f   : > { %3066 = vrsqrt.f32 %v402_v59  ;;  %v395_v62 = vmul.f32 0.0625, %v375_v60  ;;  %v396_v63 = vmul.f32 0.0625, %v378_v61 }
 0x131   : > { %v403_v0 = vadd.f32 1e-05, %v395_v62  ;;  %v404_v1 = vadd.f32 1e-05, %v396_v63 }
 0x132   : > { %v381_v3 = vpop.xlane.xlu1 %380  ;;  %v384_v4 = vpop.xlane.xlu0 %383 }
 0x133   : > { %3068 = vrsqrt.f32 %v403_v0  ;;  %v397_v5 = vmul.f32 0.0625, %v381_v3  ;;  %v398_v6 = vmul.f32 0.0625, %v384_v4 }
 0x134   : > { %3070 = vrsqrt.f32 %v404_v1 }
 0x135   : > { %v405_v7 = vadd.f32 1e-05, %v397_v5  ;;  %v406_v8 = vadd.f32 1e-05, %v398_v6 }
 0x136   : > { %v387_v10 = vpop.xlane.xlu1 %386  ;;  %v390_v11 = vpop.xlane.xlu0 %389 }
 0x137   : > { %3072 = vrsqrt.f32 %v405_v7  ;;  %v399_v12 = vmul.f32 0.0625, %v387_v10  ;;  %v400_v13 = vmul.f32 0.0625, %v390_v11 }
 0x138   : > { %3074 = vrsqrt.f32 %v406_v8 }
 0x139   : > { %v407_v14 = vadd.f32 1e-05, %v399_v12  ;;  %v408_v15 = vadd.f32 1e-05, %v400_v13 }
 0x13a   : > { %v393_v17 = vpop.xlane.xlu1 %392 }
 0x13b   : > { %3076 = vrsqrt.f32 %v407_v14  ;;  %v401_v19 = vmul.f32 0.0625, %v393_v17 }
 0x13c   : > { %v3067_v22 = vpop.eup %3066  ;;  %3078 = vrsqrt.f32 %v408_v15 }
 0x13d   : > { %v409_v23 = vadd.f32 1e-05, %v401_v19  ;;  %v418_v24 = vmul.f32 %v3067_v22, %v3321_v20 }
 0x13f   : > { %3080 = vrsqrt.f32 %v409_v23  ;;  %v430_v32 = vmul.f32 %v429_v25, %v418_v24 }
 0x140   : > { %v3069_v27 = vpop.eup %3068 }
 0x141   : > { %v3071_v30 = vpop.eup %3070  ;;  %v419_v31 = vmul.f32 %v3069_v27, %v3329_v28  ;;  %v442_v40 = vadd.f32 %v441_v33, %v430_v32 }
 0x142   : > { %v420_v34 = vmul.f32 %v3071_v30, %v3323_v21 }
 0x143   : > { %v431_v35 = vmul.f32 %v429_v25, %v419_v31 }
 0x144   : > { %v3073_v36 = vpop.eup %3072  ;;  %v432_v20 = vmul.f32 %v429_v25, %v420_v34 }
 0x145   : > { %v3075_v37 = vpop.eup %3074  ;;  %v443_v41 = vadd.f32 %v441_v33, %v431_v35  ;;  %v421_v42 = vmul.f32 %v3073_v36, %v3331_v29 }
 0x146   : > { %v422_v43 = vmul.f32 %v3075_v37, %v3339_v38  ;;  %v444_v28 = vadd.f32 %v441_v33, %v432_v20 }
 0x147   : > { %v450_v44 = vpack.c.bf16 %v443_v41, %v442_v40  ;;  %v433_v45 = vmul.f32 %v429_v25, %v421_v42 }
 0x148   : > { %v3077_v46 = vpop.eup %3076  ;;  %v434_v51 = vmul.f32 %v429_v25, %v422_v43 }
 0x149   : > { %v3079_v47 = vpop.eup %3078  ;;  %2761 = vmatprep.mubr.msk.bf16.mxu0 %vm320_vm0, %v450_v44  ;;  %v445_v50 = vadd.f32 %v441_v33, %v433_v45  ;;  %v423_v21 = vmul.f32 %v3077_v46, %v3341_v39 }
 0x14a   : > { %v424_v52 = vmul.f32 %v3079_v47, %v3349_v48  ;;  %v446_v29 = vadd.f32 %v441_v33, %v434_v51 }
 0x14b   : > { %v451_v53 = vpack.c.bf16 %v445_v50, %v444_v28  ;;  %v435_v54 = vmul.f32 %v429_v25, %v423_v21 }
 0x14c   : > { %v3081_v55 = vpop.eup %3080  ;;  %v436_v57 = vmul.f32 %v429_v25, %v424_v52 }
 0x14d   : > { %2762 = vmatmul.mubr.msk.bf16.vlgmr.msra.gmra.mxu0 %vm320_vm0, %v451_v53  ;;  %v447_v38 = vadd.f32 %v441_v33, %v435_v54  ;;  %v425_v56 = vmul.f32 %v3081_v55, %v3351_v49 }
 0x14e   : > { %v448_v60 = vadd.f32 %v441_v33, %v436_v57 }
 0x14f   : > { %v452_v58 = vpack.c.bf16 %v447_v38, %v446_v29  ;;  %v437_v59 = vmul.f32 %v429_v25, %v425_v56 }
 0x151   : > { %2765 = vmatprep.mubr.msk.bf16.mxu0 %vm320_vm0, %v452_v58  ;;  %v449_v61 = vadd.f32 %v441_v33, %v437_v59 }
 0x153   : > { %v453_v39 = vpack.c.bf16 %v449_v61, %v448_v60 }
 0x155   : > { %2766 = vmatmul.mubr.msk.bf16.gmra.mxu0 %vm320_vm0, %v453_v39 }
 0x20d   : > { %v3383_v48 = vpop.f32.mrf.mxu0 }
 0x20e   : > { %v539_v24 = vmul.f32 0.35355338, %v3383_v48 }
 0x20f   : > { %v3385_v62 = vpop.f32.mrf.mxu0 }
 0x210   : > { %v537_v49 = vmul.f32 0.35355338, %v3385_v62 }
 0x211   : > { %v3387_v63 = vpop.f32.mrf.mxu0 }
 0x212   : > { %v3417_v10 = vpack.c.bf16 %v3387_v63, %v3383_v48  ;;  %v540_v22 = vmul.f32 0.35355338, %v3387_v63 }
 0x213   : > { %v3389_v0 = vpop.f32.mrf.mxu0 }
 0x214   : > { %v538_v1 = vmul.f32 0.35355338, %v3389_v0  ;;  %v3422_v11 = vpack.c.bf16 %v3389_v0, %v3385_v62  ;;  %v3437_v26 = vpack.c.bf16 %v540_v22, %v539_v24 }
 0x215   : > { %v3393_v2 = vpop.f32.mrf.mxu0 }
 0x216   : > { %v3395_v3 = vpack.c.bf16 %v538_v1, %v537_v49  ;;  %v543_v31 = vmul.f32 0.35355338, %v3393_v2 }
 0x217   : > { %v3397_v4 = vpop.f32.mrf.mxu0 }
 0x218   : > { %2777 = vmatprep.mubr.msk.bf16.mxu1 %vm565_vm1, %v3395_v3  ;;  %v541_v25 = vmul.f32 0.35355338, %v3397_v4 }
 0x219   : > { %v3401_v5 = vpop.f32.mrf.mxu0 }
 0x21a   : > { %v3405_v6 = vpack.c.bf16 %v3401_v5, %v3393_v2  ;;  %v544_v30 = vmul.f32 0.35355338, %v3401_v5 }
 0x21b   : > { %v3407_v7 = vpop.f32.mrf.mxu0 }
 0x21c   : > { %v3411_v8 = vpack.c.bf16 %v3407_v7, %v3397_v4  ;;  %563 = vrot.lane.b32.xlu0 %v3405_v6, %s3243_s12  ;;  %v542_v23 = vmul.f32 0.35355338, %v3407_v7  ;;  %v3447_v32 = vpack.c.bf16 %v544_v30, %v543_v31 }
 0x21e   : > { %561 = vrot.lane.b32.xlu1 %v3411_v8, %s3243_s12  ;;  %v3439_v27 = vpack.c.bf16 %v542_v23, %v541_v25 }
 0x222   : > { %559 = vrot.lane.b32.xlu1 %v3417_v10, %s3243_s12 }
 0x226   : > { %557 = vrot.lane.b32.xlu1 %v3422_v11, %s3243_s12 }
 0x28e   : > { %v564_v12 = vpop.permute.xlu0 %563 }
 0x28f   : > { %2941 = vmatprep.subr.msk.bf16.mxu1 %vm565_vm1, %v564_v12  ;;  %v588_v13 = vsel %vm565_vm1, %v564_v12, 0 }
 0x290   : > { %2770 = vmatpush3.bf16.xpose.msra.mxu1 %v588_v13  ;;  %v562_v14 = vpop.permute.xlu1 %561 }
 0x291   : > { %2942 = vmatprep.subr.msk.bf16.mxu1 %vm565_vm1, %v562_v14  ;;  %v585_v15 = vsel %vm565_vm1, %v562_v14, 0 }
 0x294   : > { %v560_v16 = vpop.permute.xlu1 %559 }
 0x295   : > { %v582_v17 = vsel %vm565_vm1, %v560_v16, 0 }
 0x298   : > { %2772 = vmatpush3.bf16.xpose.msra.mxu1 %v585_v15  ;;  %v558_v18 = vpop.permute.xlu1 %557 }
 0x299   : > { %2943 = vmatprep.subr.msk.bf16.mxu1 %vm565_vm1, %v560_v16  ;;  %v579_v19 = vsel %vm565_vm1, %v558_v18, 0 }
 0x2a0   : > { %2774 = vmatpush3.bf16.xpose.msra.mxu1 %v582_v17 }
 0x2a1   : > { %2944 = vmatprep.subr.msk.bf16.mxu1 %vm565_vm1, %v558_v18 }
 0x2a8   : > { %2776 = vmatpush3.bf16.xpose.msra.mxu1 %v579_v19 }
 0x2af   : > { %2778 = vmatmul.mubr.msk.bf16.vlgmr.msra.gmra.mxu1 %vm565_vm1, %v3437_v26 }
 0x2b0   : > { %2781 = vmatprep.mubr.msk.bf16.mxu1 %vm565_vm1, %v3439_v27 }
 0x2b7   : > { %2782 = vmatmul.mubr.msk.bf16.gmra.mxu1 %vm565_vm1, %v3447_v32 }
 0x36f   : > { %v2779_v33 = vpop.f32.mrf.mxu1 }
 0x370   : > { %v662_v40 = vsel %vm655_vm2, %v2779_v33, -inf }
 0x371   : > { %v624_v34 = vpop.f32.mrf.mxu1 }
 0x372   : > { %v656_v35 = vsel %vm655_vm2, %v624_v34, -inf }
 0x373   : > { %657 = vmax.xlane.f32.xlu0 %v656_v35  ;;  %v2780_v36 = vpop.f32.mrf.mxu1 }
 0x374   : > { %v665_v43 = vsel %vm655_vm2, %v2780_v36, -inf }
 0x375   : > { %v627_v37 = vpop.f32.mrf.mxu1 }
 0x376   : > { %v659_v41 = vsel %vm655_vm2, %v627_v37, -inf }
 0x377   : > { %663 = vmax.xlane.f32.xlu0 %v662_v40  ;;  %660 = vmax.xlane.f32.xlu1 %v659_v41  ;;  %v2783_v42 = vpop.f32.mrf.mxu1 }
 0x378   : > { %v674_v47 = vsel %vm655_vm2, %v2783_v42, -inf }
 0x379   : > { %v640_v20 = vpop.f32.mrf.mxu1 }
 0x37a   : > { %v668_v50 = vsel %vm655_vm2, %v640_v20, -inf }
 0x37b   : > { %666 = vmax.xlane.f32.xlu0 %v665_v43  ;;  %v2784_v44 = vpop.f32.mrf.mxu1 }
 0x37c   : > { %v677_v45 = vsel %vm655_vm2, %v2784_v44, -inf }
 0x37d   : > { %678 = vmax.xlane.f32.xlu1 %v677_v45  ;;  %v643_v46 = vpop.f32.mrf.mxu1 }
 0x37e   : > { %v671_v28 = vsel %vm655_vm2, %v643_v46, -inf }
 0x37f   : > { %675 = vmax.xlane.f32.xlu0 %v674_v47 }
 0x381   : > { %672 = vmax.xlane.f32.xlu1 %v671_v28 }
 0x383   : > { %669 = vmax.xlane.f32.xlu0 %v668_v50 }
 0x392   : > { %752 = vrot.lane.b32.xlu1 %v3411_v8, %s3244_s13 }
 0x396   : > { %750 = vrot.lane.b32.xlu1 %v3417_v10, %s3244_s13 }
 0x399   : > { %754 = vrot.lane.b32.xlu0 %v3405_v6, %s3244_s13 }
 0x39a   : > { %748 = vrot.lane.b32.xlu1 %v3422_v11, %s3244_s13 }
 0x3fc   : > { %v658_v21 = vpop.xlane.xlu0 %657 }
 0x3fd   : > { %v680_v51 = vsub.f32 %v624_v34, %v658_v21 }
 0x3ff   : > { %v688_v55 = vmul.f32 1.442695, %v680_v51 }
 0x400   : > { %v664_v52 = vpop.xlane.xlu0 %663  ;;  %v661_v53 = vpop.xlane.xlu1 %660 }
 0x401   : > { %v682_v54 = vsub.f32 %v2779_v33, %v664_v52  ;;  %v681_v38 = vsub.f32 %v627_v37, %v661_v53 }
 0x403   : > { %v692_v29 = vmul.f32 1.442695, %v682_v54  ;;  %v690_v59 = vmul.f32 1.442695, %v681_v38 }
 0x404   : > { %v667_v56 = vpop.xlane.xlu0 %666 }
 0x405   : > { %3082 = vpow2.f32 %v692_v29  ;;  %v683_v57 = vsub.f32 %v2780_v36, %v667_v56 }
 0x406   : > { %v679_v58 = vpop.xlane.xlu1 %678  ;;  %3084 = vpow2.f32 %v688_v55 }
 0x407   : > { %v694_v60 = vmul.f32 1.442695, %v683_v57  ;;  %v687_v61 = vsub.f32 %v2784_v44, %v679_v58 }
 0x408   : > { %v676_v39 = vpop.xlane.xlu0 %675 }
 0x409   : > { %3086 = vpow2.f32 %v694_v60  ;;  %v686_v49 = vsub.f32 %v2783_v42, %v676_v39  ;;  %v702_v12 = vmul.f32 1.442695, %v687_v61 }
 0x40a   : > { %v673_v1 = vpop.xlane.xlu1 %672  ;;  %3088 = vpow2.f32 %v690_v59 }
 0x40b   : > { %v700_v13 = vmul.f32 1.442695, %v686_v49  ;;  %v685_v14 = vsub.f32 %v643_v46, %v673_v1 }
 0x40c   : > { %v670_v15 = vpop.xlane.xlu0 %669 }
 0x40d   : > { %3090 = vpow2.f32 %v700_v13  ;;  %v684_v16 = vsub.f32 %v640_v20, %v670_v15  ;;  %v698_v18 = vmul.f32 1.442695, %v685_v14 }
 0x40e   : > { %v753_v17 = vpop.permute.xlu1 %752  ;;  %3092 = vpow2.f32 %v702_v12 }
 0x40f   : > { %v696_v19 = vmul.f32 1.442695, %v684_v16 }
 0x410   : > { %v755_v22 = vpop.permute.xlu0 %754 }
 0x411   : > { %3094 = vpow2.f32 %v696_v19  ;;  %2785 = vmatprep.subr.bf16.mxu0 %v755_v22 }
 0x412   : > { %v3467_v23 = vpop.eup %3082  ;;  %2786 = vmatpush3.bf16.msra.mxu0 %v755_v22  ;;  %3096 = vpow2.f32 %v698_v18  ;;  %v751_v30 = vpop.permute.xlu1 %750 }
 0x413   : > { %2787 = vmatprep.subr.bf16.mxu0 %v753_v17  ;;  %v710_v24 = vsel %vm655_vm2, %v3467_v23, 0.0  ;;  %v3085_v25 = vpop.eup %3084 }
 0x414   : > { %711 = vadd.xlane.f32.xlu0 %v710_v24  ;;  %v704_v33 = vsel %vm655_vm2, %v3085_v25, 0.0 }
 0x416   : > { %v3087_v31 = vpop.eup %3086  ;;  %2788 = vmatpush3.bf16.msra.mxu0 %v753_v17  ;;  %v749_v37 = vpop.permute.xlu1 %748 }
 0x417   : > { %2789 = vmatprep.subr.bf16.mxu0 %v751_v30  ;;  %v713_v34 = vsel %vm655_vm2, %v3087_v31, 0.0  ;;  %v3089_v35 = vpop.eup %3088 }
 0x418   : > { %705 = vadd.xlane.f32.xlu0 %v704_v33  ;;  %714 = vadd.xlane.f32.xlu1 %v713_v34  ;;  %v707_v41 = vsel %vm655_vm2, %v3089_v35, 0.0 }
 0x41a   : > { %v3473_v36 = vpop.eup %3090  ;;  %2790 = vmatpush3.bf16.msra.mxu0 %v751_v30 }
 0x41b   : > { %2791 = vmatprep.subr.bf16.mxu0 %v749_v37  ;;  %v722_v40 = vsel %vm655_vm2, %v3473_v36, 0.0  ;;  %v3093_v42 = vpop.eup %3092 }
 0x41c   : > { %723 = vadd.xlane.f32.xlu0 %v722_v40  ;;  %708 = vadd.xlane.f32.xlu1 %v707_v41  ;;  %v725_v43 = vsel %vm655_vm2, %v3093_v42, 0.0 }
 0x41e   : > { %v3095_v20 = vpop.eup %3094  ;;  %2792 = vmatpush3.bf16.msra.mxu0 %v749_v37 }
 0x41f   : > { %v716_v44 = vsel %vm655_vm2, %v3095_v20, 0.0  ;;  %v3097_v45 = vpop.eup %3096 }
 0x420   : > { %726 = vadd.xlane.f32.xlu0 %v725_v43  ;;  %717 = vadd.xlane.f32.xlu1 %v716_v44  ;;  %v719_v46 = vsel %vm655_vm2, %v3097_v45, 0.0 }
 0x424   : > { %720 = vadd.xlane.f32.xlu0 %v719_v46 }
 0x431   : > { %853 = vrot.lane.b32.xlu1 %v3411_v8, %s3245_s14 }
 0x435   : > { %851 = vrot.lane.b32.xlu1 %v3417_v10, %s3245_s14 }
 0x439   : > { %849 = vrot.lane.b32.xlu1 %v3422_v11, %s3245_s14 }
 0x43a   : > { %855 = vrot.lane.b32.xlu0 %v3405_v6, %s3245_s14  ;;  %s3757_s14 = scalar_lea.vmem %s4005_s1, %s2593_s10 }
 0x43d   : > { %843 = vrot.lane.b32.xlu1 %v3437_v26, %s3246_s15 }
 0x43e   : > { %841 = vrot.lane.b32.xlu0 %v3395_v3, %s3246_s15 }
 0x441   : > { %847 = vrot.lane.b32.xlu1 %v3447_v32, %s3246_s15 }
 0x442   : > { %845 = vrot.lane.b32.xlu0 %v3439_v27, %s3246_s15 }
 0x49d   : > { %v712_v47 = vpop.xlane.xlu0 %711 }
 0x4a1   : > { %v706_v28 = vpop.xlane.xlu0 %705  ;;  %v715_v50 = vpop.xlane.xlu1 %714 }
 0x4a2   : > { %3098 = vrcp.f32 %v715_v50 }
 0x4a3   : > { %3100 = vrcp.f32 %v706_v28 }
 0x4a4   : > { %3102 = vrcp.f32 %v712_v47 }
 0x4a5   : > { %v724_v21 = vpop.xlane.xlu0 %723  ;;  %v709_v51 = vpop.xlane.xlu1 %708 }
 0x4a6   : > { %3104 = vrcp.f32 %v709_v51 }
 0x4a9   : > { %v727_v52 = vpop.xlane.xlu0 %726  ;;  %v718_v53 = vpop.xlane.xlu1 %717 }
 0x4aa   : > { %3106 = vrcp.f32 %v727_v52 }
 0x4ab   : > { %3108 = vrcp.f32 %v718_v53 }
 0x4ac   : > { %3110 = vrcp.f32 %v724_v21 }
 0x4ad   : > { %v721_v54 = vpop.xlane.xlu0 %720  ;;  %v854_v16 = vpop.permute.xlu1 %853 }
 0x4ae   : > { %3112 = vrcp.f32 %v721_v54  ;;  %v876_v30 = vsel %vm565_vm1, %v854_v16, 0 }
 0x4af   : > { %v3099_v55 = vpop.eup %3098 }
 0x4b0   : > { %v3101_v38 = vpop.eup %3100  ;;  %v739_v58 = vmul.f32 %v3099_v55, %v3087_v31 }
 0x4b1   : > { %v856_v29 = vpop.permute.xlu0 %855  ;;  %v3103_v56 = vpop.eup %3102  ;;  %v736_v59 = vmul.f32 %v3101_v38, %v3085_v25 }
 0x4b2   : > { %2945 = vmatprep.subr.msk.bf16.mxu0 %vm565_vm1, %v856_v29  ;;  %v738_v61 = vmul.f32 %v3103_v56, %v3467_v23  ;;  %v879_v14 = vsel %vm565_vm1, %v856_v29, 0  ;;  %v852_v31 = vpop.permute.xlu1 %851 }
 0x4b3   : > { %v3105_v57 = vpop.eup %3104  ;;  %v873_v33 = vsel %vm565_vm1, %v852_v31, 0 }
 0x4b4   : > { %v737_v60 = vmul.f32 %v3105_v57, %v3089_v35  ;;  %v745_v1 = vpack.c.bf16 %v739_v58, %v738_v61 }
 0x4b5   : > { %v842_v25 = vpop.permute.xlu0 %841 }
 0x4b6   : > { %v744_v39 = vpack.c.bf16 %v737_v60, %v736_v59  ;;  %v850_v34 = vpop.permute.xlu1 %849 }
 0x4b7   : > { %v3107_v49 = vpop.eup %3106  ;;  %v870_v35 = vsel %vm565_vm1, %v850_v34, 0 }
 0x4b8   : > { %v3109_v12 = vpop.eup %3108  ;;  %2793 = vmatprep.mubr.msk.bf16.mxu0 %vm655_vm2, %v744_v39  ;;  %v743_v19 = vmul.f32 %v3107_v49, %v3093_v42 }
 0x4b9   : > { %v3111_v13 = vpop.eup %3110  ;;  %2794 = vmatmul.mubr.msk.bf16.vlgmr.msra.gmra.mxu0 %vm655_vm2, %v745_v1  ;;  %v740_v17 = vmul.f32 %v3109_v12, %v3095_v20  ;;  %v846_v37 = vpop.permute.xlu0 %845 }
 0x4ba   : > { %2802 = vmatpush3.bf16.xpose.msra.mxu0 %v879_v14  ;;  %v742_v23 = vmul.f32 %v3111_v13, %v3473_v36  ;;  %v844_v36 = vpop.permute.xlu1 %843 }
 0x4bb   : > { %v3113_v15 = vpop.eup %3112  ;;  %2946 = vmatprep.subr.msk.bf16.mxu0 %vm565_vm1, %v854_v16 }
 0x4bc   : > { %v741_v18 = vmul.f32 %v3113_v15, %v3097_v45  ;;  %v747_v24 = vpack.c.bf16 %v743_v19, %v742_v23 }
 0x4be   : > { %v746_v22 = vpack.c.bf16 %v741_v18, %v740_v17  ;;  %v848_v40 = vpop.permute.xlu1 %847 }
 0x4c0   : > { %2797 = vmatprep.mubr.msk.bf16.mxu0 %vm655_vm2, %v746_v22 }
 0x4c1   : > { %2798 = vmatmul.mubr.msk.bf16.gmra.mxu0 %vm655_vm2, %v747_v24 }
 0x4c2   : > { %2804 = vmatpush3.bf16.xpose.msra.mxu0 %v876_v30  ;;  %2809 = vmatprep.mubr.msk.bf16.mxu0 %vm565_vm1, %v842_v25 }
 0x4c3   : > { %2947 = vmatprep.subr.msk.bf16.mxu0 %vm565_vm1, %v852_v31 }
 0x4ca   : > { %2806 = vmatpush3.bf16.xpose.msra.mxu0 %v873_v33 }
 0x4cb   : > { %2948 = vmatprep.subr.msk.bf16.mxu0 %vm565_vm1, %v850_v34 }
 0x4d2   : > { %2808 = vmatpush3.bf16.xpose.msra.mxu0 %v870_v35 }
 0x4d9   : > { %2810 = vmatmul.mubr.msk.bf16.vlgmr.msra.gmra.mxu0 %vm565_vm1, %v844_v36 }
 0x4da   : > { %2813 = vmatprep.mubr.msk.bf16.mxu0 %vm565_vm1, %v846_v37 }
 0x4e1   : > { %2814 = vmatmul.mubr.msk.bf16.gmra.mxu0 %vm565_vm1, %v848_v40 }
 0x579   : > { %v3507_v41 = vpop.f32.mrf.mxu0 }
 0x57b   : > { %v3509_v42 = vpop.f32.mrf.mxu0 }
 0x57d   : > { %v3511_v20 = vpop.f32.mrf.mxu0 }
 0x57f   : > { %v3513_v43 = vpop.f32.mrf.mxu0 }
 0x581   : > { %v3515_v44 = vpop.f32.mrf.mxu0 }
 0x583   : > { %v3517_v45 = vpop.f32.mrf.mxu0 }
 0x585   : > { %v3519_v46 = vpop.f32.mrf.mxu0 }
 0x587   : > { %v3521_v47 = vpop.f32.mrf.mxu0 }
 0x599   : > { %v2811_v28 = vpop.f32.mrf.mxu0 }
 0x59a   : > { %v952_v53 = vsel %vm655_vm2, %v2811_v28, -inf }
 0x59b   : > { %v915_v50 = vpop.f32.mrf.mxu0 }
 0x59c   : > { %v946_v21 = vsel %vm655_vm2, %v915_v50, -inf }
 0x59d   : > { %947 = vmax.xlane.f32.xlu0 %v946_v21  ;;  %v2812_v51 = vpop.f32.mrf.mxu0 }
 0x59e   : > { %v955_v38 = vsel %vm655_vm2, %v2812_v51, -inf }
 0x59f   : > { %v918_v52 = vpop.f32.mrf.mxu0 }
 0x5a0   : > { %v949_v54 = vsel %vm655_vm2, %v918_v52, -inf }
 0x5a1   : > { %953 = vmax.xlane.f32.xlu0 %v952_v53  ;;  %950 = vmax.xlane.f32.xlu1 %v949_v54  ;;  %v2815_v55 = vpop.f32.mrf.mxu0 }
 0x5a2   : > { %v964_v59 = vsel %vm655_vm2, %v2815_v55, -inf }
 0x5a3   : > { %v931_v29 = vpop.f32.mrf.mxu0 }
 0x5a4   : > { %v958_v61 = vsel %vm655_vm2, %v931_v29, -inf }
 0x5a5   : > { %956 = vmax.xlane.f32.xlu0 %v955_v38  ;;  %v2816_v56 = vpop.f32.mrf.mxu0 }
 0x5a6   : > { %v967_v57 = vsel %vm655_vm2, %v2816_v56, -inf }
 0x5a7   : > { %968 = vmax.xlane.f32.xlu1 %v967_v57  ;;  %v934_v58 = vpop.f32.mrf.mxu0 }
 0x5a8   : > { %v961_v60 = vsel %vm655_vm2, %v934_v58, -inf }
 0x5a9   : > { %965 = vmax.xlane.f32.xlu0 %v964_v59 }
 0x5ab   : > { %962 = vmax.xlane.f32.xlu1 %v961_v60 }
 0x5ad   : > { %959 = vmax.xlane.f32.xlu0 %v958_v61 }
 0x5bc   : > { %1042 = vrot.lane.b32.xlu1 %v3411_v8, %s3247_s16 }
 0x5c0   : > { %1040 = vrot.lane.b32.xlu1 %v3417_v10, %s3247_s16 }
 0x5c3   : > { %1044 = vrot.lane.b32.xlu0 %v3405_v6, %s3247_s16 }
 0x5c4   : > { %1038 = vrot.lane.b32.xlu1 %v3422_v11, %s3247_s16 }
 0x626   : > { %v948_v39 = vpop.xlane.xlu0 %947 }
 0x627   : > { %v970_v49 = vsub.f32 %v915_v50, %v948_v39 }
 0x629   : > { %v978_v14 = vmul.f32 1.442695, %v970_v49 }
 0x62a   : > { %v954_v1 = vpop.xlane.xlu0 %953  ;;  %v951_v12 = vpop.xlane.xlu1 %950 }
 0x62b   : > { %v972_v13 = vsub.f32 %v2811_v28, %v954_v1  ;;  %v971_v16 = vsub.f32 %v918_v52, %v951_v12 }
 0x62d   : > { %v982_v15 = vmul.f32 1.442695, %v972_v13  ;;  %v980_v22 = vmul.f32 1.442695, %v971_v16 }
 0x62e   : > { %v957_v17 = vpop.xlane.xlu0 %956 }
 0x62f   : > { %3114 = vpow2.f32 %v982_v15  ;;  %v973_v18 = vsub.f32 %v2812_v51, %v957_v17 }
 0x630   : > { %v969_v19 = vpop.xlane.xlu1 %968  ;;  %3116 = vpow2.f32 %v978_v14 }
 0x631   : > { %v984_v23 = vmul.f32 1.442695, %v973_v18  ;;  %v977_v24 = vsub.f32 %v2816_v56, %v969_v19 }
 0x632   : > { %v966_v25 = vpop.xlane.xlu0 %965 }
 0x633   : > { %3118 = vpow2.f32 %v984_v23  ;;  %v976_v30 = vsub.f32 %v2815_v55, %v966_v25  ;;  %v992_v33 = vmul.f32 1.442695, %v977_v24 }
 0x634   : > { %v963_v31 = vpop.xlane.xlu1 %962  ;;  %3120 = vpow2.f32 %v980_v22 }
 0x635   : > { %v990_v34 = vmul.f32 1.442695, %v976_v30  ;;  %v975_v35 = vsub.f32 %v934_v58, %v963_v31 }
 0x636   : > { %v960_v36 = vpop.xlane.xlu0 %959 }
 0x637   : > { %3122 = vpow2.f32 %v990_v34  ;;  %v974_v37 = vsub.f32 %v931_v29, %v960_v36  ;;  %v988_v28 = vmul.f32 1.442695, %v975_v35 }
 0x638   : > { %v1043_v40 = vpop.permute.xlu1 %1042  ;;  %3124 = vpow2.f32 %v992_v33 }
 0x639   : > { %v986_v50 = vmul.f32 1.442695, %v974_v37 }
 0x63a   : > { %v1045_v21 = vpop.permute.xlu0 %1044 }
 0x63b   : > { %3126 = vpow2.f32 %v986_v50  ;;  %2817 = vmatprep.subr.bf16.mxu1 %v1045_v21 }
 0x63c   : > { %v3535_v51 = vpop.eup %3114  ;;  %2818 = vmatpush3.bf16.msra.mxu1 %v1045_v21  ;;  %3128 = vpow2.f32 %v988_v28  ;;  %v1041_v54 = vpop.permute.xlu1 %1040 }
 0x63d   : > { %2819 = vmatprep.subr.bf16.mxu1 %v1043_v40  ;;  %v1000_v52 = vsel %vm655_vm2, %v3535_v51, 0.0  ;;  %v3117_v53 = vpop.eup %3116 }
 0x63e   : > { %1001 = vadd.xlane.f32.xlu0 %v1000_v52  ;;  %v994_v29 = vsel %vm655_vm2, %v3117_v53, 0.0 }
 0x640   : > { %v3119_v55 = vpop.eup %3118  ;;  %2820 = vmatpush3.bf16.msra.mxu1 %v1043_v40  ;;  %v1039_v58 = vpop.permute.xlu1 %1038 }
 0x641   : > { %2821 = vmatprep.subr.bf16.mxu1 %v1041_v54  ;;  %v1003_v38 = vsel %vm655_vm2, %v3119_v55, 0.0  ;;  %v3121_v56 = vpop.eup %3120 }
 0x642   : > { %995 = vadd.xlane.f32.xlu0 %v994_v29  ;;  %1004 = vadd.xlane.f32.xlu1 %v1003_v38  ;;  %v997_v60 = vsel %vm655_vm2, %v3121_v56, 0.0 }
 0x644   : > { %v3541_v57 = vpop.eup %3122  ;;  %2822 = vmatpush3.bf16.msra.mxu1 %v1041_v54 }
 0x645   : > { %2823 = vmatprep.subr.bf16.mxu1 %v1039_v58  ;;  %v1012_v59 = vsel %vm655_vm2, %v3541_v57, 0.0  ;;  %v3125_v61 = vpop.eup %3124 }
 0x646   : > { %1013 = vadd.xlane.f32.xlu0 %v1012_v59  ;;  %998 = vadd.xlane.f32.xlu1 %v997_v60  ;;  %v1015_v1 = vsel %vm655_vm2, %v3125_v61, 0.0 }
 0x648   : > { %v3127_v39 = vpop.eup %3126  ;;  %2824 = vmatpush3.bf16.msra.mxu1 %v1039_v58 }
 0x649   : > { %v1006_v49 = vsel %vm655_vm2, %v3127_v39, 0.0  ;;  %v3129_v12 = vpop.eup %3128 }
 0x64a   : > { %1007 = vadd.xlane.f32.xlu1 %v1006_v49  ;;  %1016 = vadd.xlane.f32.xlu0 %v1015_v1  ;;  %v1009_v13 = vsel %vm655_vm2, %v3129_v12, 0.0 }
 0x64e   : > { %1010 = vadd.xlane.f32.xlu0 %v1009_v13 }
 0x65b   : > { %1139 = vrot.lane.b32.xlu1 %v3411_v8, %s3248_s17 }
 0x65f   : > { %1137 = vrot.lane.b32.xlu1 %v3417_v10, %s3248_s17 }
 0x663   : > { %1135 = vrot.lane.b32.xlu1 %v3422_v11, %s3248_s17 }
 0x664   : > { %1141 = vrot.lane.b32.xlu0 %v3405_v6, %s3248_s17 }
 0x667   : > { %1129 = vrot.lane.b32.xlu1 %v3437_v26, %s3249_s18 }
 0x668   : > { %1127 = vrot.lane.b32.xlu0 %v3395_v3, %s3249_s18 }
 0x66b   : > { %1133 = vrot.lane.b32.xlu1 %v3447_v32, %s3249_s18 }
 0x66c   : > { %1131 = vrot.lane.b32.xlu0 %v3439_v27, %s3249_s18 }
 0x6c7   : > { %v1002_v14 = vpop.xlane.xlu0 %1001 }
 0x6cb   : > { %v996_v15 = vpop.xlane.xlu0 %995  ;;  %v1005_v16 = vpop.xlane.xlu1 %1004 }
 0x6cc   : > { %3130 = vrcp.f32 %v1005_v16 }
 0x6cd   : > { %3132 = vrcp.f32 %v996_v15 }
 0x6ce   : > { %3134 = vrcp.f32 %v1002_v14 }
 0x6cf   : > { %v1014_v17 = vpop.xlane.xlu0 %1013  ;;  %v999_v18 = vpop.xlane.xlu1 %998 }
 0x6d0   : > { %3136 = vrcp.f32 %v999_v18 }
 0x6d3   : > { %v1017_v19 = vpop.xlane.xlu0 %1016  ;;  %v1008_v22 = vpop.xlane.xlu1 %1007 }
 0x6d4   : > { %3138 = vrcp.f32 %v1017_v19 }
 0x6d5   : > { %3140 = vrcp.f32 %v1008_v22 }
 0x6d6   : > { %3142 = vrcp.f32 %v1014_v17 }
 0x6d7   : > { %v1011_v23 = vpop.xlane.xlu0 %1010  ;;  %v1140_v38 = vpop.permute.xlu1 %1139 }
 0x6d8   : > { %3144 = vrcp.f32 %v1011_v23  ;;  %v1162_v49 = vsel %vm565_vm1, %v1140_v38, 0 }
 0x6d9   : > { %v3131_v24 = vpop.eup %3130 }
 0x6da   : > { %v3133_v30 = vpop.eup %3132  ;;  %v1029_v34 = vmul.f32 %v3131_v24, %v3119_v55 }
 0x6db   : > { %v1142_v25 = vpop.permute.xlu0 %1141  ;;  %v3135_v31 = vpop.eup %3134  ;;  %v1026_v35 = vmul.f32 %v3133_v30, %v3117_v53 }
 0x6dc   : > { %2949 = vmatprep.subr.msk.bf16.mxu1 %vm565_vm1, %v1142_v25  ;;  %v1028_v37 = vmul.f32 %v3135_v31, %v3535_v51  ;;  %v1165_v54 = vsel %vm565_vm1, %v1142_v25, 0  ;;  %v1138_v1 = vpop.permute.xlu1 %1137 }
 0x6dd   : > { %v3137_v33 = vpop.eup %3136 }
 0x6de   : > { %v1027_v36 = vmul.f32 %v3137_v33, %v3121_v56  ;;  %v1035_v50 = vpack.c.bf16 %v1029_v34, %v1028_v37 }
 0x6df   : > { %v1128_v60 = vpop.permute.xlu0 %1127 }
 0x6e0   : > { %v1034_v40 = vpack.c.bf16 %v1027_v36, %v1026_v35 }
 0x6e1   : > { %v3139_v28 = vpop.eup %3138 }
 0x6e2   : > { %v3141_v21 = vpop.eup %3140  ;;  %2825 = vmatprep.mubr.msk.bf16.mxu1 %vm655_vm2, %v1034_v40  ;;  %v1033_v56 = vmul.f32 %v3139_v28, %v3125_v61  ;;  %v1136_v61 = vpop.permute.xlu1 %1135 }
 0x6e3   : > { %v3143_v52 = vpop.eup %3142  ;;  %2826 = vmatmul.mubr.msk.bf16.vlgmr.msra.gmra.mxu1 %vm655_vm2, %v1035_v50  ;;  %v1030_v53 = vmul.f32 %v3141_v21, %v3127_v39  ;;  %v1159_v39 = vsel %vm565_vm1, %v1138_v1, 0  ;;  %v1132_v13 = vpop.permute.xlu0 %1131 }
 0x6e4   : > { %2834 = vmatpush3.bf16.xpose.msra.mxu1 %v1165_v54  ;;  %v1032_v58 = vmul.f32 %v3143_v52, %v3541_v57  ;;  %v1156_v57 = vsel %vm565_vm1, %v1136_v61, 0 }
 0x6e5   : > { %v3145_v29 = vpop.eup %3144  ;;  %2950 = vmatprep.subr.msk.bf16.mxu1 %vm565_vm1, %v1140_v38 }
 0x6e6   : > { %v1031_v55 = vmul.f32 %v3145_v29, %v3129_v12  ;;  %v1037_v59 = vpack.c.bf16 %v1033_v56, %v1032_v58  ;;  %v1130_v12 = vpop.permute.xlu1 %1129 }
 0x6e8   : > { %v1036_v51 = vpack.c.bf16 %v1031_v55, %v1030_v53 }
 0x6ea   : > { %2829 = vmatprep.mubr.msk.bf16.mxu1 %vm655_vm2, %v1036_v51  ;;  %v1134_v14 = vpop.permute.xlu1 %1133 }
 0x6eb   : > { %2830 = vmatmul.mubr.msk.bf16.gmra.mxu1 %vm655_vm2, %v1037_v59 }
 0x6ec   : > { %2836 = vmatpush3.bf16.xpose.msra.mxu1 %v1162_v49  ;;  %2841 = vmatprep.mubr.msk.bf16.mxu1 %vm565_vm1, %v1128_v60 }
 0x6ed   : > { %2951 = vmatprep.subr.msk.bf16.mxu1 %vm565_vm1, %v1138_v1 }
 0x6f4   : > { %2838 = vmatpush3.bf16.xpose.msra.mxu1 %v1159_v39 }
 0x6f5   : > { %2952 = vmatprep.subr.msk.bf16.mxu1 %vm565_vm1, %v1136_v61 }
 0x6fc   : > { %2840 = vmatpush3.bf16.xpose.msra.mxu1 %v1156_v57 }
 0x703   : > { %2842 = vmatmul.mubr.msk.bf16.vlgmr.msra.gmra.mxu1 %vm565_vm1, %v1130_v12 }
 0x704   : > { %2845 = vmatprep.mubr.msk.bf16.mxu1 %vm565_vm1, %v1132_v13 }
 0x70b   : > { %2846 = vmatmul.mubr.msk.bf16.gmra.mxu1 %vm565_vm1, %v1134_v14 }
 0x7a3   : > { %v3575_v15 = vpop.f32.mrf.mxu1 }
 0x7a5   : > { %v3577_v16 = vpop.f32.mrf.mxu1 }
 0x7a7   : > { %v3579_v17 = vpop.f32.mrf.mxu1 }
 0x7a9   : > { %v3583_v19 = vpop.f32.mrf.mxu1 }
 0x7aa   : > { %v2979_v22 = vpack.i.bf16 %v3583_v19, %v3577_v16 }
 0x7ab   : > { %v3587_v23 = vpop.f32.mrf.mxu1 }
 0x7ad   : > { %v3589_v24 = vpop.f32.mrf.mxu1 }
 0x7af   : > { %v3591_v25 = vpop.f32.mrf.mxu1 }
 0x7b1   : > { %v3595_v31 = vpop.f32.mrf.mxu1 }
 0x7c3   : > { %v2843_v34 = vpop.f32.mrf.mxu1 }
 0x7c4   : > { %v1238_v28 = vsel %vm655_vm2, %v2843_v34, -inf }
 0x7c5   : > { %v1201_v35 = vpop.f32.mrf.mxu1 }
 0x7c6   : > { %v1232_v36 = vsel %vm655_vm2, %v1201_v35, -inf }
 0x7c7   : > { %1233 = vmax.xlane.f32.xlu0 %v1232_v36  ;;  %v2844_v37 = vpop.f32.mrf.mxu1 }
 0x7c8   : > { %v1241_v54 = vsel %vm655_vm2, %v2844_v37, -inf }
 0x7c9   : > { %v1204_v40 = vpop.f32.mrf.mxu1 }
 0x7ca   : > { %v1235_v50 = vsel %vm655_vm2, %v1204_v40, -inf }
 0x7cb   : > { %1239 = vmax.xlane.f32.xlu0 %v1238_v28  ;;  %1236 = vmax.xlane.f32.xlu1 %v1235_v50  ;;  %v2847_v21 = vpop.f32.mrf.mxu1 }
 0x7cc   : > { %v1250_v55 = vsel %vm655_vm2, %v2847_v21, -inf }
 0x7cd   : > { %v1217_v52 = vpop.f32.mrf.mxu1 }
 0x7ce   : > { %v1244_v51 = vsel %vm655_vm2, %v1217_v52, -inf }
 0x7cf   : > { %1242 = vmax.xlane.f32.xlu0 %v1241_v54  ;;  %v2848_v29 = vpop.f32.mrf.mxu1 }
 0x7d0   : > { %v1253_v38 = vsel %vm655_vm2, %v2848_v29, -inf }
 0x7d1   : > { %1254 = vmax.xlane.f32.xlu1 %v1253_v38  ;;  %v1220_v53 = vpop.f32.mrf.mxu1 }
 0x7d2   : > { %v1247_v56 = vsel %vm655_vm2, %v1220_v53, -inf }
 0x7d3   : > { %1251 = vmax.xlane.f32.xlu0 %v1250_v55 }
 0x7d5   : > { %1248 = vmax.xlane.f32.xlu1 %v1247_v56 }
 0x7d7   : > { %1245 = vmax.xlane.f32.xlu0 %v1244_v51 }
 0x7e6   : > { %1328 = vrot.lane.b32.xlu1 %v3411_v8, %s3250_s19 }
 0x7ea   : > { %1326 = vrot.lane.b32.xlu1 %v3417_v10, %s3250_s19 }
 0x7ed   : > { %1330 = vrot.lane.b32.xlu0 %v3405_v6, %s3250_s19 }
 0x7ee   : > { %1324 = vrot.lane.b32.xlu1 %v3422_v11, %s3250_s19 }
 0x850   : > { %v1234_v58 = vpop.xlane.xlu0 %1233 }
 0x851   : > { %v1256_v59 = vsub.f32 %v1201_v35, %v1234_v58 }
 0x853   : > { %v1264_v39 = vmul.f32 1.442695, %v1256_v59 }
 0x854   : > { %v1240_v60 = vpop.xlane.xlu0 %1239  ;;  %v1237_v49 = vpop.xlane.xlu1 %1236 }
 0x855   : > { %v1258_v1 = vsub.f32 %v2843_v34, %v1240_v60  ;;  %v1257_v57 = vsub.f32 %v1204_v40, %v1237_v49 }
 0x857   : > { %v1268_v61 = vmul.f32 1.442695, %v1258_v1  ;;  %v1266_v36 = vmul.f32 1.442695, %v1257_v57 }
 0x858   : > { %v1243_v12 = vpop.xlane.xlu0 %1242 }
 0x859   : > { %3146 = vpow2.f32 %v1268_v61  ;;  %v1259_v13 = vsub.f32 %v2844_v37, %v1243_v12 }
 0x85a   : > { %v1255_v14 = vpop.xlane.xlu1 %1254  ;;  %3148 = vpow2.f32 %v1264_v39 }
 0x85b   : > { %v1270_v28 = vmul.f32 1.442695, %v1259_v13  ;;  %v1263_v50 = vsub.f32 %v2848_v29, %v1255_v14 }
 0x85c   : > { %v1252_v54 = vpop.xlane.xlu0 %1251 }
 0x85d   : > { %3150 = vpow2.f32 %v1270_v28  ;;  %v1262_v38 = vsub.f32 %v2847_v21, %v1252_v54  ;;  %v1278_v35 = vmul.f32 1.442695, %v1263_v50 }
 0x85e   : > { %v1249_v55 = vpop.xlane.xlu1 %1248  ;;  %3152 = vpow2.f32 %v1266_v36 }
 0x85f   : > { %v1276_v56 = vmul.f32 1.442695, %v1262_v38  ;;  %v1261_v51 = vsub.f32 %v1220_v53, %v1249_v55 }
 0x860   : > { %v1246_v34 = vpop.xlane.xlu0 %1245 }
 0x861   : > { %3154 = vpow2.f32 %v1276_v56  ;;  %v1260_v58 = vsub.f32 %v1217_v52, %v1246_v34  ;;  %v1274_v59 = vmul.f32 1.442695, %v1261_v51 }
 0x862   : > { %v1329_v40 = vpop.permute.xlu1 %1328  ;;  %3156 = vpow2.f32 %v1278_v35 }
 0x863   : > { %v1272_v37 = vmul.f32 1.442695, %v1260_v58 }
 0x864   : > { %v1331_v60 = vpop.permute.xlu0 %1330 }
 0x865   : > { %3158 = vpow2.f32 %v1272_v37  ;;  %2849 = vmatprep.subr.bf16.mxu0 %v1331_v60 }
 0x866   : > { %v3611_v49 = vpop.eup %3146  ;;  %2850 = vmatpush3.bf16.msra.mxu0 %v1331_v60  ;;  %3160 = vpow2.f32 %v1274_v59  ;;  %v1327_v53 = vpop.permute.xlu1 %1326 }
 0x867   : > { %2851 = vmatprep.subr.bf16.mxu0 %v1329_v40  ;;  %v1286_v21 = vsel %vm655_vm2, %v3611_v49, 0.0  ;;  %v3149_v29 = vpop.eup %3148 }
 0x868   : > { %1287 = vadd.xlane.f32.xlu0 %v1286_v21  ;;  %v1280_v52 = vsel %vm655_vm2, %v3149_v29, 0.0 }
 0x86a   : > { %v3151_v1 = vpop.eup %3150  ;;  %2852 = vmatpush3.bf16.msra.mxu0 %v1329_v40  ;;  %v1325_v12 = vpop.permute.xlu1 %1324 }
 0x86b   : > { %2853 = vmatprep.subr.bf16.mxu0 %v1327_v53  ;;  %v1289_v39 = vsel %vm655_vm2, %v3151_v1, 0.0  ;;  %v3153_v61 = vpop.eup %3152 }
 0x86c   : > { %1281 = vadd.xlane.f32.xlu0 %v1280_v52  ;;  %1290 = vadd.xlane.f32.xlu1 %v1289_v39  ;;  %v1283_v14 = vsel %vm655_vm2, %v3153_v61, 0.0 }
 0x86e   : > { %v3617_v57 = vpop.eup %3154  ;;  %2854 = vmatpush3.bf16.msra.mxu0 %v1327_v53 }
 0x86f   : > { %2855 = vmatprep.subr.bf16.mxu0 %v1325_v12  ;;  %v1298_v13 = vsel %vm655_vm2, %v3617_v57, 0.0  ;;  %v3157_v36 = vpop.eup %3156 }
 0x870   : > { %1299 = vadd.xlane.f32.xlu0 %v1298_v13  ;;  %1284 = vadd.xlane.f32.xlu1 %v1283_v14  ;;  %v1301_v54 = vsel %vm655_vm2, %v3157_v36, 0.0 }
 0x872   : > { %v3159_v28 = vpop.eup %3158  ;;  %2856 = vmatpush3.bf16.msra.mxu0 %v1325_v12 }
 0x873   : > { %v1292_v50 = vsel %vm655_vm2, %v3159_v28, 0.0  ;;  %v3161_v38 = vpop.eup %3160 }
 0x874   : > { %1293 = vadd.xlane.f32.xlu1 %v1292_v50  ;;  %1302 = vadd.xlane.f32.xlu0 %v1301_v54  ;;  %v1295_v55 = vsel %vm655_vm2, %v3161_v38, 0.0 }
 0x878   : > { %1296 = vadd.xlane.f32.xlu0 %v1295_v55 }
 0x885   : > { %1425 = vrot.lane.b32.xlu1 %v3411_v8, %s3251_s20 }
 0x889   : > { %1423 = vrot.lane.b32.xlu1 %v3417_v10, %s3251_s20 }
 0x88d   : > { %1421 = vrot.lane.b32.xlu1 %v3422_v11, %s3251_s20 }
 0x88e   : > { %1427 = vrot.lane.b32.xlu0 %v3405_v6, %s3251_s20 }
 0x891   : > { %1415 = vrot.lane.b32.xlu1 %v3437_v26, %s3252_s21 }
 0x892   : > { %1413 = vrot.lane.b32.xlu0 %v3395_v3, %s3252_s21 }
 0x895   : > { %1419 = vrot.lane.b32.xlu1 %v3447_v32, %s3252_s21 }
 0x896   : > { %1417 = vrot.lane.b32.xlu0 %v3439_v27, %s3252_s21 }
 0x8f1   : > { %v1288_v35 = vpop.xlane.xlu0 %1287 }
 0x8f5   : > { %v1282_v56 = vpop.xlane.xlu0 %1281  ;;  %v1291_v51 = vpop.xlane.xlu1 %1290 }
 0x8f6   : > { %3162 = vrcp.f32 %v1291_v51 }
 0x8f7   : > { %3164 = vrcp.f32 %v1282_v56 }
 0x8f8   : > { %3166 = vrcp.f32 %v1288_v35 }
 0x8f9   : > { %v1300_v34 = vpop.xlane.xlu0 %1299  ;;  %v1285_v58 = vpop.xlane.xlu1 %1284 }
 0x8fa   : > { %3168 = vrcp.f32 %v1285_v58 }
 0x8fd   : > { %v1303_v40 = vpop.xlane.xlu0 %1302  ;;  %v1294_v59 = vpop.xlane.xlu1 %1293 }
 0x8fe   : > { %3170 = vrcp.f32 %v1303_v40 }
 0x8ff   : > { %3172 = vrcp.f32 %v1294_v59 }
 0x900   : > { %3174 = vrcp.f32 %v1300_v34 }
 0x901   : > { %v1297_v26 = vpop.xlane.xlu0 %1296  ;;  %v1426_v56 = vpop.permute.xlu1 %1425 }
 0x902   : > { %3176 = vrcp.f32 %v1297_v26  ;;  %v1448_v40 = vsel %vm565_vm1, %v1426_v56, 0 }
 0x903   : > { %v3163_v3 = vpop.eup %3162 }
 0x904   : > { %v3165_v37 = vpop.eup %3164  ;;  %v1315_v21 = vmul.f32 %v3163_v3, %v3151_v1 }
 0x905   : > { %v1428_v32 = vpop.permute.xlu0 %1427  ;;  %v3167_v27 = vpop.eup %3166  ;;  %v1312_v53 = vmul.f32 %v3165_v37, %v3149_v29 }
 0x906   : > { %2953 = vmatprep.subr.msk.bf16.mxu0 %vm565_vm1, %v1428_v32  ;;  %v1314_v39 = vmul.f32 %v3167_v27, %v3611_v49  ;;  %v1451_v55 = vsel %vm565_vm1, %v1428_v32, 0  ;;  %v1424_v59 = vpop.permute.xlu1 %1423 }
 0x907   : > { %v3169_v60 = vpop.eup %3168 }
 0x908   : > { %v1313_v52 = vmul.f32 %v3169_v60, %v3153_v61  ;;  %v1321_v14 = vpack.c.bf16 %v1315_v21, %v1314_v39 }
 0x909   : > { %v1414_v58 = vpop.permute.xlu0 %1413 }
 0x90a   : > { %v1320_v12 = vpack.c.bf16 %v1313_v52, %v1312_v53 }
 0x90b   : > { %v3171_v13 = vpop.eup %3170 }
 0x90c   : > { %v3173_v50 = vpop.eup %3172  ;;  %2857 = vmatprep.mubr.msk.bf16.mxu0 %vm655_vm2, %v1320_v12  ;;  %v1319_v61 = vmul.f32 %v3171_v13, %v3157_v36  ;;  %v1422_v36 = vpop.permute.xlu1 %1421 }
 0x90d   : > { %v3175_v54 = vpop.eup %3174  ;;  %2858 = vmatmul.mubr.msk.bf16.vlgmr.msra.gmra.mxu0 %vm655_vm2, %v1321_v14  ;;  %v1316_v29 = vmul.f32 %v3173_v50, %v3159_v28  ;;  %v1445_v28 = vsel %vm565_vm1, %v1424_v59, 0  ;;  %v1418_v26 = vpop.permute.xlu0 %1417 }
 0x90e   : > { %2866 = vmatpush3.bf16.xpose.msra.mxu0 %v1451_v55  ;;  %v1318_v51 = vmul.f32 %v3175_v54, %v3617_v57  ;;  %v1442_v57 = vsel %vm565_vm1, %v1422_v36, 0 }
 0x90f   : > { %v3177_v35 = vpop.eup %3176  ;;  %2954 = vmatprep.subr.msk.bf16.mxu0 %vm565_vm1, %v1426_v56 }
 0x910   : > { %v1317_v1 = vmul.f32 %v3177_v35, %v3161_v38  ;;  %v1323_v34 = vpack.c.bf16 %v1319_v61, %v1318_v51  ;;  %v1416_v38 = vpop.permute.xlu1 %1415 }
 0x912   : > { %v1322_v49 = vpack.c.bf16 %v1317_v1, %v1316_v29 }
 0x914   : > { %2861 = vmatprep.mubr.msk.bf16.mxu0 %vm655_vm2, %v1322_v49  ;;  %v1420_v3 = vpop.permute.xlu1 %1419 }
 0x915   : > { %2862 = vmatmul.mubr.msk.bf16.gmra.mxu0 %vm655_vm2, %v1323_v34 }
 0x916   : > { %2868 = vmatpush3.bf16.xpose.msra.mxu0 %v1448_v40  ;;  %2873 = vmatprep.mubr.msk.bf16.mxu0 %vm565_vm1, %v1414_v58 }
 0x917   : > { %2955 = vmatprep.subr.msk.bf16.mxu0 %vm565_vm1, %v1424_v59 }
 0x91e   : > { %2870 = vmatpush3.bf16.xpose.msra.mxu0 %v1445_v28 }
 0x91f   : > { %2956 = vmatprep.subr.msk.bf16.mxu0 %vm565_vm1, %v1422_v36 }
 0x926   : > { %2872 = vmatpush3.bf16.xpose.msra.mxu0 %v1442_v57 }
 0x92d   : > { %2874 = vmatmul.mubr.msk.bf16.vlgmr.msra.gmra.mxu0 %vm565_vm1, %v1416_v38 }
 0x92e   : > { %2877 = vmatprep.mubr.msk.bf16.mxu0 %vm565_vm1, %v1418_v26 }
 0x935   : > { %2878 = vmatmul.mubr.msk.bf16.gmra.mxu0 %vm565_vm1, %v1420_v3 }
 0x9cd   : > { %v3651_v32 = vpop.f32.mrf.mxu0 }
 0x9cf   : > { %v3653_v37 = vpop.f32.mrf.mxu0 }
 0x9d1   : > { %v3655_v27 = vpop.f32.mrf.mxu0 }
 0x9d3   : > { %v3659_v21 = vpop.f32.mrf.mxu0 }
 0x9d4   : > { %v2989_v53 = vpack.i.bf16 %v3659_v21, %v3653_v37  ;;  %v4013_v37 = vpack.i.bf16 %v3579_v17, %v3575_v15 }
 0x9d5   : > { %v3663_v52 = vpop.f32.mrf.mxu0 }
 0x9d7   : > { %v3665_v39 = vpop.f32.mrf.mxu0 }
 0x9d9   : > { %v3667_v12 = vpop.f32.mrf.mxu0 }
 0x9db   : > { %v3671_v14 = vpop.f32.mrf.mxu0 }
 0x9ed   : > { %v2875_v54 = vpop.f32.mrf.mxu0 }
 0x9ee   : > { %v1524_v1 = vsel %vm655_vm2, %v2875_v54, -inf }
 0x9ef   : > { %v1487_v55 = vpop.f32.mrf.mxu0 }
 0x9f0   : > { %v1518_v35 = vsel %vm655_vm2, %v1487_v55, -inf }
 0x9f1   : > { %1519 = vmax.xlane.f32.xlu0 %v1518_v35  ;;  %v2876_v56 = vpop.f32.mrf.mxu0 }
 0x9f2   : > { %v1527_v34 = vsel %vm655_vm2, %v2876_v56, -inf }
 0x9f3   : > { %v1490_v29 = vpop.f32.mrf.mxu0 }
 0x9f4   : > { %v1521_v61 = vsel %vm655_vm2, %v1490_v29, -inf }
 0x9f5   : > { %1525 = vmax.xlane.f32.xlu0 %v1524_v1  ;;  %1522 = vmax.xlane.f32.xlu1 %v1521_v61  ;;  %v2879_v49 = vpop.f32.mrf.mxu0 }
 0x9f6   : > { %v1536_v36 = vsel %vm655_vm2, %v2879_v49, -inf }
 0x9f7   : > { %v1503_v51 = vpop.f32.mrf.mxu0 }
 0x9f8   : > { %v1530_v59 = vsel %vm655_vm2, %v1503_v51, -inf }
 0x9f9   : > { %1528 = vmax.xlane.f32.xlu0 %v1527_v34  ;;  %v2880_v58 = vpop.f32.mrf.mxu0 }
 0x9fa   : > { %v1539_v57 = vsel %vm655_vm2, %v2880_v58, -inf }
 0x9fb   : > { %v3679_v40 = vpop.f32.mrf.mxu0 }
 0x9fc   : > { %v1533_v28 = vsel %vm655_vm2, %v3679_v40, -inf }
 0x9fd   : > { %1531 = vmax.xlane.f32.xlu0 %v1530_v59  ;;  %1534 = vmax.xlane.f32.xlu1 %v1533_v28 }
 0xa01   : > { %1537 = vmax.xlane.f32.xlu0 %v1536_v36  ;;  %1540 = vmax.xlane.f32.xlu1 %v1539_v57 }
 0xa7a   : > { %v1520_v38 = vpop.xlane.xlu0 %1519 }
 0xa7b   : > { %v1542_v26 = vsub.f32 %v1487_v55, %v1520_v38 }
 0xa7d   : > { %v1550_v61 = vmul.f32 1.442695, %v1542_v26 }
 0xa7e   : > { %v1526_v3 = vpop.xlane.xlu0 %1525  ;;  %v1523_v35 = vpop.xlane.xlu1 %1522 }
 0xa7f   : > { %v1544_v1 = vsub.f32 %v2875_v54, %v1526_v3  ;;  %v1543_v50 = vsub.f32 %v1490_v29, %v1523_v35 }
 0xa81   : > { %v1554_v34 = vmul.f32 1.442695, %v1544_v1  ;;  %v1552_v59 = vmul.f32 1.442695, %v1543_v50 }
 0xa82   : > { %v1529_v13 = vpop.xlane.xlu0 %1528 }
 0xa83   : > { %3178 = vpow2.f32 %v1554_v34  ;;  %v1545_v30 = vsub.f32 %v2876_v56, %v1529_v13 }
 0xa84   : > { %3180 = vpow2.f32 %v1550_v61 }
 0xa85   : > { %v1556_v28 = vmul.f32 1.442695, %v1545_v30 }
 0xa86   : > { %v1532_v60 = vpop.xlane.xlu0 %1531  ;;  %v1535_v26 = vpop.xlane.xlu1 %1534 }
 0xa87   : > { %3182 = vpow2.f32 %v1556_v28  ;;  %v1546_v18 = vsub.f32 %v1503_v51, %v1532_v60  ;;  %v1547_v1 = vsub.f32 %v3679_v40, %v1535_v26 }
 0xa88   : > { %3184 = vpow2.f32 %v1552_v59 }
 0xa89   : > { %v1558_v33 = vmul.f32 1.442695, %v1546_v18 }
 0xa8a   : > { %v1538_v36 = vpop.xlane.xlu0 %1537  ;;  %v1541_v3 = vpop.xlane.xlu1 %1540 }
 0xa8b   : > { %v1548_v57 = vsub.f32 %v2879_v49, %v1538_v36  ;;  %v1549_v35 = vsub.f32 %v2880_v58, %v1541_v3 }
 0xa8d   : > { %v1562_v55 = vmul.f32 1.442695, %v1548_v57  ;;  %v1564_v61 = vmul.f32 1.442695, %v1549_v35 }
 0xa8f   : > { %3186 = vpow2.f32 %v1562_v55 }
 0xa90   : > { %v3686_v38 = vpop.eup %3178  ;;  %3188 = vpow2.f32 %v1558_v33 }
 0xa91   : > { %v1572_v54 = vsel %vm655_vm2, %v3686_v38, 0.0  ;;  %v3181_v29 = vpop.eup %3180  ;;  %3190 = vpow2.f32 %v1564_v61 }
 0xa92   : > { %1573 = vadd.xlane.f32.xlu0 %v1572_v54  ;;  %v1566_v30 = vsel %vm655_vm2, %v3181_v29, 0.0 }
 0xa94   : > { %v3690_v13 = vpop.eup %3182 }
 0xa95   : > { %v1575_v60 = vsel %vm655_vm2, %v3690_v13, 0.0  ;;  %v3185_v50 = vpop.eup %3184 }
 0xa96   : > { %1567 = vadd.xlane.f32.xlu0 %v1566_v30  ;;  %1576 = vadd.xlane.f32.xlu1 %v1575_v60  ;;  %v1569_v18 = vsel %vm655_vm2, %v3185_v50, 0.0 }
 0xa9a   : > { %1570 = vadd.xlane.f32.xlu1 %v1569_v18 }
 0xa9c   : > { %v3696_v56 = vpop.eup %3186 }
 0xa9d   : > { %v1584_v33 = vsel %vm655_vm2, %v3696_v56, 0.0  ;;  %v3700_v49 = vpop.eup %3188 }
 0xa9e   : > { %1585 = vadd.xlane.f32.xlu0 %v1584_v33  ;;  %v1578_v51 = vsel %vm655_vm2, %v3700_v49, 0.0 }
 0xaa2   : > { %1579 = vadd.xlane.f32.xlu0 %v1578_v51 }
 0xaab   : > { %1614 = vrot.lane.b32.xlu1 %v3411_v8, %s3253_s22  ;;  %v1560_v8 = vmul.f32 1.442695, %v1547_v1 }
 0xaad   : > { %3192 = vpow2.f32 %v1560_v8 }
 0xaaf   : > { %1612 = vrot.lane.b32.xlu1 %v3417_v10, %s3253_s22  ;;  %v3191_v10 = vpop.eup %3190 }
 0xab0   : > { %v1587_v16 = vsel %vm655_vm2, %v3191_v10, 0.0 }
 0xab8   : > { %1616 = vrot.lane.b32.xlu0 %v3405_v6, %s3253_s22  ;;  %v4012_v6 = vpack.i.bf16 %v3595_v31, %v3589_v24  ;;  %v4014_v24 = vpack.i.bf16 %v3655_v27, %v3651_v32  ;;  %v4015_v31 = vpack.i.bf16 %v3591_v25, %v3587_v23 }
 0xaba   : > { %v3193_v19 = vpop.eup %3192 }
 0xabc   : > { %2980 = vrot.lane.b32.xlu0 %v2979_v22, %s3254_s23  ;;  %v1581_v22 = vsel %vm655_vm2, %v3193_v19, 0.0 }
 0xac0   : > { %2990 = vrot.lane.b32.xlu0 %v2989_v53, %s3255_s25 }
 0xac4   : > { %3000 = vrot.lane.b32.xlu0 %v4012_v6, %s3254_s23  ;;  %v3061_v6 = vld [vmem:[%s4008_s4] sm:$0xff]  }
 0xad3   : > { %1588 = vadd.xlane.f32.xlu1 %v1587_v16 }
 0xad7   : > { %1582 = vadd.xlane.f32.xlu1 %v1581_v22 }
 0xae8   : > { %1610 = vrot.lane.b32.xlu1 %v3422_v11, %s3253_s22 }
 0xaec   : > { %2985 = vrot.lane.b32.xlu1 %v4013_v37, %s3254_s23 }
 0xaf0   : > { %2995 = vrot.lane.b32.xlu1 %v4014_v24, %s3255_s25  ;;  %v4016_v24 = vpack.i.bf16 %v3667_v12, %v3663_v52 }
 0xaf4   : > { %3005 = vrot.lane.b32.xlu1 %v4015_v31, %s3254_s23 }
 0xb1b   : > { %v1574_v21 = vpop.xlane.xlu0 %1573 }
 0xb1f   : > { %v1568_v53 = vpop.xlane.xlu0 %1567  ;;  %v1577_v58 = vpop.xlane.xlu1 %1576 }
 0xb20   : > { %3194 = vrcp.f32 %v1568_v53 }
 0xb23   : > { %v1571_v40 = vpop.xlane.xlu1 %1570 }
 0xb24   : > { %3196 = vrcp.f32 %v1571_v40 }
 0xb25   : > { %3198 = vrcp.f32 %v1577_v58  ;;  %v2654_v58 = vld [vmem:[%s3757_s14] sm:$0xff]  }
 0xb26   : > { %3200 = vrcp.f32 %v1574_v21  ;;  %v4017_v21 = vpack.i.bf16 %v3671_v14, %v3665_v39 }
 0xb27   : > { %v1586_v11 = vpop.xlane.xlu0 %1585  ;;  %v1615_v15 = vpop.permute.xlu1 %1614 }
 0xb2b   : > { %v1580_v34 = vpop.xlane.xlu0 %1579  ;;  %v1613_v27 = vpop.permute.xlu1 %1612 }
 0xb2d   : > { %v3195_v59 = vpop.eup %3194 }
 0xb2e   : > { %v1598_v23 = vmul.f32 %v3195_v59, %v3181_v29 }
 0xb2f   : > { %v1617_v17 = vpop.permute.xlu0 %1616 }
 0xb30   : > { %2881 = vmatprep.subr.bf16.mxu0 %v1617_v17  ;;  %2933 = vmatprep.subr.bf16.mxu1 %v1617_v17 }
 0xb31   : > { %v3197_v28 = vpop.eup %3196  ;;  %2882 = vmatpush3.bf16.msra.mxu0 %v1617_v17  ;;  %2937 = vmatpush3.bf16.msra.mxu1 %v1617_v17 }
 0xb32   : > { %2883 = vmatprep.subr.bf16.mxu0 %v1615_v15  ;;  %2934 = vmatprep.subr.bf16.mxu1 %v1615_v15  ;;  %v1599_v25 = vmul.f32 %v3197_v28, %v3185_v50  ;;  %v3199_v57 = vpop.eup %3198 }
 0xb33   : > { %v3201_v54 = vpop.eup %3200  ;;  %v1601_v29 = vmul.f32 %v3199_v57, %v3690_v13  ;;  %v2981_v14 = vpop.permute.xlu0 %2980 }
 0xb34   : > { %v1606_v32 = vpack.c.bf16 %v1599_v25, %v1598_v23  ;;  %v1600_v60 = vmul.f32 %v3201_v54, %v3686_v38  ;;  %v3060_v38 = vld [vmem:[%s4008_s4 + $0x8] sm:$0xff]   ;;  %v2983_v23 = vunpack.i.h.bf16 %v2981_v14  ;;  %v2982_v25 = vunpack.i.l.bf16 %v2981_v14 }
 0xb35   : > { %2884 = vmatpush3.bf16.msra.mxu0 %v1615_v15  ;;  %2938 = vmatpush3.bf16.msra.mxu1 %v1615_v15 }
 0xb36   : > { %2885 = vmatprep.subr.bf16.mxu0 %v1613_v27  ;;  %2935 = vmatprep.subr.bf16.mxu1 %v1613_v27  ;;  %v1607_v50 = vpack.c.bf16 %v1601_v29, %v1600_v60 }
 0xb37   : > { %2889 = vmatprep.mubr.msk.bf16.mxu0 %vm655_vm2, %v1606_v32  ;;  %v2991_v17 = vpop.permute.xlu0 %2990 }
 0xb38   : > { %v2993_v54 = vunpack.i.h.bf16 %v2991_v17  ;;  %v2992_v29 = vunpack.i.l.bf16 %v2991_v17 }
 0xb39   : > { %2886 = vmatpush3.bf16.msra.mxu0 %v1613_v27  ;;  %2939 = vmatpush3.bf16.msra.mxu1 %v1613_v27 }
 0xb3b   : > { %v3001_v32 = vpop.permute.xlu0 %3000 }
 0xb5c   : > { %v1589_v36 = vpop.xlane.xlu1 %1588 }
 0xb5d   : > { %3202 = vrcp.f32 %v1589_v36 }
 0xb5e   : > { %3204 = vrcp.f32 %v1580_v34  ;;  %v2656_v34 = vunpack.c.h.bf16 %v2654_v58 }
 0xb5f   : > { %3206 = vrcp.f32 %v1586_v11  ;;  %v2655_v11 = vunpack.c.l.bf16 %v2654_v58 }
 0xb60   : > { %v1583_v55 = vpop.xlane.xlu1 %1582 }
 0xb61   : > { %3208 = vrcp.f32 %v1583_v55  ;;  %v3039_v59 = vpack.i.bf16 %v2656_v34, %v2655_v11 }
 0xb64   : > { %v1611_v30 = vpop.permute.xlu1 %1610 }
 0xb65   : > { %2887 = vmatprep.subr.bf16.mxu0 %v1611_v30  ;;  %2936 = vmatprep.subr.bf16.mxu1 %v1611_v30 }
 0xb66   : > { %2888 = vmatpush3.bf16.msra.mxu0 %v1611_v30  ;;  %2940 = vmatpush3.bf16.msra.mxu1 %v1611_v30 }
 0xb67   : > { %2897 = vmatprep.subr.bf16.mxu1 %v3060_v38 }
 0xb68   : > { %v2986_v39 = vpop.permute.xlu1 %2985 }
 0xb69   : > { %2890 = vmatmul.mubr.msk.bf16.vlgmr.msra.gmra.mxu0 %vm655_vm2, %v1607_v50  ;;  %v2988_v27 = vunpack.i.h.bf16 %v2986_v39  ;;  %v2987_v36 = vunpack.i.l.bf16 %v2986_v39 }
 0xb6a   : > { %v3203_v18 = vpop.eup %3202 }
 0xb6b   : > { %v3205_v33 = vpop.eup %3204  ;;  %v1605_v3 = vmul.f32 %v3203_v18, %v3191_v10  ;;  %v1796_v18 = vsel %vm565_vm1, %v3513_v43, %v2983_v23 }
 0xb6c   : > { %v3207_v51 = vpop.eup %3206  ;;  %v1602_v35 = vmul.f32 %v3205_v33, %v3700_v49  ;;  %v2996_v15 = vpop.permute.xlu1 %2995  ;;  %v1795_v33 = vsel %vm565_vm1, %v3509_v42, %v2982_v25  ;;  %v1804_v43 = vsel %vm320_vm0, %v1796_v18, %v2993_v54 }
 0xb6d   : > { %v1604_v13 = vmul.f32 %v3207_v51, %v3696_v56  ;;  %v2998_v57 = vunpack.i.h.bf16 %v2996_v15  ;;  %v2997_v55 = vunpack.i.l.bf16 %v2996_v15  ;;  %v1798_v51 = vsel %vm565_vm1, %v3511_v20, %v2988_v27 }
 0xb6e   : > { %v3209_v26 = vpop.eup %3208 }
 0xb6f   : > { %v1603_v1 = vmul.f32 %v3209_v26, %v3193_v19  ;;  %v1609_v8 = vpack.c.bf16 %v1605_v3, %v1604_v13  ;;  %v1797_v26 = vsel %vm565_vm1, %v3507_v41, %v2987_v36  ;;  %v2669_v36 = vld [vmem:[%s3757_s14 + $0x8] sm:$0xff]  }
 0xb70   : > { %v3006_v28 = vpop.permute.xlu1 %3005 }
 0xb71   : > { %v1608_v61 = vpack.c.bf16 %v1603_v1, %v1602_v35  ;;  %v1805_v35 = vsel %vm320_vm0, %v1797_v26, %v2997_v55  ;;  %v1806_v1 = vsel %vm320_vm0, %v1798_v51, %v2998_v57  ;;  %v2659_v57 = vunpack.c.l.bf16 %v2669_v36 }
 0xb72   : > { %v2660_v55 = vunpack.c.h.bf16 %v2669_v36 }
 0xb73   : > { %2893 = vmatprep.mubr.msk.bf16.mxu1 %vm655_vm2, %v1608_v61 }
 0xb74   : > { %2894 = vmatmul.mubr.msk.bf16.vlgmr.msra.gmra.mxu1 %vm655_vm2, %v1609_v8  ;;  %v1803_v8 = vsel %vm320_vm0, %v1795_v33, %v2992_v29  ;;  %v3044_v54 = vpack.i.bf16 %v2660_v55, %v2659_v57  ;;  %v1826_v29 = vsub.s32 2, %v3364_v9 }
 0xb75   : > { %2898 = vmatpush3.bf16.msra.mxu1 %v3060_v38 }
 0xb76   : > { %2899 = vmatprep.subr.bf16.mxu1 %v3061_v6 }
 0xb79   : > { %2900 = vmatpush3.bf16.msra.mxu1 %v3061_v6 }
 0xc29   : > { %v2891_v49 = vpop.f32.mrf.mxu0 }
 0xc2b   : > { %v1668_v56 = vpop.f32.mrf.mxu0 }
 0xc2d   : > { %v2892_v10 = vpop.f32.mrf.mxu0 }
 0xc2e   : > { %v3009_v16 = vpack.i.bf16 %v2892_v10, %v2891_v49 }
 0xc2f   : > { %v1671_v19 = vpop.f32.mrf.mxu0 }
 0xc30   : > { %v3014_v22 = vpack.i.bf16 %v1671_v19, %v1668_v56  ;;  %3010 = vrot.lane.b32.xlu1 %v3009_v16, %s3256_s9  ;;  %v3003_v16 = vunpack.i.h.bf16 %v3001_v32  ;;  %v3002_v19 = vunpack.i.l.bf16 %v3001_v32 }
 0xc32   : > { %3015 = vrot.lane.b32.xlu0 %v3014_v22, %s3256_s9  ;;  %v3008_v22 = vunpack.i.h.bf16 %v3006_v28  ;;  %v1800_v34 = vsel %vm565_vm1, %v3521_v47, %v3003_v16 }
 0xc34   : > { %v2895_v37 = vpop.f32.mrf.mxu1  ;;  %3025 = vrot.lane.b32.xlu1 %v4016_v24, %s3255_s25 }
 0xc36   : > { %v1684_v31 = vpop.f32.mrf.mxu1  ;;  %3020 = vrot.lane.b32.xlu0 %v4017_v21, %s3255_s25 }
 0xc38   : > { %v2896_v53 = vpop.f32.mrf.mxu1 }
 0xc39   : > { %v3034_v40 = vpack.i.bf16 %v2896_v53, %v2895_v37  ;;  %v3007_v37 = vunpack.i.l.bf16 %v3006_v28 }
 0xc3a   : > { %v1687_v52 = vpop.f32.mrf.mxu1 }
 0xc3b   : > { %v3029_v12 = vpack.i.bf16 %v1687_v52, %v1684_v31  ;;  %3035 = vrot.lane.b32.xlu1 %v3034_v40, %s3256_s9  ;;  %v1799_v52 = vsel %vm565_vm1, %v3517_v45, %v3002_v19 }
 0xc3d   : > { %3030 = vrot.lane.b32.xlu0 %v3029_v12, %s3256_s9  ;;  %v1802_v12 = vsel %vm565_vm1, %v3519_v46, %v3008_v22 }
 0xc3f   : > { %3045 = vrot.lane.b32.xlu1 %v3044_v54, %s3244_s13 }
 0xc41   : > { %3040 = vrot.lane.b32.xlu0 %v3039_v59, %s3244_s13  ;;  %v1801_v59 = vsel %vm565_vm1, %v3515_v44, %v3007_v37 }
 0xca2   : > { %v3011_v30 = vpop.permute.xlu1 %3010 }
 0xca3   : > { %v3013_v60 = vunpack.i.h.bf16 %v3011_v30  ;;  %v3012_v50 = vunpack.i.l.bf16 %v3011_v30  ;;  %v3803_v30 = vld [vmem:[%s4006_s2] sm:$0x7f] }
 0xca4   : > { %v3016_v3 = vpop.permute.xlu0 %3015 }
 0xca5   : > { %v3018_v13 = vunpack.i.h.bf16 %v3016_v3  ;;  %v3017_v61 = vunpack.i.l.bf16 %v3016_v3  ;;  %v1814_v38 = vsel %vm1811_vm3, %v1805_v35, %v3012_v50  ;;  %v1815_v42 = vsel %vm1811_vm3, %v1806_v1, %v3013_v60 }
 0xca6   : > { %v1821_v49 = vpack.c.bf16 %v1815_v42, %v1814_v38  ;;  %v3026_v56 = vpop.permute.xlu1 %3025  ;;  %v1827_v60 = vrot.slane %v3803_v30, %v1826_v29 }
 0xca7   : > { %v1813_v20 = vsel %vm1811_vm3, %v1804_v43, %v3018_v13  ;;  %v1812_v6 = vsel %vm1811_vm3, %v1803_v8, %v3017_v61  ;;  %v3028_v24 = vunpack.i.h.bf16 %v3026_v56  ;;  %v3027_v31 = vunpack.i.l.bf16 %v3026_v56  ;;  %v2670_v61 = vld [vmem:[%s3757_s14 + $0x10] sm:$0xff]  }
 0xca8   : > { %v1820_v41 = vpack.c.bf16 %v1813_v20, %v1812_v6  ;;  %v3021_v10 = vpop.permute.xlu0 %3020  ;;  %v2663_v38 = vunpack.c.l.bf16 %v2670_v61  ;;  %v2664_v42 = vunpack.c.h.bf16 %v2670_v61  ;;  %v2671_v6 = vld [vmem:[%s3757_s14 + $0x18] sm:$0xff]  }
 0xca9   : > { %v3023_v21 = vunpack.i.h.bf16 %v3021_v10  ;;  %v3022_v53 = vunpack.i.l.bf16 %v3021_v10  ;;  %v1809_v14 = vsel %vm320_vm0, %v1801_v59, %v3027_v31  ;;  %v1810_v15 = vsel %vm320_vm0, %v1802_v12, %v3028_v24 }
 0xcaa   : > { %2901 = vmatprep.mubr.msk.bf16.mxu1 %vm1840_vm4, %v1820_v41  ;;  %v3049_v10 = vpack.i.bf16 %v2664_v42, %v2663_v38  ;;  %v2667_v16 = vunpack.c.l.bf16 %v2671_v6  ;;  %v2668_v19 = vunpack.c.h.bf16 %v2671_v6 }
 0xcab   : > { %2902 = vmatmul.mubr.msk.bf16.vlgmr.msra.gmra.mxu1 %vm1840_vm4, %v1821_v49  ;;  %v1808_v23 = vsel %vm320_vm0, %v1800_v34, %v3023_v21  ;;  %v1807_v47 = vsel %vm320_vm0, %v1799_v52, %v3022_v53 }
 0xcac   : > { %v3054_v37 = vpack.i.bf16 %v2668_v19, %v2667_v16 }
 0xcad   : > { %v3036_v58 = vpop.permute.xlu1 %3035 }
 0xcae   : > { %v3038_v40 = vunpack.i.h.bf16 %v3036_v58  ;;  %v3037_v11 = vunpack.i.l.bf16 %v3036_v58 }
 0xcaf   : > { %v3031_v39 = vpop.permute.xlu0 %3030 }
 0xcb0   : > { %v3033_v17 = vunpack.i.h.bf16 %v3031_v39  ;;  %v3032_v28 = vunpack.i.l.bf16 %v3031_v39  ;;  %v1818_v45 = vsel %vm1811_vm3, %v1809_v14, %v3037_v11  ;;  %v1819_v25 = vsel %vm1811_vm3, %v1810_v15, %v3038_v40 }
 0xcb1   : > { %v1823_v27 = vpack.c.bf16 %v1819_v25, %v1818_v45  ;;  %v3046_v31 = vpop.permute.xlu1 %3045 }
 0xcb2   : > { %v1816_v46 = vsel %vm1811_vm3, %v1807_v47, %v3032_v28  ;;  %v1817_v44 = vsel %vm1811_vm3, %v1808_v23, %v3033_v17 }
 0xcb3   : > { %v1822_v32 = vpack.c.bf16 %v1817_v44, %v1816_v46  ;;  %v3041_v24 = vpop.permute.xlu0 %3040 }
 0xcb5   : > { %2905 = vmatprep.mubr.msk.bf16.mxu1 %vm1840_vm4, %v1822_v32 }
 0xcb6   : > { %2906 = vmatmul.mubr.msk.bf16.gmra.mxu1 %vm1840_vm4, %v1823_v27 }
 0xd6b   : > { %v2903_v50 = vpop.f32.mrf.mxu1 }
 0xd6c   : > { %v1896_v18 = vadd.f32 %v2903_v50, %v1827_v60 }
 0xd6d   : > { %v1887_v33 = vpop.f32.mrf.mxu1 }
 0xd6e   : > { %1930 = vrot.lane.b32.xlu0 %v1896_v18, %s3244_s13  ;;  %v1888_v26 = vadd.f32 %v1887_v33, %v1827_v60 }
 0xd6f   : > { %v2904_v51 = vpop.f32.mrf.mxu1 }
 0xd70   : > { %v1899_v3 = vadd.f32 %v2904_v51, %v1827_v60 }
 0xd71   : > { %v1890_v35 = vpop.f32.mrf.mxu1 }
 0xd72   : > { %1932 = vrot.lane.b32.xlu1 %v1899_v3, %s3244_s13  ;;  %1926 = vrot.lane.b32.xlu0 %v1888_v26, %s3244_s13  ;;  %v1891_v1 = vadd.f32 %v1890_v35, %v1827_v60 }
 0xd76   : > { %v2907_v13 = vpop.f32.mrf.mxu1  ;;  %1928 = vrot.lane.b32.xlu1 %v1891_v1, %s3244_s13 }
 0xd77   : > { %v1912_v8 = vadd.f32 %v2907_v13, %v1827_v60 }
 0xd78   : > { %v1903_v43 = vpop.f32.mrf.mxu1 }
 0xd79   : > { %1938 = vrot.lane.b32.xlu0 %v1912_v8, %s3244_s13  ;;  %v1904_v41 = vadd.f32 %v1903_v43, %v1827_v60 }
 0xd7a   : > { %v2908_v20 = vpop.f32.mrf.mxu1 }
 0xd7b   : > { %v1915_v49 = vadd.f32 %v2908_v20, %v1827_v60 }
 0xd7c   : > { %v1906_v56 = vpop.f32.mrf.mxu1 }
 0xd7d   : > { %1940 = vrot.lane.b32.xlu1 %v1915_v49, %s3244_s13  ;;  %1934 = vrot.lane.b32.xlu0 %v1904_v41, %s3244_s13  ;;  %v1907_v22 = vadd.f32 %v1906_v56, %v1827_v60 }
 0xd81   : > { %1936 = vrot.lane.b32.xlu1 %v1907_v22, %s3244_s13  ;;  %3050 = vrot.lane.b32.xlu0 %v3049_v10, %s3244_s13 }
 0xd85   : > { %3055 = vrot.lane.b32.xlu1 %v3054_v37, %s3244_s13 }
 0xde0   : > { %v1931_v21 = vpop.permute.xlu0 %1930 }
 0xde1   : > { %v1952_v11 = vadd.f32 %v3383_v48, %v1931_v21 }
 0xde3   : > { %v3825_v59 = vadd.low.f32.bf16 %v1952_v11, %v3046_v31 }
 0xde4   : > { %v1933_v53 = vpop.permute.xlu1 %1932  ;;  %v1927_v58 = vpop.permute.xlu0 %1926 }
 0xde5   : > { %v1950_v40 = vadd.f32 %v1927_v58, %v3385_v62  ;;  %v1953_v39 = vadd.f32 %v3387_v63, %v1933_v53 }
 0xde7   : > { %v3820_v34 = vadd.low.f32.bf16 %v1950_v40, %v3041_v24  ;;  %v3834_v48 = vadd.high.f32.bf16 %v1953_v39, %v3046_v31 }
 0xde8   : > { %v1929_v52 = vpop.permute.xlu1 %1928 }
 0xde9   : > { %v1951_v12 = vadd.f32 %v1929_v52, %v3389_v0  ;;  %2022 = vrot.lane.b32.xlu0 %v3820_v34, %s3244_s13 }
 0xdeb   : > { %v3828_v14 = vadd.high.f32.bf16 %v1951_v12, %v3041_v24  ;;  %v1939_v15 = vpop.permute.xlu0 %1938 }
 0xdec   : > { %v1956_v46 = vadd.f32 %v3393_v2, %v1939_v15 }
 0xded   : > { %2024 = vrot.lane.b32.xlu1 %v3828_v14, %s3244_s13  ;;  %2026 = vrot.lane.b32.xlu0 %v3825_v59, %s3244_s13 }
 0xdef   : > { %v1941_v62 = vpop.permute.xlu1 %1940  ;;  %v1935_v0 = vpop.permute.xlu0 %1934 }
 0xdf0   : > { %v1954_v63 = vadd.f32 %v1935_v0, %v3397_v4  ;;  %v1957_v44 = vadd.f32 %v3401_v5, %v1941_v62 }
 0xdf1   : > { %2028 = vrot.lane.b32.xlu1 %v3834_v48, %s3244_s13 }
 0xdf3   : > { %v1937_v17 = vpop.permute.xlu1 %1936  ;;  %v3051_v28 = vpop.permute.xlu0 %3050 }
 0xdf4   : > { %v1955_v23 = vadd.f32 %v1937_v17, %v3407_v7  ;;  %v3842_v45 = vadd.low.f32.bf16 %v1954_v63, %v3051_v28 }
 0xdf6   : > { %v3840_v47 = vadd.high.f32.bf16 %v1955_v23, %v3051_v28  ;;  %2030 = vrot.lane.b32.xlu0 %v3842_v45, %s3244_s13 }
 0xdf7   : > { %v3056_v25 = vpop.permute.xlu1 %3055 }
 0xdf8   : > { %2032 = vrot.lane.b32.xlu1 %v3840_v47, %s3244_s13  ;;  %v3850_v32 = vadd.high.f32.bf16 %v1957_v44, %v3056_v25  ;;  %v3852_v4 = vadd.low.f32.bf16 %v1956_v46, %v3056_v25 }
 0xdfa   : > { %2034 = vrot.lane.b32.xlu0 %v3852_v4, %s3244_s13 }
 0xdfc   : > { %2036 = vrot.lane.b32.xlu1 %v3850_v32, %s3244_s13 }
 0xe5b   : > { %v2023_v7 = vpop.permute.xlu0 %2022 }
 0xe5c   : > { %v2046_v2 = vsel %vm1840_vm4, %v2023_v7, 0.0 }
 0xe5d   : > { %2047 = vadd.xlane.f32.xlu0 %v2046_v2 }
 0xe5f   : > { %v2025_v5 = vpop.permute.xlu1 %2024  ;;  %v2027_v27 = vpop.permute.xlu0 %2026 }
 0xe60   : > { %v2049_v36 = vsel %vm1840_vm4, %v2025_v5, 0.0  ;;  %v2052_v57 = vsel %vm1840_vm4, %v2027_v27, 0.0 }
 0xe61   : > { %2050 = vadd.xlane.f32.xlu1 %v2049_v36  ;;  %2053 = vadd.xlane.f32.xlu0 %v2052_v57 }
 0xe63   : > { %v2029_v55 = vpop.permute.xlu1 %2028 }
 0xe64   : > { %v2055_v54 = vsel %vm1840_vm4, %v2029_v55, 0.0 }
 0xe65   : > { %2056 = vadd.xlane.f32.xlu0 %v2055_v54 }
 0xe68   : > { %v2031_v60 = vpop.permute.xlu0 %2030 }
 0xe69   : > { %v2058_v18 = vsel %vm1840_vm4, %v2031_v60, 0.0 }
 0xe6a   : > { %v2033_v29 = vpop.permute.xlu1 %2032  ;;  %2059 = vadd.xlane.f32.xlu0 %v2058_v18  ;;  %v2185_v18 = vsub.s32 3, %v3364_v9 }
 0xe6b   : > { %v2061_v50 = vsel %vm1840_vm4, %v2033_v29, 0.0 }
 0xe6c   : > { %2062 = vadd.xlane.f32.xlu1 %v2061_v50  ;;  %v2035_v51 = vpop.permute.xlu0 %2034  ;;  %v2201_v50 = vsub.s32 4, %v3364_v9 }
 0xe6d   : > { %v2064_v3 = vsel %vm1840_vm4, %v2035_v51, 0.0  ;;  %v2186_v51 = vrot.slane %v3803_v30, %v2185_v18 }
 0xe6e   : > { %v2037_v33 = vpop.permute.xlu1 %2036  ;;  %2065 = vadd.xlane.f32.xlu0 %v2064_v3 }
 0xe6f   : > { %v2067_v26 = vsel %vm1840_vm4, %v2037_v33, 0.0  ;;  %v2202_v33 = vrot.slane %v3803_v30, %v2201_v50 }
 0xe70   : > { %2068 = vadd.xlane.f32.xlu1 %v2067_v26  ;;  %v3062_v26 = vld [vmem:[%s4009_s5 + $0x8] sm:$0xff]  }
 0xe71   : > { %2909 = vmatprep.subr.bf16.mxu0 %v3062_v26 }
 0xe72   : > { %2910 = vmatpush3.bf16.msra.mxu0 %v3062_v26 }
 0xee6   : > { %v2048_v35 = vpop.xlane.xlu0 %2047 }
 0xee7   : > { %v2071_v1 = vmul.f32 0.03125, %v2048_v35 }
 0xee9   : > { %v3867_v13 = vsub.f32 %v3820_v34, %v2071_v1 }
 0xeea   : > { %v2051_v61 = vpop.xlane.xlu1 %2050  ;;  %v2054_v8 = vpop.xlane.xlu0 %2053 }
 0xeeb   : > { %v2087_v43 = vmul.f32 %v3867_v13, %v3867_v13  ;;  %v2072_v38 = vmul.f32 0.03125, %v2051_v61  ;;  %v2073_v42 = vmul.f32 0.03125, %v2054_v8 }
 0xeed   : > { %v3872_v20 = vsub.f32 %v3825_v59, %v2073_v42  ;;  %2103 = vrot.lane.b32.xlu0 %v2087_v43, %s3244_s13  ;;  %v3876_v41 = vsub.f32 %v3828_v14, %v2072_v38 }
 0xeee   : > { %v2057_v6 = vpop.xlane.xlu0 %2056 }
 0xeef   : > { %v2089_v49 = vmul.f32 %v3872_v20, %v3872_v20  ;;  %v2074_v56 = vmul.f32 0.03125, %v2057_v6  ;;  %v2088_v10 = vmul.f32 %v3876_v41, %v3876_v41 }
 0xef1   : > { %2107 = vrot.lane.b32.xlu1 %v2089_v49, %s3244_s13  ;;  %v3884_v16 = vsub.f32 %v3834_v48, %v2074_v56 }
 0xef3   : > { %v2060_v22 = vpop.xlane.xlu0 %2059  ;;  %v2090_v31 = vmul.f32 %v3884_v16, %v3884_v16 }
 0xef4   : > { %v2075_v24 = vmul.f32 0.03125, %v2060_v22 }
 0xef5   : > { %v2063_v19 = vpop.xlane.xlu1 %2062  ;;  %2105 = vrot.lane.b32.xlu1 %v2088_v10, %s3244_s13 }
 0xef6   : > { %v2076_v37 = vmul.f32 0.03125, %v2063_v19  ;;  %v3893_v53 = vsub.f32 %v3842_v45, %v2075_v24 }
 0xef7   : > { %v2066_v40 = vpop.xlane.xlu0 %2065 }
 0xef8   : > { %v3890_v21 = vsub.f32 %v3840_v47, %v2076_v37  ;;  %v2091_v52 = vmul.f32 %v3893_v53, %v3893_v53  ;;  %v2077_v39 = vmul.f32 0.03125, %v2066_v40 }
 0xef9   : > { %v2069_v58 = vpop.xlane.xlu1 %2068  ;;  %2109 = vrot.lane.b32.xlu1 %v2090_v31, %s3244_s13  ;;  %v3063_v31 = vld [vmem:[%s4009_s5] sm:$0xff]  }
 0xefa   : > { %v2092_v11 = vmul.f32 %v3890_v21, %v3890_v21  ;;  %v2078_v12 = vmul.f32 0.03125, %v2069_v58  ;;  %v3904_v62 = vsub.f32 %v3852_v4, %v2077_v39  ;;  %2111 = vrot.lane.b32.xlu0 %v2091_v52, %s3244_s13  ;;  %2911 = vmatprep.subr.bf16.mxu0 %v3063_v31 }
 0xefb   : > { %2912 = vmatpush3.bf16.msra.mxu0 %v3063_v31 }
 0xefc   : > { %v3901_v15 = vsub.f32 %v3850_v32, %v2078_v12  ;;  %v2093_v17 = vmul.f32 %v3904_v62, %v3904_v62 }
 0xefd   : > { %2113 = vrot.lane.b32.xlu1 %v2092_v11, %s3244_s13 }
 0xefe   : > { %v2094_v0 = vmul.f32 %v3901_v15, %v3901_v15  ;;  %2115 = vrot.lane.b32.xlu0 %v2093_v17, %s3244_s13 }
 0xf01   : > { %2117 = vrot.lane.b32.xlu1 %v2094_v0, %s3244_s13 }
 0xf5f   : > { %v2104_v23 = vpop.permute.xlu0 %2103 }
 0xf60   : > { %v2127_v46 = vsel %vm1840_vm4, %v2104_v23, 0.0 }
 0xf63   : > { %v2108_v28 = vpop.permute.xlu1 %2107 }
 0xf64   : > { %v2133_v63 = vsel %vm1840_vm4, %v2108_v28, 0.0 }
 0xf65   : > { %2134 = vadd.xlane.f32.xlu0 %v2133_v63 }
 0xf67   : > { %v2106_v25 = vpop.permute.xlu1 %2105 }
 0xf68   : > { %v2130_v44 = vsel %vm1840_vm4, %v2106_v25, 0.0 }
 0xf69   : > { %2131 = vadd.xlane.f32.xlu1 %v2130_v44  ;;  %2128 = vadd.xlane.f32.xlu0 %v2127_v46 }
 0xf6b   : > { %v2110_v7 = vpop.permute.xlu1 %2109 }
 0xf6c   : > { %v2136_v2 = vsel %vm1840_vm4, %v2110_v7, 0.0  ;;  %v2112_v5 = vpop.permute.xlu0 %2111 }
 0xf6d   : > { %2137 = vadd.xlane.f32.xlu0 %v2136_v2  ;;  %v2139_v29 = vsel %vm1840_vm4, %v2112_v5, 0.0 }
 0xf6f   : > { %v2114_v27 = vpop.permute.xlu1 %2113 }
 0xf70   : > { %v2116_v36 = vpop.permute.xlu0 %2115  ;;  %v2142_v60 = vsel %vm1840_vm4, %v2114_v27, 0.0 }
 0xf71   : > { %v2145_v57 = vsel %vm1840_vm4, %v2116_v36, 0.0 }
 0xf72   : > { %2146 = vadd.xlane.f32.xlu0 %v2145_v57 }
 0xf73   : > { %v2118_v55 = vpop.permute.xlu1 %2117 }
 0xf74   : > { %v2148_v54 = vsel %vm1840_vm4, %v2118_v55, 0.0 }
 0xf75   : > { %2149 = vadd.xlane.f32.xlu1 %v2148_v54 }
 0xf76   : > { %2140 = vadd.xlane.f32.xlu0 %v2139_v29 }
 0xf79   : > { %2143 = vadd.xlane.f32.xlu1 %v2142_v60 }
 0xf8a   : > { %2204 = vrot.lane.b32.xlu1 %v2202_v33, %s3244_s13 }
 0xf8c   : > { %2188 = vrot.lane.b32.xlu0 %v2186_v51, %s3244_s13 }
 0xfee   : > { %v2135_v3 = vpop.xlane.xlu0 %2134 }
 0xfef   : > { %v2153_v35 = vmul.f32 0.03125, %v2135_v3 }
 0xff1   : > { %v2161_v1 = vadd.f32 1e-05, %v2153_v35 }
 0xff2   : > { %v2132_v61 = vpop.xlane.xlu1 %2131  ;;  %v2129_v8 = vpop.xlane.xlu0 %2128 }
 0xff3   : > { %v2152_v43 = vmul.f32 0.03125, %v2132_v61  ;;  %v2151_v38 = vmul.f32 0.03125, %v2129_v8  ;;  %3210 = vrsqrt.f32 %v2161_v1 }
 0xff5   : > { %v2160_v42 = vadd.f32 1e-05, %v2152_v43  ;;  %v2159_v6 = vadd.f32 1e-05, %v2151_v38 }
 0xff6   : > { %v2138_v49 = vpop.xlane.xlu0 %2137 }
 0xff7   : > { %3212 = vrsqrt.f32 %v2160_v42  ;;  %v2154_v56 = vmul.f32 0.03125, %v2138_v49 }
 0xff8   : > { %3214 = vrsqrt.f32 %v2159_v6 }
 0xff9   : > { %v2162_v10 = vadd.f32 1e-05, %v2154_v56 }
 0xffb   : > { %3216 = vrsqrt.f32 %v2162_v10  ;;  %v2147_v19 = vpop.xlane.xlu0 %2146 }
 0xffc   : > { %v2157_v22 = vmul.f32 0.03125, %v2147_v19 }
 0xffe   : > { %v2150_v37 = vpop.xlane.xlu1 %2149  ;;  %v2165_v58 = vadd.f32 1e-05, %v2157_v22 }
 0xfff   : > { %v2158_v24 = vmul.f32 0.03125, %v2150_v37  ;;  %v2141_v11 = vpop.xlane.xlu0 %2140  ;;  %v3065_v37 = vld [vmem:[%s4010_s6] sm:$0xff]  }
0x1000   : > { %3218 = vrsqrt.f32 %v2165_v58  ;;  %v2155_v52 = vmul.f32 0.03125, %v2141_v11  ;;  %v3211_v39 = vpop.eup %3210 }
0x1001   : > { %v2166_v40 = vadd.f32 1e-05, %v2158_v24  ;;  %v2177_v5 = vmul.f32 %v3211_v39, %v3872_v20  ;;  %v2225_v24 = vsub.s32 5, %v3364_v9 }
0x1002   : > { %v2144_v12 = vpop.xlane.xlu1 %2143  ;;  %v2163_v28 = vadd.f32 1e-05, %v2155_v52 }
0x1003   : > { %3220 = vrsqrt.f32 %v2166_v40  ;;  %v2156_v0 = vmul.f32 0.03125, %v2144_v12  ;;  %v2189_v25 = vpop.permute.xlu0 %2188  ;;  %v2226_v58 = vrot.slane %v3803_v30, %v2225_v24 }
0x1004   : > { %v3213_v17 = vpop.eup %3212  ;;  %3222 = vrsqrt.f32 %v2163_v28  ;;  %v2193_v54 = vmul.f32 %v2189_v25, %v2177_v5 }
0x1005   : > { %v3215_v63 = vpop.eup %3214  ;;  %v2164_v23 = vadd.f32 1e-05, %v2156_v0  ;;  %v2176_v46 = vmul.f32 %v3213_v17, %v3876_v41 }
0x1006   : > { %v2205_v44 = vpop.permute.xlu1 %2204  ;;  %v2175_v7 = vmul.f32 %v3215_v63, %v3867_v13 }
0x1007   : > { %3224 = vrsqrt.f32 %v2164_v23  ;;  %v2192_v2 = vmul.f32 %v2189_v25, %v2176_v46  ;;  %v2209_v18 = vadd.f32 %v2205_v44, %v2193_v54 }
0x1008   : > { %v3217_v27 = vpop.eup %3216  ;;  %v2191_v36 = vmul.f32 %v2189_v25, %v2175_v7 }
0x1009   : > { %v2208_v57 = vadd.f32 %v2205_v44, %v2192_v2  ;;  %v2178_v55 = vmul.f32 %v3217_v27, %v3884_v16 }
0x100a   : > { %v2207_v29 = vadd.f32 %v2205_v44, %v2191_v36 }
0x100b   : > { %v2194_v60 = vmul.f32 %v2189_v25, %v2178_v55 }
0x100c   : > { %v2215_v50 = vpack.c.bf16 %v2208_v57, %v2207_v29 }
0x100d   : > { %v2210_v33 = vadd.f32 %v2205_v44, %v2194_v60  ;;  %v3219_v41 = vpop.eup %3218 }
0x100e   : > { %2231 = vrot.lane.b32.xlu1 %v2215_v50, %s3244_s13  ;;  %v2181_v26 = vmul.f32 %v3219_v41, %v3904_v62 }
0x100f   : > { %v2216_v51 = vpack.c.bf16 %v2210_v33, %v2209_v18 }
0x1010   : > { %v3221_v13 = vpop.eup %3220  ;;  %v2197_v3 = vmul.f32 %v2189_v25, %v2181_v26 }
0x1011   : > { %v2182_v20 = vmul.f32 %v3221_v13, %v3901_v15  ;;  %v3223_v35 = vpop.eup %3222 }
0x1012   : > { %2233 = vrot.lane.b32.xlu1 %v2216_v51, %s3244_s13  ;;  %v2213_v61 = vadd.f32 %v2205_v44, %v2197_v3  ;;  %v2179_v8 = vmul.f32 %v3223_v35, %v3893_v53  ;;  %v2346_v51 = vsub.s32 6, %v3364_v9 }
0x1013   : > { %v2198_v16 = vmul.f32 %v2189_v25, %v2182_v20 }
0x1014   : > { %v3225_v1 = vpop.eup %3224  ;;  %v2195_v42 = vmul.f32 %v2189_v25, %v2179_v8  ;;  %v2347_v13 = vrot.slane %v3803_v30, %v2346_v51 }
0x1015   : > { %v2214_v43 = vadd.f32 %v2205_v44, %v2198_v16  ;;  %v2180_v38 = vmul.f32 %v3225_v1, %v3890_v21  ;;  %v3064_v21 = vld [vmem:[%s4010_s6 + $0x8] sm:$0xff]  }
0x1016   : > { %v2211_v56 = vadd.f32 %v2205_v44, %v2195_v42  ;;  %2921 = vmatprep.subr.bf16.mxu1 %v3064_v21 }
0x1017   : > { %v2218_v6 = vpack.c.bf16 %v2214_v43, %v2213_v61  ;;  %v2196_v49 = vmul.f32 %v2189_v25, %v2180_v38  ;;  %2922 = vmatpush3.bf16.msra.mxu1 %v3064_v21 }
0x1018   : > { %2923 = vmatprep.subr.bf16.mxu1 %v3065_v37 }
0x1019   : > { %2237 = vrot.lane.b32.xlu1 %v2218_v6, %s3244_s13  ;;  %v2212_v62 = vadd.f32 %v2205_v44, %v2196_v49 }
0x101b   : > { %v2217_v15 = vpack.c.bf16 %v2212_v62, %v2211_v56  ;;  %2924 = vmatpush3.bf16.msra.mxu1 %v3065_v37 }
0x101d   : > { %2235 = vrot.lane.b32.xlu0 %v2217_v15, %s3244_s13 }
0x1080   : > { %v2232_v10 = vpop.permute.xlu1 %2231 }
0x1081   : > { %2913 = vmatprep.mubr.msk.bf16.mxu0 %vm1840_vm4, %v2232_v10 }
0x1084   : > { %v2234_v19 = vpop.permute.xlu1 %2233 }
0x1085   : > { %2914 = vmatmul.mubr.msk.bf16.vlgmr.msra.gmra.mxu0 %vm1840_vm4, %v2234_v19 }
0x108b   : > { %v2238_v22 = vpop.permute.xlu1 %2237 }
0x108f   : > { %v2236_v53 = vpop.permute.xlu0 %2235 }
0x1090   : > { %2917 = vmatprep.mubr.msk.bf16.mxu0 %vm1840_vm4, %v2236_v53 }
0x1091   : > { %2918 = vmatmul.mubr.msk.bf16.gmra.mxu0 %vm1840_vm4, %v2238_v22 }
0x1145   : > { %v2915_v31 = vpop.f32.mrf.mxu0 }
0x1146   : > { %v2306_v39 = vadd.f32 %v2915_v31, %v2226_v58 }
0x1147   : > { %v2297_v40 = vpop.f32.mrf.mxu0 }
0x1148   : > { %v2298_v52 = vadd.f32 %v2297_v40, %v2226_v58  ;;  %v2330_v25 = vmax.f32 %v2306_v39, 0.0 }
0x1149   : > { %v2916_v11 = vpop.f32.mrf.mxu0 }
0x114a   : > { %v2309_v12 = vadd.f32 %v2916_v11, %v2226_v58  ;;  %v2328_v63 = vmax.f32 %v2298_v52, 0.0 }
0x114b   : > { %v2300_v0 = vpop.f32.mrf.mxu0 }
0x114c   : > { %v2301_v17 = vadd.f32 %v2300_v0, %v2226_v58  ;;  %v2331_v28 = vmax.f32 %v2309_v12, 0.0 }
0x114e   : > { %v2329_v23 = vmax.f32 %v2301_v17, 0.0  ;;  %v2337_v44 = vpack.c.bf16 %v2331_v28, %v2330_v25 }
0x1150   : > { %v2336_v46 = vpack.c.bf16 %v2329_v23, %v2328_v63 }
0x1151   : > { %v2919_v7 = vpop.f32.mrf.mxu0 }
0x1152   : > { %2925 = vmatprep.mubr.msk.bf16.mxu1 %vm1840_vm4, %v2336_v46  ;;  %v2322_v57 = vadd.f32 %v2919_v7, %v2226_v58 }
0x1153   : > { %2926 = vmatmul.mubr.msk.bf16.vlgmr.msra.gmra.mxu1 %vm1840_vm4, %v2337_v44  ;;  %v2313_v2 = vpop.f32.mrf.mxu0 }
0x1154   : > { %v2314_v27 = vadd.f32 %v2313_v2, %v2226_v58  ;;  %v2334_v18 = vmax.f32 %v2322_v57, 0.0 }
0x1155   : > { %v2920_v5 = vpop.f32.mrf.mxu0 }
0x1156   : > { %v2325_v36 = vadd.f32 %v2920_v5, %v2226_v58  ;;  %v2332_v60 = vmax.f32 %v2314_v27, 0.0 }
0x1157   : > { %v2316_v55 = vpop.f32.mrf.mxu0 }
0x1158   : > { %v2317_v54 = vadd.f32 %v2316_v55, %v2226_v58  ;;  %v2335_v29 = vmax.f32 %v2325_v36, 0.0 }
0x115a   : > { %v2333_v50 = vmax.f32 %v2317_v54, 0.0  ;;  %v2339_v41 = vpack.c.bf16 %v2335_v29, %v2334_v18 }
0x115c   : > { %v2338_v33 = vpack.c.bf16 %v2333_v50, %v2332_v60 }
0x115e   : > { %2929 = vmatprep.mubr.msk.bf16.mxu1 %vm1840_vm4, %v2338_v33 }
0x115f   : > { %2930 = vmatmul.mubr.msk.bf16.gmra.mxu1 %vm1840_vm4, %v2339_v41 }
0x1213   : > { %v2927_v26 = vpop.f32.mrf.mxu1 }
0x1214   : > { %v2415_v20 = vadd.f32 %v2927_v26, %v2347_v13 }
0x1215   : > { %v2406_v3 = vpop.f32.mrf.mxu1 }
0x1216   : > { %2449 = vrot.lane.b32.xlu0 %v2415_v20, %s3244_s13  ;;  %v2407_v16 = vadd.f32 %v2406_v3, %v2347_v13 }
0x1217   : > { %v2928_v35 = vpop.f32.mrf.mxu1 }
0x1218   : > { %v2418_v1 = vadd.f32 %v2928_v35, %v2347_v13 }
0x1219   : > { %v2409_v61 = vpop.f32.mrf.mxu1 }
0x121a   : > { %2451 = vrot.lane.b32.xlu1 %v2418_v1, %s3244_s13  ;;  %2445 = vrot.lane.b32.xlu0 %v2407_v16, %s3244_s13  ;;  %v2410_v8 = vadd.f32 %v2409_v61, %v2347_v13 }
0x121e   : > { %2447 = vrot.lane.b32.xlu1 %v2410_v8, %s3244_s13 }
0x121f   : > { %v2931_v43 = vpop.f32.mrf.mxu1 }
0x1220   : > { %v2431_v6 = vadd.f32 %v2931_v43, %v2347_v13 }
0x1221   : > { %v2422_v9 = vpop.f32.mrf.mxu1 }
0x1222   : > { %v2423_v38 = vadd.f32 %v2422_v9, %v2347_v13 }
0x1223   : > { %v2932_v30 = vpop.f32.mrf.mxu1 }
0x1224   : > { %2453 = vrot.lane.b32.xlu0 %v2423_v38, %s3244_s13  ;;  %v2434_v56 = vadd.f32 %v2932_v30, %v2347_v13 }
0x1225   : > { %v2425_v42 = vpop.f32.mrf.mxu1 }
0x1226   : > { %v2426_v49 = vadd.f32 %v2425_v42, %v2347_v13 }
0x1228   : > { %2455 = vrot.lane.b32.xlu1 %v2426_v49, %s3244_s13  ;;  %2457 = vrot.lane.b32.xlu0 %v2431_v6, %s3244_s13 }
0x122c   : > { %2459 = vrot.lane.b32.xlu1 %v2434_v56, %s3244_s13 }
0x1288   : > { %v2450_v62 = vpop.permute.xlu0 %2449 }
0x1289   : > { %v2471_v15 = vadd.f32 %v3825_v59, %v2450_v62 }
0x128b   : > { %2489 = vrot.lane.b32.xlu0 %v2471_v15, %s3244_s13 }
0x128c   : > { %v2446_v10 = vpop.permute.xlu0 %2445  ;;  %v2452_v19 = vpop.permute.xlu1 %2451 }
0x128d   : > { %v2469_v53 = vadd.f32 %v3820_v34, %v2446_v10  ;;  %v2472_v22 = vadd.f32 %v3834_v48, %v2452_v19 }
0x128f   : > { %2485 = vrot.lane.b32.xlu0 %v2469_v53, %s3244_s13  ;;  %2491 = vrot.lane.b32.xlu1 %v2472_v22, %s3244_s13 }
0x1290   : > { %v2448_v21 = vpop.permute.xlu1 %2447 }
0x1291   : > { %v2470_v37 = vadd.f32 %v3828_v14, %v2448_v21 }
0x1293   : > { %2487 = vrot.lane.b32.xlu1 %v2470_v37, %s3244_s13 }
0x1296   : > { %v2454_v24 = vpop.permute.xlu0 %2453 }
0x1297   : > { %v2473_v59 = vadd.f32 %v3842_v45, %v2454_v24 }
0x1299   : > { %2493 = vrot.lane.b32.xlu0 %v2473_v59, %s3244_s13 }
0x129a   : > { %v2458_v31 = vpop.permute.xlu0 %2457  ;;  %v2456_v58 = vpop.permute.xlu1 %2455 }
0x129b   : > { %v2475_v34 = vadd.f32 %v3852_v4, %v2458_v31  ;;  %v2474_v48 = vadd.f32 %v3840_v47, %v2456_v58 }
0x129d   : > { %2497 = vrot.lane.b32.xlu0 %v2475_v34, %s3244_s13  ;;  %2495 = vrot.lane.b32.xlu1 %v2474_v48, %s3244_s13 }
0x129e   : > { %v2460_v40 = vpop.permute.xlu1 %2459 }
0x129f   : > { %v2476_v14 = vadd.f32 %v3850_v32, %v2460_v40 }
0x12a1   : > { %2499 = vrot.lane.b32.xlu1 %v2476_v14, %s3244_s13 }
0x12fd   : > { %v2490_v45 = vpop.permute.xlu0 %2489 }
0x12fe   : > { %2511 = vst.msk [vmem:[%s302_s30 + $0x10] sm:$0xff] %vm1840_vm4, %v2490_v45 }
0x1301   : > { %v2486_v4 = vpop.permute.xlu0 %2485  ;;  %v2492_v11 = vpop.permute.xlu1 %2491 }
0x1302   : > { %2509 = vst.msk [vmem:[%s302_s30] sm:$0xff] %vm1840_vm4, %v2486_v4  ;;  %2512 = vst.msk [vmem:[%s302_s30 + $0x18] sm:$0xff] %vm1840_vm4, %v2492_v11 }
0x1305   : > { %v2488_v47 = vpop.permute.xlu1 %2487 }
0x1306   : > { %2510 = vst.msk [vmem:[%s302_s30 + $0x8] sm:$0xff] %vm1840_vm4, %v2488_v47 }
0x130b   : > { %v2494_v32 = vpop.permute.xlu0 %2493 }
0x130c   : > { %2513 = vst.msk [vmem:[%s302_s30 + $0x20] sm:$0xff] %vm1840_vm4, %v2494_v32 }
0x130f   : > { %v2498_v52 = vpop.permute.xlu0 %2497  ;;  %v2496_v12 = vpop.permute.xlu1 %2495 }
0x1310   : > { %2515 = vst.msk [vmem:[%s302_s30 + $0x30] sm:$0xff] %vm1840_vm4, %v2498_v52  ;;  %2514 = vst.msk [vmem:[%s302_s30 + $0x28] sm:$0xff] %vm1840_vm4, %v2496_v12 }
0x1313   : > { %v2500_v39 = vpop.permute.xlu1 %2499 }
0x1314   : > { %2516 = vst.msk [vmem:[%s302_s30 + $0x38] sm:$0xff] %vm1840_vm4, %v2500_v39 }
0x1315 PF: > { %s17_s24 = sadd.s32 1, %s3241_s24  }
0x1316   : > { %p14_p4 = scmp.ge.s32.totalorder %s17_s24, 4  }
0x1318   :  { %16 = sbr.rel (!%p14_p4) target bundleno = 1 (0x1), region = 81 }

</bundles_post_ra>
